<compile_context>
chip_gen: v7x
topology: tpu7x:2x2x1
jax: 0.10.0
libtpu: 0.0.40
codegen_flags: <defaults>
</compile_context>

<pallas_src>
import functools

import jax
import jax.numpy as jnp
from jax.experimental import pallas as pl
from jax.experimental.pallas import tpu as pltpu

LANE = 128


def _round_up(x, m):
    return (x + m - 1) // m * m


# ----------------------------------------------------------------------------
# Pallas kernel: fused (im2col'd) matmul + bias + activation.
#   x_ref: (TM, Kp)  bf16   im2col patch rows (K zero-padded to 128 multiple)
#   w_ref: (Kp, Np)  bf16   conv weight, Cout zero-padded to 128 lanes
#   b_ref: (1,  Np)  f32
#   o_ref: (TM, Np)  f32    lane-dense output block
# ----------------------------------------------------------------------------
def _make_fused_kernel(act):
    def kernel(x_ref, w_ref, b_ref, o_ref):
        acc = jnp.dot(x_ref[...], w_ref[...],
                      preferred_element_type=jnp.float32)
        acc = acc + b_ref[...]
        if act == "relu":
            acc = jnp.maximum(acc, 0.0)
        elif act == "sigmoid":
            acc = jax.nn.sigmoid(acc)
        elif act == "tanh":
            acc = jnp.tanh(acc)
        o_ref[...] = acc
    return kernel


def fused_matmul_bias_act(x, w, b, act, *, tm):
    """x: (Mp, Kp) bf16, w: (Kp, Np) bf16, b: (1, Np) f32 -> (Mp, Np) f32."""
    M, K = x.shape
    Kw, N = w.shape
    assert Kw == K and M % tm == 0 and N % LANE == 0 and K % LANE == 0
    return pl.pallas_call(
        _make_fused_kernel(act),
        out_shape=jax.ShapeDtypeStruct((M, N), jnp.float32),
        grid_spec=pltpu.PrefetchScalarGridSpec(
            num_scalar_prefetch=0,
            grid=(M // tm,),
            in_specs=[
                pl.BlockSpec((tm, K), lambda i: (i, 0)),   # row tile of im2col
                pl.BlockSpec((K, N), lambda i: (0, 0)),    # weights (resident)
                pl.BlockSpec((1, N), lambda i: (0, 0)),    # bias
            ],
            out_specs=pl.BlockSpec((tm, N), lambda i: (i, 0)),
        ),
        compiler_params=pltpu.CompilerParams(
            dimension_semantics=("parallel",)),
    )(x, w, b)


# Pure-jnp twin doing the identical math (validates the Pallas kernel).
def jnp_matmul_bias_act(x, w, b, act, *, tm):
    del tm
    acc = jnp.dot(x, w, preferred_element_type=jnp.float32,
                  precision=jax.lax.Precision.HIGHEST) + b
    if act == "relu":
        acc = jnp.maximum(acc, 0.0)
    elif act == "sigmoid":
        acc = jax.nn.sigmoid(acc)
    elif act == "tanh":
        acc = jnp.tanh(acc)
    return acc


# ----------------------------------------------------------------------------
# Model config: (Cin, Cout, K, padding, stride, fused activation after conv)
# ----------------------------------------------------------------------------
CFGS = [
    (1, 16, 1, 0, 1, "relu"),      # self.conv   -> relu
    (16, 32, 3, 1, 1, "sigmoid"),  # self.conv1  -> sigmoid
    (32, 32, 6, 4, 1, "tanh"),     # self.conv2  -> tanh
    (32, 64, 3, 1, 2, None),       # self.conv3
    (64, 1, 2, 0, 1, None),        # self.conv4
]


def prepare_params(params, compute_dtype=jnp.bfloat16):
    """One-time hoisted weight prep: ConvTranspose2d weight (Cin,Cout,KH,KW)
    -> direct-conv matmul weight (KH*KW*Cin, Cout), K/Cout zero-padded to
    lane multiples, cast to the MXU compute dtype; bias padded to (1, Np)."""
    prepped = []
    for (w_t, b), (ci, co, k, p, s, act) in zip(params, CFGS):
        # flip spatially + swap in/out channels -> (KH, KW, Cin, Cout)
        w = jnp.transpose(w_t[:, :, ::-1, ::-1], (2, 3, 0, 1))
        w = w.reshape(k * k * ci, co).astype(jnp.float32)
        Kp = _round_up(k * k * ci, LANE)
        Np = _round_up(co, LANE)
        w = jnp.pad(w, ((0, Kp - w.shape[0]), (0, Np - co))).astype(compute_dtype)
        b_pad = jnp.pad(b.astype(jnp.float32), (0, Np - co)).reshape(1, Np)
        prepped.append((w, b_pad))
    return prepped


def _im2col(x_pad, KH, KW, Ho, Wo):
    # (Hp, Wp, Cin) -> (Ho*Wo, KH*KW*Cin), column order (kh, kw, cin)
    Cin = x_pad.shape[-1]
    cols = []
    for kh in range(KH):
        for kw in range(KW):
            cols.append(x_pad[kh:kh + Ho, kw:kw + Wo, :].reshape(Ho * Wo, Cin))
    return jnp.concatenate(cols, axis=-1)


def forward_im2col(x_nchw, prepped, matmul_fn):
    x = jnp.transpose(x_nchw[0], (1, 2, 0)).astype(jnp.float32)  # CHW -> HWC
    for (w, b), (ci, co, k, p, s, act) in zip(prepped, CFGS):
        H, W, Cin = x.shape
        assert Cin == ci
        if s > 1:
            # ConvTranspose fractional stride = zero-dilated input.
            # (Polyphase decomposition would skip the structural zeros; the
            #  layer is no longer MXU-bound so it is left simple.)
            Hd, Wd = (H - 1) * s + 1, (W - 1) * s + 1
            x = jnp.zeros((Hd, Wd, Cin), x.dtype).at[::s, ::s, :].set(x)
            H, W = Hd, Wd
        ph = k - 1 - p
        x_pad = jnp.pad(x, ((ph, ph), (ph, ph), (0, 0)))
        Ho = H + 2 * ph - k + 1
        Wo = W + 2 * ph - k + 1
        cols = _im2col(x_pad, k, k, Ho, Wo)              # (Ho*Wo, k*k*Cin)
        M, K = cols.shape
        Kp, Np = w.shape
        tm = min(512, _round_up(M, 16))                  # row tile (M axis)
        Mp = _round_up(M, tm)
        cols = jnp.pad(cols, ((0, Mp - M), (0, Kp - K))).astype(w.dtype)
        out = matmul_fn(cols, w, b, act, tm=tm)          # (Mp, Np) f32
        x = out[:M, :co].reshape(Ho, Wo, co)
    return jnp.transpose(x, (2, 0, 1))[None]             # HWC -> NCHW


# Independent f32 reference for the ConvTranspose2d lowering (pure XLA).
def forward_lax_f32(x_nchw, params):
    x = x_nchw.astype(jnp.float32)
    for (w_t, b), (ci, co, k, p, s, act) in zip(params, CFGS):
        w_oihw = jnp.transpose(w_t[:, :, ::-1, ::-1], (1, 0, 2, 3))
        x = jax.lax.conv_general_dilated(
            x, w_oihw, window_strides=(1, 1),
            padding=[(k - 1 - p, k - 1 - p)] * 2,
            lhs_dilation=(s, s),
            dimension_numbers=("NCHW", "OIHW", "NCHW"),
            precision=jax.lax.Precision.HIGHEST,
        ) + b.reshape(1, co, 1, 1)
        if act == "relu":
            x = jnp.maximum(x, 0.0)
        elif act == "sigmoid":
            x = jax.nn.sigmoid(x)
        elif act == "tanh":
            x = jnp.tanh(x)
    return x


if __name__ == "__main__":
    key = jax.random.PRNGKey(0)
    H = W = 16  # small spatial (module uses 64x64); chain 16->16->16->13->25->26
    keys = jax.random.split(key, len(CFGS) + 1)
    x_nchw = jax.random.normal(keys[0], (1, 1, H, W), jnp.float32)

    params = []
    for i, (ci, co, k, p, s, act) in enumerate(CFGS):
        wk, bk = jax.random.split(keys[i + 1])
        w = jax.random.normal(wk, (ci, co, k, k), jnp.float32) * 0.1
        b = jax.random.normal(bk, (co,), jnp.float32) * 0.1
        params.append((w, b))

    # One-time hoisted weight preprocessing (bf16 for the MXU path).
    prepped_bf16 = prepare_params(params, jnp.bfloat16)
    prepped_f32 = prepare_params(params, jnp.float32)

    fwd_pallas = jax.jit(
        functools.partial(forward_im2col, matmul_fn=fused_matmul_bias_act))
    out = jax.block_until_ready(fwd_pallas(x_nchw, prepped_bf16))

    # 1) Kernel check: identical bf16-input / f32-accum math in pure jnp.
    ref_bf16 = forward_im2col(x_nchw, prepped_bf16, jnp_matmul_bias_act)
    # 2) Lowering check (f32, no bf16 noise): im2col path vs XLA conv_transpose.
    ref_f32_im2col = forward_im2col(x_nchw, prepped_f32, jnp_matmul_bias_act)
    ref_f32_lax = forward_lax_f32(x_nchw, params)

    assert out.shape == (1, 1, 26, 26), out.shape
    assert out.dtype == jnp.float32
    assert jnp.allclose(out, ref_bf16, atol=1e-2, rtol=1e-2), \
        float(jnp.max(jnp.abs(out - ref_bf16)))
    assert jnp.allclose(ref_f32_im2col, ref_f32_lax, atol=1e-4, rtol=1e-4), \
        float(jnp.max(jnp.abs(ref_f32_im2col - ref_f32_lax)))
    print("KERNEL_OK")
</pallas_src>

<mosaic_0001>
module attributes {stable_mosaic.version = 11 : i64} {
  func.func @kernel(%arg0: i32, %arg1: memref<256x128xbf16, #tpu.memory_space<vmem>>, %arg2: memref<128x128xbf16, #tpu.memory_space<vmem>>, %arg3: memref<1x128xf32, #tpu.memory_space<vmem>>, %arg4: memref<256x128xf32, #tpu.memory_space<vmem>>) attributes {dimension_semantics = [#tpu.dimension_semantics<parallel>], iteration_bounds = array<i64: 1>, scalar_prefetch = 0 : i64, scratch_operands = 0 : i64, tpu.core_type = #tpu.core_type<tc>, window_params = [{transform_indices = @transform_0, window_bounds = array<i64: 256, 128>}, {pipeline_mode = #tpu.pipeline_mode<synchronous>, transform_indices = @transform_1, window_bounds = array<i64: 128, 128>}, {pipeline_mode = #tpu.pipeline_mode<synchronous>, transform_indices = @transform_2, window_bounds = array<i64: 1, 128>}, {transform_indices = @transform_3, window_bounds = array<i64: 256, 128>}]} {
    %c0 = arith.constant 0 : index
    %c0_0 = arith.constant 0 : index
    %0 = vector.load %arg1[%c0, %c0_0] : memref<256x128xbf16, #tpu.memory_space<vmem>>, vector<256x128xbf16>
    %c0_1 = arith.constant 0 : index
    %c0_2 = arith.constant 0 : index
    %1 = vector.load %arg2[%c0_1, %c0_2] : memref<128x128xbf16, #tpu.memory_space<vmem>>, vector<128x128xbf16>
    %cst = arith.constant dense<0.000000e+00> : vector<256x128xf32>
    %2 = tpu.matmul %0, %1, %cst {dimension_numbers = #tpu.dot_dimension_numbers<[1], [0], [0], [1], [0, 0, 1, 1], [], []>} : vector<256x128xbf16>, vector<128x128xbf16>, vector<256x128xf32> -> vector<256x128xf32>
    %c0_3 = arith.constant 0 : index
    %c0_4 = arith.constant 0 : index
    %3 = vector.load %arg3[%c0_3, %c0_4] : memref<1x128xf32, #tpu.memory_space<vmem>>, vector<1x128xf32>
    %4 = vector.broadcast %3 : vector<1x128xf32> to vector<256x128xf32>
    %5 = arith.addf %2, %4 : vector<256x128xf32>
    %cst_5 = arith.constant 0.000000e+00 : f32
    %6 = vector.broadcast %cst_5 : f32 to vector<256x128xf32>
    %7 = arith.maximumf %5, %6 : vector<256x128xf32>
    %c0_6 = arith.constant 0 : index
    %c0_7 = arith.constant 0 : index
    %8 = vector.load %arg4[%c0_6, %c0_7] : memref<256x128xf32, #tpu.memory_space<vmem>>, vector<256x128xf32>
    tpu.vector_store %arg4[%c0_6, %c0_7], %7 {strides = array<i32>} : memref<256x128xf32, #tpu.memory_space<vmem>>, vector<256x128xf32>,
    return
  }
  func.func @transform_0(%arg0: i32) -> (i32, i32) {
    %c0_i32 = arith.constant 0 : i32
    %c0_i32_0 = arith.constant 0 : i32
    return %arg0, %c0_i32 : i32, i32
  }
  func.func @transform_1(%arg0: i32) -> (i32, i32) {
    %c0_i32 = arith.constant 0 : i32
    %c0_i32_0 = arith.constant 0 : i32
    %c0_i32_1 = arith.constant 0 : i32
    return %c0_i32, %c0_i32_0 : i32, i32
  }
  func.func @transform_2(%arg0: i32) -> (i32, i32) {
    %c0_i32 = arith.constant 0 : i32
    %c0_i32_0 = arith.constant 0 : i32
    %c0_i32_1 = arith.constant 0 : i32
    return %c0_i32, %c0_i32_0 : i32, i32
  }
  func.func @transform_3(%arg0: i32) -> (i32, i32) {
    %c0_i32 = arith.constant 0 : i32
    %c0_i32_0 = arith.constant 0 : i32
    return %arg0, %c0_i32 : i32, i32
  }
}

module attributes {stable_mosaic.version = 11 : i64} {
  func.func @kernel(%arg0: i32, %arg1: memref<256x256xbf16, #tpu.memory_space<vmem>>, %arg2: memref<256x128xbf16, #tpu.memory_space<vmem>>, %arg3: memref<1x128xf32, #tpu.memory_space<vmem>>, %arg4: memref<256x128xf32, #tpu.memory_space<vmem>>) attributes {dimension_semantics = [#tpu.dimension_semantics<parallel>], iteration_bounds = array<i64: 1>, scalar_prefetch = 0 : i64, scratch_operands = 0 : i64, tpu.core_type = #tpu.core_type<tc>, window_params = [{transform_indices = @transform_0, window_bounds = array<i64: 256, 256>}, {pipeline_mode = #tpu.pipeline_mode<synchronous>, transform_indices = @transform_1, window_bounds = array<i64: 256, 128>}, {pipeline_mode = #tpu.pipeline_mode<synchronous>, transform_indices = @transform_2, window_bounds = array<i64: 1, 128>}, {transform_indices = @transform_3, window_bounds = array<i64: 256, 128>}]} {
    %c0 = arith.constant 0 : index
    %c0_0 = arith.constant 0 : index
    %0 = vector.load %arg1[%c0, %c0_0] : memref<256x256xbf16, #tpu.memory_space<vmem>>, vector<256x256xbf16>
    %c0_1 = arith.constant 0 : index
    %c0_2 = arith.constant 0 : index
    %1 = vector.load %arg2[%c0_1, %c0_2] : memref<256x128xbf16, #tpu.memory_space<vmem>>, vector<256x128xbf16>
    %cst = arith.constant dense<0.000000e+00> : vector<256x128xf32>
    %2 = tpu.matmul %0, %1, %cst {dimension_numbers = #tpu.dot_dimension_numbers<[1], [0], [0], [1], [0, 0, 1, 1], [], []>} : vector<256x256xbf16>, vector<256x128xbf16>, vector<256x128xf32> -> vector<256x128xf32>
    %c0_3 = arith.constant 0 : index
    %c0_4 = arith.constant 0 : index
    %3 = vector.load %arg3[%c0_3, %c0_4] : memref<1x128xf32, #tpu.memory_space<vmem>>, vector<1x128xf32>
    %4 = vector.broadcast %3 : vector<1x128xf32> to vector<256x128xf32>
    %5 = arith.addf %2, %4 : vector<256x128xf32>
    %6 = arith.negf %5 : vector<256x128xf32>
    %7 = math.exp %6 : vector<256x128xf32>
    %cst_5 = arith.constant 1.000000e+00 : f32
    %8 = vector.broadcast %cst_5 : f32 to vector<256x128xf32>
    %9 = arith.addf %8, %7 : vector<256x128xf32>
    %10 = arith.divf %8, %9 : vector<256x128xf32>
    %c0_6 = arith.constant 0 : index
    %c0_7 = arith.constant 0 : index
    %11 = vector.load %arg4[%c0_6, %c0_7] : memref<256x128xf32, #tpu.memory_space<vmem>>, vector<256x128xf32>
    tpu.vector_store %arg4[%c0_6, %c0_7], %10 {strides = array<i32>} : memref<256x128xf32, #tpu.memory_space<vmem>>, vector<256x128xf32>,
    return
  }
  func.func @transform_0(%arg0: i32) -> (i32, i32) {
    %c0_i32 = arith.constant 0 : i32
    %c0_i32_0 = arith.constant 0 : i32
    return %arg0, %c0_i32 : i32, i32
  }
  func.func @transform_1(%arg0: i32) -> (i32, i32) {
    %c0_i32 = arith.constant 0 : i32
    %c0_i32_0 = arith.constant 0 : i32
    %c0_i32_1 = arith.constant 0 : i32
    return %c0_i32, %c0_i32_0 : i32, i32
  }
  func.func @transform_2(%arg0: i32) -> (i32, i32) {
    %c0_i32 = arith.constant 0 : i32
    %c0_i32_0 = arith.constant 0 : i32
    %c0_i32_1 = arith.constant 0 : i32
    return %c0_i32, %c0_i32_0 : i32, i32
  }
  func.func @transform_3(%arg0: i32) -> (i32, i32) {
    %c0_i32 = arith.constant 0 : i32
    %c0_i32_0 = arith.constant 0 : i32
    return %arg0, %c0_i32 : i32, i32
  }
}

module attributes {stable_mosaic.version = 11 : i64} {
  func.func @kernel(%arg0: i32, %arg1: memref<176x1152xbf16, #tpu.memory_space<vmem>>, %arg2: memref<1152x128xbf16, #tpu.memory_space<vmem>>, %arg3: memref<1x128xf32, #tpu.memory_space<vmem>>, %arg4: memref<176x128xf32, #tpu.memory_space<vmem>>) attributes {dimension_semantics = [#tpu.dimension_semantics<parallel>], iteration_bounds = array<i64: 1>, scalar_prefetch = 0 : i64, scratch_operands = 0 : i64, tpu.core_type = #tpu.core_type<tc>, window_params = [{transform_indices = @transform_0, window_bounds = array<i64: 176, 1152>}, {pipeline_mode = #tpu.pipeline_mode<synchronous>, transform_indices = @transform_1, window_bounds = array<i64: 1152, 128>}, {pipeline_mode = #tpu.pipeline_mode<synchronous>, transform_indices = @transform_2, window_bounds = array<i64: 1, 128>}, {transform_indices = @transform_3, window_bounds = array<i64: 176, 128>}]} {
    %c0 = arith.constant 0 : index
    %c0_0 = arith.constant 0 : index
    %0 = vector.load %arg1[%c0, %c0_0] : memref<176x1152xbf16, #tpu.memory_space<vmem>>, vector<176x1152xbf16>
    %c0_1 = arith.constant 0 : index
    %c0_2 = arith.constant 0 : index
    %1 = vector.load %arg2[%c0_1, %c0_2] : memref<1152x128xbf16, #tpu.memory_space<vmem>>, vector<1152x128xbf16>
    %cst = arith.constant dense<0.000000e+00> : vector<176x128xf32>
    %2 = tpu.matmul %0, %1, %cst {dimension_numbers = #tpu.dot_dimension_numbers<[1], [0], [0], [1], [0, 0, 1, 1], [], []>} : vector<176x1152xbf16>, vector<1152x128xbf16>, vector<176x128xf32> -> vector<176x128xf32>
    %c0_3 = arith.constant 0 : index
    %c0_4 = arith.constant 0 : index
    %3 = vector.load %arg3[%c0_3, %c0_4] : memref<1x128xf32, #tpu.memory_space<vmem>>, vector<1x128xf32>
    %4 = vector.broadcast %3 : vector<1x128xf32> to vector<176x128xf32>
    %5 = arith.addf %2, %4 : vector<176x128xf32>
    %6 = math.tanh %5 : vector<176x128xf32>
    %c0_5 = arith.constant 0 : index
    %c0_6 = arith.constant 0 : index
    %7 = vector.load %arg4[%c0_5, %c0_6] : memref<176x128xf32, #tpu.memory_space<vmem>>, vector<176x128xf32>
    tpu.vector_store %arg4[%c0_5, %c0_6], %6 {strides = array<i32>} : memref<176x128xf32, #tpu.memory_space<vmem>>, vector<176x128xf32>,
    return
  }
  func.func @transform_0(%arg0: i32) -> (i32, i32) {
    %c0_i32 = arith.constant 0 : i32
    %c0_i32_0 = arith.constant 0 : i32
    return %arg0, %c0_i32 : i32, i32
  }
  func.func @transform_1(%arg0: i32) -> (i32, i32) {
    %c0_i32 = arith.constant 0 : i32
    %c0_i32_0 = arith.constant 0 : i32
    %c0_i32_1 = arith.constant 0 : i32
    return %c0_i32, %c0_i32_0 : i32, i32
  }
  func.func @transform_2(%arg0: i32) -> (i32, i32) {
    %c0_i32 = arith.constant 0 : i32
    %c0_i32_0 = arith.constant 0 : i32
    %c0_i32_1 = arith.constant 0 : i32
    return %c0_i32, %c0_i32_0 : i32, i32
  }
  func.func @transform_3(%arg0: i32) -> (i32, i32) {
    %c0_i32 = arith.constant 0 : i32
    %c0_i32_0 = arith.constant 0 : i32
    return %arg0, %c0_i32 : i32, i32
  }
}

module attributes {stable_mosaic.version = 11 : i64} {
  func.func @kernel(%arg0: i32, %arg1: memref<512x384xbf16, #tpu.memory_space<vmem>>, %arg2: memref<384x128xbf16, #tpu.memory_space<vmem>>, %arg3: memref<1x128xf32, #tpu.memory_space<vmem>>, %arg4: memref<512x128xf32, #tpu.memory_space<vmem>>) attributes {dimension_semantics = [#tpu.dimension_semantics<parallel>], iteration_bounds = array<i64: 2>, scalar_prefetch = 0 : i64, scratch_operands = 0 : i64, tpu.core_type = #tpu.core_type<tc>, window_params = [{transform_indices = @transform_0, window_bounds = array<i64: 512, 384>}, {pipeline_mode = #tpu.pipeline_mode<synchronous>, transform_indices = @transform_1, window_bounds = array<i64: 384, 128>}, {pipeline_mode = #tpu.pipeline_mode<synchronous>, transform_indices = @transform_2, window_bounds = array<i64: 1, 128>}, {transform_indices = @transform_3, window_bounds = array<i64: 512, 128>}]} {
    %c0 = arith.constant 0 : index
    %c0_0 = arith.constant 0 : index
    %0 = vector.load %arg1[%c0, %c0_0] : memref<512x384xbf16, #tpu.memory_space<vmem>>, vector<512x384xbf16>
    %c0_1 = arith.constant 0 : index
    %c0_2 = arith.constant 0 : index
    %1 = vector.load %arg2[%c0_1, %c0_2] : memref<384x128xbf16, #tpu.memory_space<vmem>>, vector<384x128xbf16>
    %cst = arith.constant dense<0.000000e+00> : vector<512x128xf32>
    %2 = tpu.matmul %0, %1, %cst {dimension_numbers = #tpu.dot_dimension_numbers<[1], [0], [0], [1], [0, 0, 1, 1], [], []>} : vector<512x384xbf16>, vector<384x128xbf16>, vector<512x128xf32> -> vector<512x128xf32>
    %c0_3 = arith.constant 0 : index
    %c0_4 = arith.constant 0 : index
    %3 = vector.load %arg3[%c0_3, %c0_4] : memref<1x128xf32, #tpu.memory_space<vmem>>, vector<1x128xf32>
    %4 = vector.broadcast %3 : vector<1x128xf32> to vector<512x128xf32>
    %5 = arith.addf %2, %4 : vector<512x128xf32>
    %c0_5 = arith.constant 0 : index
    %c0_6 = arith.constant 0 : index
    %6 = vector.load %arg4[%c0_5, %c0_6] : memref<512x128xf32, #tpu.memory_space<vmem>>, vector<512x128xf32>
    tpu.vector_store %arg4[%c0_5, %c0_6], %5 {strides = array<i32>} : memref<512x128xf32, #tpu.memory_space<vmem>>, vector<512x128xf32>,
    return
  }
  func.func @transform_0(%arg0: i32) -> (i32, i32) {
    %c0_i32 = arith.constant 0 : i32
    %c0_i32_0 = arith.constant 0 : i32
    return %arg0, %c0_i32 : i32, i32
  }
  func.func @transform_1(%arg0: i32) -> (i32, i32) {
    %c0_i32 = arith.constant 0 : i32
    %c0_i32_0 = arith.constant 0 : i32
    %c0_i32_1 = arith.constant 0 : i32
    return %c0_i32, %c0_i32_0 : i32, i32
  }
  func.func @transform_2(%arg0: i32) -> (i32, i32) {
    %c0_i32 = arith.constant 0 : i32
    %c0_i32_0 = arith.constant 0 : i32
    %c0_i32_1 = arith.constant 0 : i32
    return %c0_i32, %c0_i32_0 : i32, i32
  }
  func.func @transform_3(%arg0: i32) -> (i32, i32) {
    %c0_i32 = arith.constant 0 : i32
    %c0_i32_0 = arith.constant 0 : i32
    return %arg0, %c0_i32 : i32, i32
  }
}

module attributes {stable_mosaic.version = 11 : i64} {
  func.func @kernel(%arg0: i32, %arg1: memref<512x256xbf16, #tpu.memory_space<vmem>>, %arg2: memref<256x128xbf16, #tpu.memory_space<vmem>>, %arg3: memref<1x128xf32, #tpu.memory_space<vmem>>, %arg4: memref<512x128xf32, #tpu.memory_space<vmem>>) attributes {dimension_semantics = [#tpu.dimension_semantics<parallel>], iteration_bounds = array<i64: 2>, scalar_prefetch = 0 : i64, scratch_operands = 0 : i64, tpu.core_type = #tpu.core_type<tc>, window_params = [{transform_indices = @transform_0, window_bounds = array<i64: 512, 256>}, {pipeline_mode = #tpu.pipeline_mode<synchronous>, transform_indices = @transform_1, window_bounds = array<i64: 256, 128>}, {pipeline_mode = #tpu.pipeline_mode<synchronous>, transform_indices = @transform_2, window_bounds = array<i64: 1, 128>}, {transform_indices = @transform_3, window_bounds = array<i64: 512, 128>}]} {
    %c0 = arith.constant 0 : index
    %c0_0 = arith.constant 0 : index
    %0 = vector.load %arg1[%c0, %c0_0] : memref<512x256xbf16, #tpu.memory_space<vmem>>, vector<512x256xbf16>
    %c0_1 = arith.constant 0 : index
    %c0_2 = arith.constant 0 : index
    %1 = vector.load %arg2[%c0_1, %c0_2] : memref<256x128xbf16, #tpu.memory_space<vmem>>, vector<256x128xbf16>
    %cst = arith.constant dense<0.000000e+00> : vector<512x128xf32>
    %2 = tpu.matmul %0, %1, %cst {dimension_numbers = #tpu.dot_dimension_numbers<[1], [0], [0], [1], [0, 0, 1, 1], [], []>} : vector<512x256xbf16>, vector<256x128xbf16>, vector<512x128xf32> -> vector<512x128xf32>
    %c0_3 = arith.constant 0 : index
    %c0_4 = arith.constant 0 : index
    %3 = vector.load %arg3[%c0_3, %c0_4] : memref<1x128xf32, #tpu.memory_space<vmem>>, vector<1x128xf32>
    %4 = vector.broadcast %3 : vector<1x128xf32> to vector<512x128xf32>
    %5 = arith.addf %2, %4 : vector<512x128xf32>
    %c0_5 = arith.constant 0 : index
    %c0_6 = arith.constant 0 : index
    %6 = vector.load %arg4[%c0_5, %c0_6] : memref<512x128xf32, #tpu.memory_space<vmem>>, vector<512x128xf32>
    tpu.vector_store %arg4[%c0_5, %c0_6], %5 {strides = array<i32>} : memref<512x128xf32, #tpu.memory_space<vmem>>, vector<512x128xf32>,
    return
  }
  func.func @transform_0(%arg0: i32) -> (i32, i32) {
    %c0_i32 = arith.constant 0 : i32
    %c0_i32_0 = arith.constant 0 : i32
    return %arg0, %c0_i32 : i32, i32
  }
  func.func @transform_1(%arg0: i32) -> (i32, i32) {
    %c0_i32 = arith.constant 0 : i32
    %c0_i32_0 = arith.constant 0 : i32
    %c0_i32_1 = arith.constant 0 : i32
    return %c0_i32, %c0_i32_0 : i32, i32
  }
  func.func @transform_2(%arg0: i32) -> (i32, i32) {
    %c0_i32 = arith.constant 0 : i32
    %c0_i32_0 = arith.constant 0 : i32
    %c0_i32_1 = arith.constant 0 : i32
    return %c0_i32, %c0_i32_0 : i32, i32
  }
  func.func @transform_3(%arg0: i32) -> (i32, i32) {
    %c0_i32 = arith.constant 0 : i32
    %c0_i32_0 = arith.constant 0 : i32
    return %arg0, %c0_i32 : i32, i32
  }
}

</mosaic_0001>

<bundles_post_ra>
// kernel: forward_im2col.5
= control target key start
LH: loop header
LB: loop body
LE: loop exit
PB: predicated region body
PF: predicated region fallthrough
CT: control target
= control target key end

     0   :  { %s805_s1 = inlined_call_operand.vmem [shape: bf16[128,128], index: 1, kind: input, shape index: {}]   ;;  %s806_s0 = inlined_call_operand.vmem [shape: bf16[256,128], index: 0, kind: input, shape index: {}]   ;;  %s807_s2 = inlined_call_operand.vmem [shape: f32[1,128], index: 2, kind: input, shape index: {}]   ;;  %s808_s3 = inlined_call_operand.vmem [shape: f32[256,128], index: 3, kind: output, shape index: {}]  }
   0x1   :  { %v556_v0 = vld [vmem:[%s805_s1] sm:$0xff]   ;;  %v557_v1 = vld [vmem:[%s805_s1 + $0x8] sm:$0xff]   ;;  %v558_v2 = vld [vmem:[%s805_s1 + $0x10] sm:$0xff]  }
   0x2   :  { %492 = vmatprep.subr.bf16.mxu0 %v556_v0  ;;  %540 = vmatprep.subr.bf16.mxu1 %v556_v0  ;;  %v559_v3 = vld [vmem:[%s805_s1 + $0x18] sm:$0xff]   ;;  %v564_v4 = vld [vmem:[%s806_s0] sm:$0xff]   ;;  %v561_v7 = vld [vmem:[%s805_s1 + $0x28] sm:$0xff]  }
   0x3   :  { %493 = vmatpush3.bf16.msra.mxu0 %v556_v0  ;;  %548 = vmatpush3.bf16.msra.mxu1 %v556_v0  ;;  %v565_v5 = vld [vmem:[%s806_s0 + $0x40] sm:$0xff]   ;;  %v562_v8 = vld [vmem:[%s805_s1 + $0x30] sm:$0xff]   ;;  %v563_v9 = vld [vmem:[%s805_s1 + $0x38] sm:$0xff]  }
   0x4   :  { %494 = vmatprep.subr.bf16.mxu0 %v557_v1  ;;  %541 = vmatprep.subr.bf16.mxu1 %v557_v1  ;;  %v560_v6 = vld [vmem:[%s805_s1 + $0x20] sm:$0xff]   ;;  %v566_v10 = vld [vmem:[%s806_s0 + $0x8] sm:$0xff]   ;;  %v568_v12 = vld [vmem:[%s806_s0 + $0x10] sm:$0xff]  }
   0x5   :  { %508 = vmatprep.mubr.bf16.mxu0 %v564_v4  ;;  %524 = vmatprep.mubr.bf16.mxu1 %v565_v5  ;;  %v567_v11 = vld [vmem:[%s806_s0 + $0x48] sm:$0xff]   ;;  %v569_v13 = vld [vmem:[%s806_s0 + $0x50] sm:$0xff]   ;;  %v570_v14 = vld [vmem:[%s806_s0 + $0x18] sm:$0xff]  }
   0x6   :  { %v571_v15 = vld [vmem:[%s806_s0 + $0x58] sm:$0xff]   ;;  %v572_v16 = vld [vmem:[%s806_s0 + $0x20] sm:$0xff]   ;;  %v574_v18 = vld [vmem:[%s806_s0 + $0x28] sm:$0xff]  }
   0x7   :  { %495 = vmatpush3.bf16.msra.mxu0 %v557_v1  ;;  %549 = vmatpush3.bf16.msra.mxu1 %v557_v1  ;;  %v573_v17 = vld [vmem:[%s806_s0 + $0x60] sm:$0xff]   ;;  %v575_v19 = vld [vmem:[%s806_s0 + $0x68] sm:$0xff]   ;;  %v576_v20 = vld [vmem:[%s806_s0 + $0x30] sm:$0xff]  }
   0x8   :  { %496 = vmatprep.subr.bf16.mxu0 %v558_v2  ;;  %542 = vmatprep.subr.bf16.mxu1 %v558_v2  ;;  %v577_v21 = vld [vmem:[%s806_s0 + $0x70] sm:$0xff]   ;;  %v578_v22 = vld [vmem:[%s806_s0 + $0x38] sm:$0xff]   ;;  %v675_v24 = vld [vmem:[%s807_s2] ss:$0 sm:$0xff] }
   0x9   :  { %v579_v23 = vld [vmem:[%s806_s0 + $0x78] sm:$0xff]  }
   0xb   :  { %497 = vmatpush3.bf16.msra.mxu0 %v558_v2  ;;  %550 = vmatpush3.bf16.msra.mxu1 %v558_v2 }
   0xc   :  { %498 = vmatprep.subr.bf16.mxu0 %v559_v3  ;;  %543 = vmatprep.subr.bf16.mxu1 %v559_v3 }
   0xf   :  { %499 = vmatpush3.bf16.msra.mxu0 %v559_v3  ;;  %551 = vmatpush3.bf16.msra.mxu1 %v559_v3 }
  0x10   :  { %500 = vmatprep.subr.bf16.mxu0 %v560_v6  ;;  %544 = vmatprep.subr.bf16.mxu1 %v560_v6 }
  0x13   :  { %501 = vmatpush3.bf16.msra.mxu0 %v560_v6  ;;  %552 = vmatpush3.bf16.msra.mxu1 %v560_v6 }
  0x14   :  { %502 = vmatprep.subr.bf16.mxu0 %v561_v7  ;;  %545 = vmatprep.subr.bf16.mxu1 %v561_v7 }
  0x17   :  { %503 = vmatpush3.bf16.msra.mxu0 %v561_v7  ;;  %553 = vmatpush3.bf16.msra.mxu1 %v561_v7 }
  0x18   :  { %504 = vmatprep.subr.bf16.mxu0 %v562_v8  ;;  %546 = vmatprep.subr.bf16.mxu1 %v562_v8 }
  0x1b   :  { %505 = vmatpush3.bf16.msra.mxu0 %v562_v8  ;;  %554 = vmatpush3.bf16.msra.mxu1 %v562_v8 }
  0x1c   :  { %506 = vmatprep.subr.bf16.mxu0 %v563_v9  ;;  %547 = vmatprep.subr.bf16.mxu1 %v563_v9 }
  0x1f   :  { %507 = vmatpush3.bf16.msra.mxu0 %v563_v9  ;;  %555 = vmatpush3.bf16.msra.mxu1 %v563_v9 }
  0x22   :  { %509 = vmatmul.mubr.bf16.vlgmr.msra.gmra.mrb[0].mxu0 %v566_v10  ;;  %525 = vmatmul.mubr.bf16.vlgmr.msra.gmra.mrb[0].mxu1 %v567_v11 }
  0x23   :  { %512 = vmatprep.mubr.bf16.mxu0 %v568_v12  ;;  %528 = vmatprep.mubr.bf16.mxu1 %v569_v13 }
  0x2a   :  { %513 = vmatmul.mubr.bf16.gmra.mrb[4].mxu0 %v570_v14  ;;  %529 = vmatmul.mubr.bf16.gmra.mrb[4].mxu1 %v571_v15 }
  0x2b   :  { %516 = vmatprep.mubr.bf16.mxu0 %v572_v16  ;;  %532 = vmatprep.mubr.bf16.mxu1 %v573_v17 }
  0x32   :  { %517 = vmatmul.mubr.bf16.gmra.mrb[8].mxu0 %v574_v18  ;;  %533 = vmatmul.mubr.bf16.gmra.mrb[8].mxu1 %v575_v19 }
  0x33   :  { %520 = vmatprep.mubr.bf16.mxu0 %v576_v20  ;;  %536 = vmatprep.mubr.bf16.mxu1 %v577_v21 }
  0x3a   :  { %521 = vmatmul.mubr.bf16.gmra.mrb[12].mxu0 %v578_v22  ;;  %537 = vmatmul.mubr.bf16.gmra.mrb[12].mxu1 %v579_v23 }
  0xf5   :  { %v510_v25 = vpop.f32.mrb[0].mxu0  ;;  %v526_v26 = vpop.f32.mrb[0].mxu1 }
  0xf6   :  { %v257_v27 = vadd.f32 %v510_v25, %v675_v24  ;;  %v321_v28 = vadd.f32 %v526_v26, %v675_v24  ;;  %v248_v29 = vpop.f32.mrb[1].mxu0  ;;  %v312_v30 = vpop.f32.mrb[1].mxu1 }
  0xf7   :  { %v249_v31 = vadd.f32 %v675_v24, %v248_v29  ;;  %v313_v32 = vadd.f32 %v675_v24, %v312_v30  ;;  %v511_v33 = vpop.f32.mrb[2].mxu0  ;;  %v527_v34 = vpop.f32.mrb[2].mxu1 }
  0xf8   :  { %v377_v35 = vmax.f32 %v257_v27, 0.0  ;;  %v393_v36 = vmax.f32 %v321_v28, 0.0  ;;  %v260_v37 = vadd.f32 %v511_v33, %v675_v24  ;;  %v324_v38 = vadd.f32 %v527_v34, %v675_v24  ;;  %v251_v39 = vpop.f32.mrb[3].mxu0  ;;  %v315_v40 = vpop.f32.mrb[3].mxu1 }
  0xf9   :  { %v375_v41 = vmax.f32 %v249_v31, 0.0  ;;  %v391_v42 = vmax.f32 %v313_v32, 0.0  ;;  %v252_v43 = vadd.f32 %v675_v24, %v251_v39  ;;  %v316_v44 = vadd.f32 %v675_v24, %v315_v40 }
  0xfa   :  { %409 = vst [vmem:[%s808_s3 + $0x10] sm:$0xff] %v377_v35  ;;  %425 = vst [vmem:[%s808_s3 + $0x90] sm:$0xff] %v393_v36  ;;  %v378_v45 = vmax.f32 %v260_v37, 0.0  ;;  %v394_v46 = vmax.f32 %v324_v38, 0.0 }
  0xfb   :  { %407 = vst [vmem:[%s808_s3] sm:$0xff] %v375_v41  ;;  %423 = vst [vmem:[%s808_s3 + $0x80] sm:$0xff] %v391_v42  ;;  %v376_v47 = vmax.f32 %v252_v43, 0.0  ;;  %v392_v48 = vmax.f32 %v316_v44, 0.0 }
  0xfc   :  { %410 = vst [vmem:[%s808_s3 + $0x18] sm:$0xff] %v378_v45  ;;  %426 = vst [vmem:[%s808_s3 + $0x98] sm:$0xff] %v394_v46 }
  0xfd   :  { %408 = vst [vmem:[%s808_s3 + $0x8] sm:$0xff] %v376_v47  ;;  %424 = vst [vmem:[%s808_s3 + $0x88] sm:$0xff] %v392_v48  ;;  %v514_v49 = vpop.f32.mrb[4].mxu0  ;;  %v530_v50 = vpop.f32.mrb[4].mxu1 }
  0xfe   :  { %v273_v51 = vadd.f32 %v514_v49, %v675_v24  ;;  %v337_v52 = vadd.f32 %v530_v50, %v675_v24  ;;  %v264_v53 = vpop.f32.mrb[5].mxu0  ;;  %v328_v54 = vpop.f32.mrb[5].mxu1 }
  0xff   :  { %v265_v55 = vadd.f32 %v675_v24, %v264_v53  ;;  %v329_v56 = vadd.f32 %v675_v24, %v328_v54  ;;  %v515_v57 = vpop.f32.mrb[6].mxu0  ;;  %v531_v58 = vpop.f32.mrb[6].mxu1 }
 0x100   :  { %v381_v59 = vmax.f32 %v273_v51, 0.0  ;;  %v397_v60 = vmax.f32 %v337_v52, 0.0  ;;  %v276_v61 = vadd.f32 %v515_v57, %v675_v24  ;;  %v340_v62 = vadd.f32 %v531_v58, %v675_v24  ;;  %v267_v63 = vpop.f32.mrb[7].mxu0  ;;  %v331_v0 = vpop.f32.mrb[7].mxu1 }
 0x101   :  { %v379_v1 = vmax.f32 %v265_v55, 0.0  ;;  %v395_v2 = vmax.f32 %v329_v56, 0.0  ;;  %v268_v3 = vadd.f32 %v675_v24, %v267_v63  ;;  %v332_v4 = vadd.f32 %v675_v24, %v331_v0 }
 0x102   :  { %413 = vst [vmem:[%s808_s3 + $0x30] sm:$0xff] %v381_v59  ;;  %429 = vst [vmem:[%s808_s3 + $0xb0] sm:$0xff] %v397_v60  ;;  %v382_v5 = vmax.f32 %v276_v61, 0.0  ;;  %v398_v6 = vmax.f32 %v340_v62, 0.0 }
 0x103   :  { %411 = vst [vmem:[%s808_s3 + $0x20] sm:$0xff] %v379_v1  ;;  %427 = vst [vmem:[%s808_s3 + $0xa0] sm:$0xff] %v395_v2  ;;  %v380_v7 = vmax.f32 %v268_v3, 0.0  ;;  %v396_v8 = vmax.f32 %v332_v4, 0.0 }
 0x104   :  { %414 = vst [vmem:[%s808_s3 + $0x38] sm:$0xff] %v382_v5  ;;  %430 = vst [vmem:[%s808_s3 + $0xb8] sm:$0xff] %v398_v6 }
 0x105   :  { %412 = vst [vmem:[%s808_s3 + $0x28] sm:$0xff] %v380_v7  ;;  %428 = vst [vmem:[%s808_s3 + $0xa8] sm:$0xff] %v396_v8  ;;  %v518_v9 = vpop.f32.mrb[8].mxu0  ;;  %v534_v10 = vpop.f32.mrb[8].mxu1 }
 0x106   :  { %v289_v11 = vadd.f32 %v518_v9, %v675_v24  ;;  %v353_v12 = vadd.f32 %v534_v10, %v675_v24  ;;  %v280_v13 = vpop.f32.mrb[9].mxu0  ;;  %v344_v14 = vpop.f32.mrb[9].mxu1 }
 0x107   :  { %v281_v15 = vadd.f32 %v675_v24, %v280_v13  ;;  %v345_v16 = vadd.f32 %v675_v24, %v344_v14  ;;  %v519_v17 = vpop.f32.mrb[10].mxu0  ;;  %v535_v18 = vpop.f32.mrb[10].mxu1 }
 0x108   :  { %v385_v19 = vmax.f32 %v289_v11, 0.0  ;;  %v401_v20 = vmax.f32 %v353_v12, 0.0  ;;  %v292_v21 = vadd.f32 %v519_v17, %v675_v24  ;;  %v356_v22 = vadd.f32 %v535_v18, %v675_v24  ;;  %v283_v23 = vpop.f32.mrb[11].mxu0  ;;  %v347_v25 = vpop.f32.mrb[11].mxu1 }
 0x109   :  { %v383_v26 = vmax.f32 %v281_v15, 0.0  ;;  %v399_v27 = vmax.f32 %v345_v16, 0.0  ;;  %v284_v28 = vadd.f32 %v675_v24, %v283_v23  ;;  %v348_v29 = vadd.f32 %v675_v24, %v347_v25 }
 0x10a   :  { %417 = vst [vmem:[%s808_s3 + $0x50] sm:$0xff] %v385_v19  ;;  %433 = vst [vmem:[%s808_s3 + $0xd0] sm:$0xff] %v401_v20  ;;  %v386_v30 = vmax.f32 %v292_v21, 0.0  ;;  %v402_v31 = vmax.f32 %v356_v22, 0.0 }
 0x10b   :  { %415 = vst [vmem:[%s808_s3 + $0x40] sm:$0xff] %v383_v26  ;;  %431 = vst [vmem:[%s808_s3 + $0xc0] sm:$0xff] %v399_v27  ;;  %v384_v32 = vmax.f32 %v284_v28, 0.0  ;;  %v400_v33 = vmax.f32 %v348_v29, 0.0 }
 0x10c   :  { %418 = vst [vmem:[%s808_s3 + $0x58] sm:$0xff] %v386_v30  ;;  %434 = vst [vmem:[%s808_s3 + $0xd8] sm:$0xff] %v402_v31 }
 0x10d   :  { %416 = vst [vmem:[%s808_s3 + $0x48] sm:$0xff] %v384_v32  ;;  %432 = vst [vmem:[%s808_s3 + $0xc8] sm:$0xff] %v400_v33  ;;  %v522_v34 = vpop.f32.mrb[12].mxu0  ;;  %v538_v35 = vpop.f32.mrb[12].mxu1 }
 0x10e   :  { %v305_v36 = vadd.f32 %v522_v34, %v675_v24  ;;  %v369_v37 = vadd.f32 %v538_v35, %v675_v24  ;;  %v296_v38 = vpop.f32.mrb[13].mxu0  ;;  %v360_v39 = vpop.f32.mrb[13].mxu1 }
 0x10f   :  { %v297_v40 = vadd.f32 %v675_v24, %v296_v38  ;;  %v361_v41 = vadd.f32 %v675_v24, %v360_v39  ;;  %v523_v42 = vpop.f32.mrb[14].mxu0  ;;  %v539_v43 = vpop.f32.mrb[14].mxu1 }
 0x110   :  { %v389_v44 = vmax.f32 %v305_v36, 0.0  ;;  %v405_v45 = vmax.f32 %v369_v37, 0.0  ;;  %v308_v46 = vadd.f32 %v523_v42, %v675_v24  ;;  %v372_v47 = vadd.f32 %v539_v43, %v675_v24  ;;  %v299_v48 = vpop.f32.mrb[15].mxu0  ;;  %v363_v49 = vpop.f32.mrb[15].mxu1 }
 0x111   :  { %v387_v50 = vmax.f32 %v297_v40, 0.0  ;;  %v403_v51 = vmax.f32 %v361_v41, 0.0  ;;  %v300_v52 = vadd.f32 %v675_v24, %v299_v48  ;;  %v364_v53 = vadd.f32 %v675_v24, %v363_v49 }
 0x112   :  { %421 = vst [vmem:[%s808_s3 + $0x70] sm:$0xff] %v389_v44  ;;  %437 = vst [vmem:[%s808_s3 + $0xf0] sm:$0xff] %v405_v45  ;;  %v390_v54 = vmax.f32 %v308_v46, 0.0  ;;  %v406_v55 = vmax.f32 %v372_v47, 0.0 }
 0x113   :  { %419 = vst [vmem:[%s808_s3 + $0x60] sm:$0xff] %v387_v50  ;;  %435 = vst [vmem:[%s808_s3 + $0xe0] sm:$0xff] %v403_v51  ;;  %v388_v56 = vmax.f32 %v300_v52, 0.0  ;;  %v404_v24 = vmax.f32 %v364_v53, 0.0 }
 0x114   :  { %422 = vst [vmem:[%s808_s3 + $0x78] sm:$0xff] %v390_v54  ;;  %438 = vst [vmem:[%s808_s3 + $0xf8] sm:$0xff] %v406_v55 }
 0x115   :  { %420 = vst [vmem:[%s808_s3 + $0x68] sm:$0xff] %v388_v56  ;;  %436 = vst [vmem:[%s808_s3 + $0xe8] sm:$0xff] %v404_v24 }

// kernel: forward_im2col.6
= control target key start
LH: loop header
LB: loop body
LE: loop exit
PB: predicated region body
PF: predicated region fallthrough
CT: control target
= control target key end

     0   :  { %s1429_s1 = inlined_call_operand.vmem [shape: bf16[256,128], index: 1, kind: input, shape index: {}]   ;;  %s1430_s0 = inlined_call_operand.vmem [shape: bf16[256,256], index: 0, kind: input, shape index: {}]   ;;  %s1431_s2 = inlined_call_operand.vmem [shape: f32[1,128], index: 2, kind: input, shape index: {}]   ;;  %s1432_s3 = inlined_call_operand.vmem [shape: f32[256,128], index: 3, kind: output, shape index: {}]  }
   0x1   :  { %v940_v0 = vld [vmem:[%s1429_s1 + $0x40] sm:$0xff]   ;;  %v942_v2 = vld [vmem:[%s1429_s1 + $0x48] sm:$0xff]   ;;  %v944_v4 = vld [vmem:[%s1429_s1 + $0x50] sm:$0xff]  }
   0x2   :  { %v941_v1 = vld [vmem:[%s1429_s1] sm:$0xff]   ;;  %812 = vmatprep.subr.bf16.mxu0 %v940_v0  ;;  %924 = vmatprep.subr.bf16.mxu1 %v940_v0  ;;  %v943_v3 = vld [vmem:[%s1429_s1 + $0x8] sm:$0xff]   ;;  %v945_v5 = vld [vmem:[%s1429_s1 + $0x10] sm:$0xff]  }
   0x3   :  { %813 = vmatpush3.bf16.msra.mxu0 %v941_v1  ;;  %932 = vmatpush3.bf16.msra.mxu1 %v941_v1  ;;  %v946_v6 = vld [vmem:[%s1429_s1 + $0x58] sm:$0xff]   ;;  %v948_v8 = vld [vmem:[%s1429_s1 + $0x60] sm:$0xff]   ;;  %v950_v10 = vld [vmem:[%s1429_s1 + $0x68] sm:$0xff]  }
   0x4   :  { %814 = vmatprep.subr.bf16.mxu0 %v942_v2  ;;  %925 = vmatprep.subr.bf16.mxu1 %v942_v2  ;;  %v947_v7 = vld [vmem:[%s1429_s1 + $0x18] sm:$0xff]   ;;  %v949_v9 = vld [vmem:[%s1429_s1 + $0x20] sm:$0xff]   ;;  %v951_v13 = vld [vmem:[%s1429_s1 + $0x28] sm:$0xff]  }
   0x5   :  { %v958_v11 = vld [vmem:[%s1430_s0 + $0x4] ss:$8 sps:$4 sm:$0xff]   ;;  %v952_v14 = vld [vmem:[%s1429_s1 + $0x70] sm:$0xff]   ;;  %v954_v16 = vld [vmem:[%s1429_s1 + $0x78] sm:$0xff]  }
   0x6   :  { %v961_v12 = vld [vmem:[%s1430_s0 + $0x84] ss:$8 sps:$4 sm:$0xff]   ;;  %374 = vmatprep.mubr.bf16.mxu0 %v958_v11  ;;  %v953_v15 = vld [vmem:[%s1429_s1 + $0x30] sm:$0xff]   ;;  %v955_v17 = vld [vmem:[%s1429_s1 + $0x38] sm:$0xff]  }
   0x7   :  { %815 = vmatpush3.bf16.msra.mxu0 %v943_v3  ;;  %933 = vmatpush3.bf16.msra.mxu1 %v943_v3  ;;  %v956_v18 = vld [vmem:[%s1430_s0] ss:$8 sps:$4 sm:$0xff]   ;;  %v962_v20 = vld [vmem:[%s1430_s0 + $0x14] ss:$8 sps:$4 sm:$0xff]   ;;  %v966_v22 = vld [vmem:[%s1430_s0 + $0x10] ss:$8 sps:$4 sm:$0xff]  }
   0x8   :  { %816 = vmatprep.subr.bf16.mxu0 %v944_v4  ;;  %926 = vmatprep.subr.bf16.mxu1 %v944_v4  ;;  %v959_v19 = vld [vmem:[%s1430_s0 + $0x80] ss:$8 sps:$4 sm:$0xff]   ;;  %v964_v21 = vld [vmem:[%s1430_s0 + $0x94] ss:$8 sps:$4 sm:$0xff]   ;;  %v967_v23 = vld [vmem:[%s1430_s0 + $0x90] ss:$8 sps:$4 sm:$0xff]  }
   0x9   :  { %438 = vmatprep.mubr.bf16.mxu1 %v961_v12  ;;  %v968_v24 = vld [vmem:[%s1430_s0 + $0x24] ss:$8 sps:$4 sm:$0xff]   ;;  %v972_v26 = vld [vmem:[%s1430_s0 + $0x20] ss:$8 sps:$4 sm:$0xff]   ;;  %v974_v28 = vld [vmem:[%s1430_s0 + $0x34] ss:$8 sps:$4 sm:$0xff]  }
   0xa   :  { %v970_v25 = vld [vmem:[%s1430_s0 + $0xa4] ss:$8 sps:$4 sm:$0xff]   ;;  %v973_v27 = vld [vmem:[%s1430_s0 + $0xa0] ss:$8 sps:$4 sm:$0xff]   ;;  %v976_v29 = vld [vmem:[%s1430_s0 + $0xb4] ss:$8 sps:$4 sm:$0xff]  }
   0xb   :  { %817 = vmatpush3.bf16.msra.mxu0 %v945_v5  ;;  %934 = vmatpush3.bf16.msra.mxu1 %v945_v5  ;;  %v978_v30 = vld [vmem:[%s1430_s0 + $0x30] ss:$8 sps:$4 sm:$0xff]   ;;  %v980_v32 = vld [vmem:[%s1430_s0 + $0x44] ss:$8 sps:$4 sm:$0xff]   ;;  %v984_v34 = vld [vmem:[%s1430_s0 + $0x40] ss:$8 sps:$4 sm:$0xff]  }
   0xc   :  { %818 = vmatprep.subr.bf16.mxu0 %v946_v6  ;;  %927 = vmatprep.subr.bf16.mxu1 %v946_v6  ;;  %v979_v31 = vld [vmem:[%s1430_s0 + $0xb0] ss:$8 sps:$4 sm:$0xff]   ;;  %v982_v33 = vld [vmem:[%s1430_s0 + $0xc4] ss:$8 sps:$4 sm:$0xff]   ;;  %v985_v35 = vld [vmem:[%s1430_s0 + $0xc0] ss:$8 sps:$4 sm:$0xff]  }
   0xd   :  { %v986_v36 = vld [vmem:[%s1430_s0 + $0x54] ss:$8 sps:$4 sm:$0xff]   ;;  %v990_v38 = vld [vmem:[%s1430_s0 + $0x50] ss:$8 sps:$4 sm:$0xff]   ;;  %v992_v40 = vld [vmem:[%s1430_s0 + $0x64] ss:$8 sps:$4 sm:$0xff]  }
   0xe   :  { %v988_v37 = vld [vmem:[%s1430_s0 + $0xd4] ss:$8 sps:$4 sm:$0xff]   ;;  %v991_v39 = vld [vmem:[%s1430_s0 + $0xd0] ss:$8 sps:$4 sm:$0xff]   ;;  %v994_v41 = vld [vmem:[%s1430_s0 + $0xe4] ss:$8 sps:$4 sm:$0xff]  }
   0xf   :  { %819 = vmatpush3.bf16.msra.mxu0 %v947_v7  ;;  %935 = vmatpush3.bf16.msra.mxu1 %v947_v7  ;;  %v996_v42 = vld [vmem:[%s1430_s0 + $0x60] ss:$8 sps:$4 sm:$0xff]   ;;  %v998_v44 = vld [vmem:[%s1430_s0 + $0x74] ss:$8 sps:$4 sm:$0xff]   ;;  %v1002_v46 = vld [vmem:[%s1430_s0 + $0x70] ss:$8 sps:$4 sm:$0xff]  }
  0x10   :  { %820 = vmatprep.subr.bf16.mxu0 %v948_v8  ;;  %928 = vmatprep.subr.bf16.mxu1 %v948_v8  ;;  %v997_v43 = vld [vmem:[%s1430_s0 + $0xe0] ss:$8 sps:$4 sm:$0xff]   ;;  %v1000_v45 = vld [vmem:[%s1430_s0 + $0xf4] ss:$8 sps:$4 sm:$0xff]   ;;  %v1003_v47 = vld [vmem:[%s1430_s0 + $0xf0] ss:$8 sps:$4 sm:$0xff]  }
  0x11   :  { %v1299_v50 = vld [vmem:[%s1431_s2] ss:$0 sm:$0xff] }
  0x13   :  { %821 = vmatpush3.bf16.msra.mxu0 %v949_v9  ;;  %936 = vmatpush3.bf16.msra.mxu1 %v949_v9 }
  0x14   :  { %822 = vmatprep.subr.bf16.mxu0 %v950_v10  ;;  %929 = vmatprep.subr.bf16.mxu1 %v950_v10 }
  0x17   :  { %823 = vmatpush3.bf16.msra.mxu0 %v951_v13  ;;  %937 = vmatpush3.bf16.msra.mxu1 %v951_v13 }
  0x18   :  { %824 = vmatprep.subr.bf16.mxu0 %v952_v14  ;;  %930 = vmatprep.subr.bf16.mxu1 %v952_v14 }
  0x1b   :  { %825 = vmatpush3.bf16.msra.mxu0 %v953_v15  ;;  %938 = vmatpush3.bf16.msra.mxu1 %v953_v15 }
  0x1c   :  { %826 = vmatprep.subr.bf16.mxu0 %v954_v16  ;;  %931 = vmatprep.subr.bf16.mxu1 %v954_v16 }
  0x1f   :  { %827 = vmatpush3.bf16.msra.mxu0 %v955_v17  ;;  %939 = vmatpush3.bf16.msra.mxu1 %v955_v17 }
  0x22   :  { %375 = vmatmul.mubr.bf16.vlgmr.msra.gmra.mrb[0].mxu0 %v956_v18  ;;  %439 = vmatmul.mubr.bf16.vlgmr.msra.gmra.mrb[0].mxu1 %v959_v19 }
  0x23   :  { %382 = vmatprep.mubr.bf16.mxu0 %v962_v20  ;;  %446 = vmatprep.mubr.bf16.mxu1 %v964_v21 }
  0x2a   :  { %383 = vmatmul.mubr.bf16.gmra.mrb[4].mxu0 %v966_v22  ;;  %447 = vmatmul.mubr.bf16.gmra.mrb[4].mxu1 %v967_v23 }
  0x2b   :  { %390 = vmatprep.mubr.bf16.mxu0 %v968_v24  ;;  %454 = vmatprep.mubr.bf16.mxu1 %v970_v25 }
  0x32   :  { %391 = vmatmul.mubr.bf16.gmra.mrb[8].mxu0 %v972_v26  ;;  %455 = vmatmul.mubr.bf16.gmra.mrb[8].mxu1 %v973_v27 }
  0x33   :  { %398 = vmatprep.mubr.bf16.mxu0 %v974_v28  ;;  %462 = vmatprep.mubr.bf16.mxu1 %v976_v29 }
  0x3a   :  { %399 = vmatmul.mubr.bf16.gmra.mrb[12].mxu0 %v978_v30  ;;  %463 = vmatmul.mubr.bf16.gmra.mrb[12].mxu1 %v979_v31 }
  0x3b   :  { %406 = vmatprep.mubr.bf16.mxu0 %v980_v32  ;;  %470 = vmatprep.mubr.bf16.mxu1 %v982_v33 }
  0x42   :  { %407 = vmatmul.mubr.bf16.gmra.mrb[16].mxu0 %v984_v34  ;;  %471 = vmatmul.mubr.bf16.gmra.mrb[16].mxu1 %v985_v35 }
  0x43   :  { %414 = vmatprep.mubr.bf16.mxu0 %v986_v36  ;;  %478 = vmatprep.mubr.bf16.mxu1 %v988_v37 }
  0x4a   :  { %415 = vmatmul.mubr.bf16.gmra.mrb[20].mxu0 %v990_v38  ;;  %479 = vmatmul.mubr.bf16.gmra.mrb[20].mxu1 %v991_v39 }
  0x4b   :  { %422 = vmatprep.mubr.bf16.mxu0 %v992_v40  ;;  %486 = vmatprep.mubr.bf16.mxu1 %v994_v41 }
  0x52   :  { %423 = vmatmul.mubr.bf16.gmra.mrb[24].mxu0 %v996_v42  ;;  %487 = vmatmul.mubr.bf16.gmra.mrb[24].mxu1 %v997_v43 }
  0x53   :  { %430 = vmatprep.mubr.bf16.mxu0 %v998_v44  ;;  %494 = vmatprep.mubr.bf16.mxu1 %v1000_v45 }
  0x5a   :  { %431 = vmatmul.mubr.bf16.gmra.mrb[28].mxu0 %v1002_v46  ;;  %495 = vmatmul.mubr.bf16.gmra.mrb[28].mxu1 %v1003_v47 }
  0xf5   :  { %v828_v48 = vpop.f32.mrb[0].mxu0  ;;  %v876_v49 = vpop.f32.mrb[0].mxu1 }
  0xf6   :  { %v829_v51 = vpop.f32.mrb[1].mxu0  ;;  %v877_v52 = vpop.f32.mrb[1].mxu1 }
  0xf7   :  { %v830_v53 = vadd.f32 %v829_v51, %v828_v48  ;;  %v878_v54 = vadd.f32 %v877_v52, %v876_v49  ;;  %v831_v55 = vpop.f32.mrb[2].mxu0  ;;  %v879_v56 = vpop.f32.mrb[2].mxu1 }
  0xf8   :  { %v832_v57 = vpop.f32.mrb[3].mxu0  ;;  %v880_v58 = vpop.f32.mrb[3].mxu1 }
  0xf9   :  { %v377_v59 = vadd.f32 %v830_v53, %v1299_v50  ;;  %v441_v60 = vadd.f32 %v878_v54, %v1299_v50  ;;  %v833_v61 = vadd.f32 %v832_v57, %v831_v55  ;;  %v881_v62 = vadd.f32 %v880_v58, %v879_v56 }
  0xfb   :  { %v780_v63 = vmul.f32 -1.442695, %v377_v59  ;;  %v796_v0 = vmul.f32 -1.442695, %v441_v60  ;;  %v380_v1 = vadd.f32 %v833_v61, %v1299_v50  ;;  %v444_v2 = vadd.f32 %v881_v62, %v1299_v50 }
  0xfd   :  { %1004 = vpow2.f32 %v780_v63  ;;  %v781_v3 = vmul.f32 -1.442695, %v380_v1  ;;  %v797_v4 = vmul.f32 -1.442695, %v444_v2  ;;  %v834_v5 = vpop.f32.mrb[4].mxu0  ;;  %v882_v6 = vpop.f32.mrb[4].mxu1 }
  0xfe   :  { %1006 = vpow2.f32 %v796_v0  ;;  %v835_v7 = vpop.f32.mrb[5].mxu0  ;;  %v883_v8 = vpop.f32.mrb[5].mxu1 }
  0xff   :  { %1008 = vpow2.f32 %v781_v3  ;;  %v836_v9 = vadd.f32 %v835_v7, %v834_v5  ;;  %v884_v10 = vadd.f32 %v883_v8, %v882_v6  ;;  %v837_v11 = vpop.f32.mrb[6].mxu0  ;;  %v885_v12 = vpop.f32.mrb[6].mxu1 }
 0x100   :  { %1010 = vpow2.f32 %v797_v4  ;;  %v838_v13 = vpop.f32.mrb[7].mxu0  ;;  %v886_v14 = vpop.f32.mrb[7].mxu1 }
 0x101   :  { %v385_v15 = vadd.f32 %v836_v9, %v1299_v50  ;;  %v449_v16 = vadd.f32 %v884_v10, %v1299_v50  ;;  %v839_v17 = vadd.f32 %v838_v13, %v837_v11  ;;  %v887_v18 = vadd.f32 %v886_v14, %v885_v12 }
 0x103   :  { %v782_v19 = vmul.f32 -1.442695, %v385_v15  ;;  %v798_v20 = vmul.f32 -1.442695, %v449_v16  ;;  %v388_v21 = vadd.f32 %v839_v17, %v1299_v50  ;;  %v452_v22 = vadd.f32 %v887_v18, %v1299_v50 }
 0x105   :  { %1012 = vpow2.f32 %v782_v19  ;;  %v783_v23 = vmul.f32 -1.442695, %v388_v21  ;;  %v799_v24 = vmul.f32 -1.442695, %v452_v22  ;;  %v840_v25 = vpop.f32.mrb[8].mxu0  ;;  %v888_v26 = vpop.f32.mrb[8].mxu1 }
 0x106   :  { %1014 = vpow2.f32 %v798_v20  ;;  %v841_v27 = vpop.f32.mrb[9].mxu0  ;;  %v889_v28 = vpop.f32.mrb[9].mxu1 }
 0x107   :  { %v1005_v29 = vpop.eup %1004  ;;  %1016 = vpow2.f32 %v783_v23  ;;  %v842_v30 = vadd.f32 %v841_v27, %v840_v25  ;;  %v890_v31 = vadd.f32 %v889_v28, %v888_v26  ;;  %v843_v32 = vpop.f32.mrb[10].mxu0 }
 0x108   :  { %v891_v33 = vpop.f32.mrb[10].mxu1  ;;  %v1007_v34 = vpop.eup %1006  ;;  %v599_v35 = vadd.f32 1.0, %v1005_v29  ;;  %1018 = vpow2.f32 %v799_v24 }
 0x109   :  { %v844_v36 = vpop.f32.mrb[11].mxu0  ;;  %v892_v37 = vpop.f32.mrb[11].mxu1  ;;  %v615_v39 = vadd.f32 1.0, %v1007_v34  ;;  %v393_v40 = vadd.f32 %v842_v30, %v1299_v50  ;;  %v457_v41 = vadd.f32 %v890_v31, %v1299_v50 }
 0x10a   :  { %v1009_v38 = vpop.eup %1008  ;;  %v845_v42 = vadd.f32 %v844_v36, %v843_v32  ;;  %1020 = vrcp.f32 %v599_v35  ;;  %v893_v45 = vadd.f32 %v892_v37, %v891_v33 }
 0x10b   :  { %v1011_v43 = vpop.eup %1010  ;;  %v600_v44 = vadd.f32 1.0, %v1009_v38  ;;  %1022 = vrcp.f32 %v615_v39  ;;  %v784_v47 = vmul.f32 -1.442695, %v393_v40  ;;  %v800_v48 = vmul.f32 -1.442695, %v457_v41 }
 0x10c   :  { %v616_v46 = vadd.f32 1.0, %v1011_v43  ;;  %v396_v49 = vadd.f32 %v845_v42, %v1299_v50  ;;  %v460_v51 = vadd.f32 %v893_v45, %v1299_v50 }
 0x10d   :  { %1024 = vrcp.f32 %v600_v44  ;;  %v846_v52 = vpop.f32.mrb[12].mxu0  ;;  %v894_v53 = vpop.f32.mrb[12].mxu1 }
 0x10e   :  { %1026 = vrcp.f32 %v616_v46  ;;  %v785_v54 = vmul.f32 -1.442695, %v396_v49  ;;  %v801_v55 = vmul.f32 -1.442695, %v460_v51  ;;  %v847_v56 = vpop.f32.mrb[13].mxu0  ;;  %v895_v57 = vpop.f32.mrb[13].mxu1 }
 0x10f   :  { %1028 = vpow2.f32 %v784_v47  ;;  %v1013_v58 = vpop.eup %1012  ;;  %v848_v59 = vadd.f32 %v847_v56, %v846_v52  ;;  %v896_v60 = vadd.f32 %v895_v57, %v894_v53  ;;  %v849_v61 = vpop.f32.mrb[14].mxu0 }
 0x110   :  { %1030 = vpow2.f32 %v800_v48  ;;  %v897_v62 = vpop.f32.mrb[14].mxu1  ;;  %v1015_v63 = vpop.eup %1014  ;;  %v601_v0 = vadd.f32 1.0, %v1013_v58 }
 0x111   :  { %1032 = vpow2.f32 %v785_v54  ;;  %v850_v1 = vpop.f32.mrb[15].mxu0  ;;  %v898_v2 = vpop.f32.mrb[15].mxu1  ;;  %v617_v4 = vadd.f32 1.0, %v1015_v63  ;;  %v401_v5 = vadd.f32 %v848_v59, %v1299_v50  ;;  %v465_v6 = vadd.f32 %v896_v60, %v1299_v50 }
 0x112   :  { %v1017_v3 = vpop.eup %1016  ;;  %1034 = vpow2.f32 %v801_v55  ;;  %v851_v9 = vadd.f32 %v850_v1, %v849_v61  ;;  %v899_v10 = vadd.f32 %v898_v2, %v897_v62 }
 0x113   :  { %v1019_v7 = vpop.eup %1018  ;;  %1036 = vrcp.f32 %v601_v0  ;;  %v602_v8 = vadd.f32 1.0, %v1017_v3  ;;  %v786_v12 = vmul.f32 -1.442695, %v401_v5  ;;  %v802_v13 = vmul.f32 -1.442695, %v465_v6 }
 0x114   :  { %1038 = vrcp.f32 %v617_v4  ;;  %v618_v11 = vadd.f32 1.0, %v1019_v7  ;;  %v1021_v14 = vpop.eup %1020  ;;  %v404_v15 = vadd.f32 %v851_v9, %v1299_v50  ;;  %v468_v16 = vadd.f32 %v899_v10, %v1299_v50 }
 0x115   :  { %1040 = vrcp.f32 %v602_v8  ;;  %v1023_v17 = vpop.eup %1022  ;;  %695 = vst [vmem:[%s1432_s3] sm:$0xff] %v1021_v14  ;;  %v852_v18 = vpop.f32.mrb[16].mxu0 }
 0x116   :  { %1042 = vrcp.f32 %v618_v11  ;;  %v900_v19 = vpop.f32.mrb[16].mxu1  ;;  %711 = vst [vmem:[%s1432_s3 + $0x80] sm:$0xff] %v1023_v17  ;;  %v787_v21 = vmul.f32 -1.442695, %v404_v15  ;;  %v803_v22 = vmul.f32 -1.442695, %v468_v16 }
 0x117   :  { %v1025_v20 = vpop.eup %1024  ;;  %1044 = vpow2.f32 %v786_v12  ;;  %v853_v23 = vpop.f32.mrb[17].mxu0 }
 0x118   :  { %v901_v24 = vpop.f32.mrb[17].mxu1  ;;  %v1027_v25 = vpop.eup %1026  ;;  %696 = vst [vmem:[%s1432_s3 + $0x8] sm:$0xff] %v1025_v20  ;;  %1046 = vpow2.f32 %v802_v13  ;;  %v854_v26 = vadd.f32 %v853_v23, %v852_v18 }
 0x119   :  { %v902_v27 = vadd.f32 %v901_v24, %v900_v19  ;;  %v855_v28 = vpop.f32.mrb[18].mxu0  ;;  %v903_v29 = vpop.f32.mrb[18].mxu1  ;;  %712 = vst [vmem:[%s1432_s3 + $0x88] sm:$0xff] %v1027_v25  ;;  %1048 = vpow2.f32 %v787_v21 }
 0x11a   :  { %v1029_v30 = vpop.eup %1028  ;;  %v856_v31 = vpop.f32.mrb[19].mxu0  ;;  %1050 = vpow2.f32 %v803_v22  ;;  %v409_v35 = vadd.f32 %v854_v26, %v1299_v50 }
 0x11b   :  { %v904_v32 = vpop.f32.mrb[19].mxu1  ;;  %v1031_v33 = vpop.eup %1030  ;;  %v603_v34 = vadd.f32 1.0, %v1029_v30  ;;  %v473_v36 = vadd.f32 %v902_v27, %v1299_v50  ;;  %v857_v39 = vadd.f32 %v856_v31, %v855_v28 }
 0x11c   :  { %v1033_v37 = vpop.eup %1032  ;;  %v619_v38 = vadd.f32 1.0, %v1031_v33  ;;  %v905_v40 = vadd.f32 %v904_v32, %v903_v29  ;;  %v788_v43 = vmul.f32 -1.442695, %v409_v35 }
 0x11d   :  { %v1035_v41 = vpop.eup %1034  ;;  %1052 = vrcp.f32 %v603_v34  ;;  %v604_v42 = vadd.f32 1.0, %v1033_v37  ;;  %v804_v44 = vmul.f32 -1.442695, %v473_v36  ;;  %v412_v47 = vadd.f32 %v857_v39, %v1299_v50  ;;  %v858_v51 = vpop.f32.mrb[20].mxu0 }
 0x11e   :  { %v1037_v45 = vpop.eup %1036  ;;  %1054 = vrcp.f32 %v619_v38  ;;  %v620_v46 = vadd.f32 1.0, %v1035_v41  ;;  %v476_v48 = vadd.f32 %v905_v40, %v1299_v50  ;;  %v906_v52 = vpop.f32.mrb[20].mxu1 }
 0x11f   :  { %v1039_v49 = vpop.eup %1038  ;;  %697 = vst [vmem:[%s1432_s3 + $0x10] sm:$0xff] %v1037_v45  ;;  %1056 = vrcp.f32 %v604_v42  ;;  %v789_v54 = vmul.f32 -1.442695, %v412_v47  ;;  %v859_v56 = vpop.f32.mrb[21].mxu0 }
 0x120   :  { %v1041_v53 = vpop.eup %1040  ;;  %713 = vst [vmem:[%s1432_s3 + $0x90] sm:$0xff] %v1039_v49  ;;  %1058 = vrcp.f32 %v620_v46  ;;  %v805_v55 = vmul.f32 -1.442695, %v476_v48  ;;  %v907_v57 = vpop.f32.mrb[21].mxu1  ;;  %v860_v59 = vadd.f32 %v859_v56, %v858_v51 }
 0x121   :  { %v1043_v58 = vpop.eup %1042  ;;  %698 = vst [vmem:[%s1432_s3 + $0x18] sm:$0xff] %v1041_v53  ;;  %1060 = vpow2.f32 %v788_v43  ;;  %v908_v60 = vadd.f32 %v907_v57, %v906_v52  ;;  %v861_v61 = vpop.f32.mrb[22].mxu0 }
 0x122   :  { %v909_v62 = vpop.f32.mrb[22].mxu1  ;;  %v1045_v63 = vpop.eup %1044  ;;  %714 = vst [vmem:[%s1432_s3 + $0x98] sm:$0xff] %v1043_v58  ;;  %1062 = vpow2.f32 %v804_v44  ;;  %v417_v4 = vadd.f32 %v860_v59, %v1299_v50 }
 0x123   :  { %v862_v0 = vpop.f32.mrb[23].mxu0  ;;  %v910_v1 = vpop.f32.mrb[23].mxu1  ;;  %v605_v3 = vadd.f32 1.0, %v1045_v63  ;;  %1064 = vpow2.f32 %v789_v54  ;;  %v481_v5 = vadd.f32 %v908_v60, %v1299_v50 }
 0x124   :  { %v1047_v2 = vpop.eup %1046  ;;  %1066 = vpow2.f32 %v805_v55  ;;  %v863_v8 = vadd.f32 %v862_v0, %v861_v61  ;;  %v911_v9 = vadd.f32 %v910_v1, %v909_v62  ;;  %v790_v12 = vmul.f32 -1.442695, %v417_v4 }
 0x125   :  { %v1049_v6 = vpop.eup %1048  ;;  %v621_v7 = vadd.f32 1.0, %v1047_v2  ;;  %1068 = vrcp.f32 %v605_v3  ;;  %v806_v13 = vmul.f32 -1.442695, %v481_v5  ;;  %v864_v18 = vpop.f32.mrb[24].mxu0 }
 0x126   :  { %v1051_v10 = vpop.eup %1050  ;;  %v606_v11 = vadd.f32 1.0, %v1049_v6  ;;  %v420_v15 = vadd.f32 %v863_v8, %v1299_v50  ;;  %v484_v16 = vadd.f32 %v911_v9, %v1299_v50  ;;  %v912_v19 = vpop.f32.mrb[24].mxu1 }
 0x127   :  { %1070 = vrcp.f32 %v621_v7  ;;  %v622_v14 = vadd.f32 1.0, %v1051_v10  ;;  %v1053_v17 = vpop.eup %1052  ;;  %v865_v23 = vpop.f32.mrb[25].mxu0 }
 0x128   :  { %1072 = vrcp.f32 %v606_v11  ;;  %v1055_v20 = vpop.eup %1054  ;;  %699 = vst [vmem:[%s1432_s3 + $0x20] sm:$0xff] %v1053_v17  ;;  %v791_v21 = vmul.f32 -1.442695, %v420_v15  ;;  %v807_v22 = vmul.f32 -1.442695, %v484_v16  ;;  %v913_v24 = vpop.f32.mrb[25].mxu1  ;;  %v866_v26 = vadd.f32 %v865_v23, %v864_v18 }
 0x129   :  { %1074 = vrcp.f32 %v622_v14  ;;  %v1057_v25 = vpop.eup %1056  ;;  %715 = vst [vmem:[%s1432_s3 + $0xa0] sm:$0xff] %v1055_v20  ;;  %v914_v27 = vadd.f32 %v913_v24, %v912_v19  ;;  %v867_v28 = vpop.f32.mrb[26].mxu0 }
 0x12a   :  { %1076 = vpow2.f32 %v790_v12  ;;  %v915_v29 = vpop.f32.mrb[26].mxu1  ;;  %v1059_v30 = vpop.eup %1058  ;;  %700 = vst [vmem:[%s1432_s3 + $0x28] sm:$0xff] %v1057_v25  ;;  %v425_v34 = vadd.f32 %v866_v26, %v1299_v50 }
 0x12b   :  { %1078 = vpow2.f32 %v806_v13  ;;  %v868_v31 = vpop.f32.mrb[27].mxu0  ;;  %v916_v32 = vpop.f32.mrb[27].mxu1  ;;  %716 = vst [vmem:[%s1432_s3 + $0xa8] sm:$0xff] %v1059_v30  ;;  %v489_v35 = vadd.f32 %v914_v27, %v1299_v50 }
 0x12c   :  { %v1061_v33 = vpop.eup %1060  ;;  %1080 = vpow2.f32 %v791_v21  ;;  %v869_v36 = vadd.f32 %v868_v31, %v867_v28  ;;  %v917_v39 = vadd.f32 %v916_v32, %v915_v29  ;;  %v792_v45 = vmul.f32 -1.442695, %v425_v34 }
 0x12d   :  { %v1063_v37 = vpop.eup %1062  ;;  %v607_v38 = vadd.f32 1.0, %v1061_v33  ;;  %1082 = vpow2.f32 %v807_v22  ;;  %v808_v49 = vmul.f32 -1.442695, %v489_v35  ;;  %v870_v51 = vpop.f32.mrb[28].mxu0 }
 0x12e   :  { %v1065_v40 = vpop.eup %1064  ;;  %v623_v41 = vadd.f32 1.0, %v1063_v37  ;;  %v428_v42 = vadd.f32 %v869_v36, %v1299_v50  ;;  %v492_v46 = vadd.f32 %v917_v39, %v1299_v50  ;;  %v918_v52 = vpop.f32.mrb[28].mxu1 }
 0x12f   :  { %v1067_v43 = vpop.eup %1066  ;;  %1084 = vrcp.f32 %v607_v38  ;;  %v608_v44 = vadd.f32 1.0, %v1065_v40  ;;  %v871_v55 = vpop.f32.mrb[29].mxu0 }
 0x130   :  { %v1069_v47 = vpop.eup %1068  ;;  %1086 = vrcp.f32 %v623_v41  ;;  %v624_v48 = vadd.f32 1.0, %v1067_v43  ;;  %v793_v54 = vmul.f32 -1.442695, %v428_v42  ;;  %v919_v56 = vpop.f32.mrb[29].mxu1  ;;  %v809_v58 = vmul.f32 -1.442695, %v492_v46 }
 0x131   :  { %v1071_v53 = vpop.eup %1070  ;;  %701 = vst [vmem:[%s1432_s3 + $0x30] sm:$0xff] %v1069_v47  ;;  %1088 = vrcp.f32 %v608_v44  ;;  %v872_v59 = vadd.f32 %v871_v55, %v870_v51  ;;  %v920_v60 = vadd.f32 %v919_v56, %v918_v52  ;;  %v873_v61 = vpop.f32.mrb[30].mxu0 }
 0x132   :  { %v1073_v57 = vpop.eup %1072  ;;  %717 = vst [vmem:[%s1432_s3 + $0xb0] sm:$0xff] %v1071_v53  ;;  %1090 = vrcp.f32 %v624_v48  ;;  %v921_v62 = vpop.f32.mrb[30].mxu1 }
 0x133   :  { %v1075_v63 = vpop.eup %1074  ;;  %702 = vst [vmem:[%s1432_s3 + $0x38] sm:$0xff] %v1073_v57  ;;  %1092 = vpow2.f32 %v792_v45  ;;  %v874_v0 = vpop.f32.mrb[31].mxu0  ;;  %v433_v3 = vadd.f32 %v872_v59, %v1299_v50  ;;  %v497_v4 = vadd.f32 %v920_v60, %v1299_v50 }
 0x134   :  { %v922_v1 = vpop.f32.mrb[31].mxu1  ;;  %v1077_v2 = vpop.eup %1076  ;;  %718 = vst [vmem:[%s1432_s3 + $0xb8] sm:$0xff] %v1075_v63  ;;  %1094 = vpow2.f32 %v808_v49  ;;  %v875_v5 = vadd.f32 %v874_v0, %v873_v61 }
 0x135   :  { %v1079_v6 = vpop.eup %1078  ;;  %v609_v7 = vadd.f32 1.0, %v1077_v2  ;;  %1096 = vpow2.f32 %v793_v54  ;;  %v923_v8 = vadd.f32 %v922_v1, %v921_v62  ;;  %v794_v11 = vmul.f32 -1.442695, %v433_v3 }
 0x136   :  { %v1081_v9 = vpop.eup %1080  ;;  %v625_v10 = vadd.f32 1.0, %v1079_v6  ;;  %1098 = vpow2.f32 %v809_v58  ;;  %v436_v14 = vadd.f32 %v875_v5, %v1299_v50  ;;  %v810_v17 = vmul.f32 -1.442695, %v497_v4 }
 0x137   :  { %v1083_v12 = vpop.eup %1082  ;;  %1100 = vrcp.f32 %v609_v7  ;;  %v610_v13 = vadd.f32 1.0, %v1081_v9  ;;  %v500_v15 = vadd.f32 %v923_v8, %v1299_v50 }
 0x138   :  { %1102 = vrcp.f32 %v625_v10  ;;  %v626_v16 = vadd.f32 1.0, %v1083_v12  ;;  %v795_v19 = vmul.f32 -1.442695, %v436_v14 }
 0x139   :  { %v1085_v18 = vpop.eup %1084  ;;  %1104 = vrcp.f32 %v610_v13  ;;  %v811_v21 = vmul.f32 -1.442695, %v500_v15 }
 0x13a   :  { %v1087_v20 = vpop.eup %1086  ;;  %703 = vst [vmem:[%s1432_s3 + $0x40] sm:$0xff] %v1085_v18  ;;  %1106 = vrcp.f32 %v626_v16 }
 0x13b   :  { %v1089_v22 = vpop.eup %1088  ;;  %719 = vst [vmem:[%s1432_s3 + $0xc0] sm:$0xff] %v1087_v20  ;;  %1108 = vpow2.f32 %v794_v11 }
 0x13c   :  { %v1091_v50 = vpop.eup %1090  ;;  %704 = vst [vmem:[%s1432_s3 + $0x48] sm:$0xff] %v1089_v22  ;;  %1110 = vpow2.f32 %v810_v17 }
 0x13d   :  { %v1093_v23 = vpop.eup %1092  ;;  %720 = vst [vmem:[%s1432_s3 + $0xc8] sm:$0xff] %v1091_v50  ;;  %1112 = vpow2.f32 %v795_v19 }
 0x13e   :  { %v1095_v24 = vpop.eup %1094  ;;  %v611_v25 = vadd.f32 1.0, %v1093_v23  ;;  %1114 = vpow2.f32 %v811_v21 }
 0x13f   :  { %v1097_v26 = vpop.eup %1096  ;;  %v627_v27 = vadd.f32 1.0, %v1095_v24 }
 0x140   :  { %v1099_v28 = vpop.eup %1098  ;;  %1116 = vrcp.f32 %v611_v25  ;;  %v612_v29 = vadd.f32 1.0, %v1097_v26 }
 0x141   :  { %v1101_v30 = vpop.eup %1100  ;;  %1118 = vrcp.f32 %v627_v27  ;;  %v628_v31 = vadd.f32 1.0, %v1099_v28 }
 0x142   :  { %v1103_v32 = vpop.eup %1102  ;;  %705 = vst [vmem:[%s1432_s3 + $0x50] sm:$0xff] %v1101_v30  ;;  %1120 = vrcp.f32 %v612_v29 }
 0x143   :  { %v1105_v33 = vpop.eup %1104  ;;  %721 = vst [vmem:[%s1432_s3 + $0xd0] sm:$0xff] %v1103_v32  ;;  %1122 = vrcp.f32 %v628_v31 }
 0x144   :  { %v1107_v34 = vpop.eup %1106  ;;  %706 = vst [vmem:[%s1432_s3 + $0x58] sm:$0xff] %v1105_v33 }
 0x145   :  { %v1109_v35 = vpop.eup %1108  ;;  %722 = vst [vmem:[%s1432_s3 + $0xd8] sm:$0xff] %v1107_v34 }
 0x146   :  { %v1111_v36 = vpop.eup %1110  ;;  %v613_v37 = vadd.f32 1.0, %v1109_v35 }
 0x147   :  { %v1113_v38 = vpop.eup %1112  ;;  %v629_v39 = vadd.f32 1.0, %v1111_v36 }
 0x148   :  { %v1115_v40 = vpop.eup %1114  ;;  %1124 = vrcp.f32 %v613_v37  ;;  %v614_v41 = vadd.f32 1.0, %v1113_v38 }
 0x149   :  { %1126 = vrcp.f32 %v629_v39  ;;  %v630_v42 = vadd.f32 1.0, %v1115_v40 }
 0x14a   :  { %v1117_v43 = vpop.eup %1116  ;;  %1128 = vrcp.f32 %v614_v41 }
 0x14b   :  { %v1119_v44 = vpop.eup %1118  ;;  %707 = vst [vmem:[%s1432_s3 + $0x60] sm:$0xff] %v1117_v43  ;;  %1130 = vrcp.f32 %v630_v42 }
 0x14c   :  { %v1121_v45 = vpop.eup %1120  ;;  %723 = vst [vmem:[%s1432_s3 + $0xe0] sm:$0xff] %v1119_v44 }
 0x14d   :  { %v1123_v46 = vpop.eup %1122  ;;  %708 = vst [vmem:[%s1432_s3 + $0x68] sm:$0xff] %v1121_v45 }
 0x14e   :  { %724 = vst [vmem:[%s1432_s3 + $0xe8] sm:$0xff] %v1123_v46 }
 0x152   :  { %v1125_v47 = vpop.eup %1124 }
 0x153   :  { %v1127_v48 = vpop.eup %1126  ;;  %709 = vst [vmem:[%s1432_s3 + $0x70] sm:$0xff] %v1125_v47 }
 0x154   :  { %v1129_v49 = vpop.eup %1128  ;;  %725 = vst [vmem:[%s1432_s3 + $0xf0] sm:$0xff] %v1127_v48 }
 0x155   :  { %v1131_v51 = vpop.eup %1130  ;;  %710 = vst [vmem:[%s1432_s3 + $0x78] sm:$0xff] %v1129_v49 }
 0x156   :  { %726 = vst [vmem:[%s1432_s3 + $0xf8] sm:$0xff] %v1131_v51 }

// kernel: forward_im2col.7
= control target key start
LH: loop header
LB: loop body
LE: loop exit
PB: predicated region body
PF: predicated region fallthrough
CT: control target
= control target key end

     0   :  { %vm2724_vm0 = vmmov 0   ;;  %s3513_s1 = inlined_call_operand.vmem [shape: bf16[1152,128], index: 1, kind: input, shape index: {}]   ;;  %s3514_s0 = inlined_call_operand.vmem [shape: bf16[176,1152], index: 0, kind: input, shape index: {}]   ;;  %s3515_s2 = inlined_call_operand.vmem [shape: f32[1,128], index: 2, kind: input, shape index: {}]   ;;  %s3516_s3 = inlined_call_operand.vmem [shape: f32[176,128], index: 3, kind: output, shape index: {}]  }
   0x1   :  { %v2464_v0 = vld [vmem:[%s3513_s1 + $0x40] sm:$0xff]   ;;  %v2466_v2 = vld [vmem:[%s3513_s1 + $0x48] sm:$0xff]   ;;  %v2468_v4 = vld [vmem:[%s3513_s1 + $0x50] sm:$0xff]  }
   0x2   :  { %v2465_v1 = vld [vmem:[%s3513_s1] sm:$0xff]   ;;  %2039 = vmatprep.subr.bf16.mxu0 %v2464_v0  ;;  %2446 = vmatprep.subr.bf16.mxu1 %v2464_v0  ;;  %v2467_v3 = vld [vmem:[%s3513_s1 + $0x8] sm:$0xff]   ;;  %v2469_v5 = vld [vmem:[%s3513_s1 + $0x10] sm:$0xff]  }
   0x3   :  { %2040 = vmatpush3.bf16.msra.mxu0 %v2465_v1  ;;  %2454 = vmatpush3.bf16.msra.mxu1 %v2465_v1  ;;  %v2470_v6 = vld [vmem:[%s3513_s1 + $0x58] sm:$0xff]   ;;  %v2472_v8 = vld [vmem:[%s3513_s1 + $0x60] sm:$0xff]   ;;  %v2474_v10 = vld [vmem:[%s3513_s1 + $0x68] sm:$0xff]  }
   0x4   :  { %2041 = vmatprep.subr.bf16.mxu0 %v2466_v2  ;;  %2447 = vmatprep.subr.bf16.mxu1 %v2466_v2  ;;  %v2471_v7 = vld [vmem:[%s3513_s1 + $0x18] sm:$0xff]   ;;  %v2473_v9 = vld [vmem:[%s3513_s1 + $0x20] sm:$0xff]   ;;  %v2475_v13 = vld [vmem:[%s3513_s1 + $0x28] sm:$0xff]  }
   0x5   :  { %v2482_v11 = vld [vmem:[%s3514_s0 + $0x4] ss:$36 sps:$4 sm:$0xff]   ;;  %v2485_v12 = vld [vmem:[%s3514_s0 + $0x1b4] ss:$36 sps:$4 sm:$0xff]   ;;  %v2491_v25 = vld [vmem:[%s3514_s0 + $0x4c] ss:$36 sps:$4 sm:$0xff]  }
   0x6   :  { %v2476_v14 = vld [vmem:[%s3513_s1 + $0x70] sm:$0xff]   ;;  %1246 = vmatprep.mubr.bf16.mxu0 %v2482_v11  ;;  %1294 = vmatprep.mubr.bf16.mxu1 %v2485_v12  ;;  %v2478_v16 = vld [vmem:[%s3513_s1 + $0x78] sm:$0xff]   ;;  %v2486_v18 = vld [vmem:[%s3513_s1 + $0x140] sm:$0xff]  }
   0x7   :  { %2042 = vmatpush3.bf16.msra.mxu0 %v2467_v3  ;;  %2455 = vmatpush3.bf16.msra.mxu1 %v2467_v3  ;;  %v2477_v15 = vld [vmem:[%s3513_s1 + $0x30] sm:$0xff]   ;;  %v2479_v17 = vld [vmem:[%s3513_s1 + $0x38] sm:$0xff]   ;;  %v2480_v19 = vld [vmem:[%s3514_s0] ss:$36 sps:$4 sm:$0xff]  }
   0x8   :  { %2043 = vmatprep.subr.bf16.mxu0 %v2468_v4  ;;  %2448 = vmatprep.subr.bf16.mxu1 %v2468_v4  ;;  %v2483_v20 = vld [vmem:[%s3514_s0 + $0x1b0] ss:$36 sps:$4 sm:$0xff]   ;;  %v2488_v21 = vld [vmem:[%s3513_s1 + $0xc0] sm:$0xff]   ;;  %v2490_v24 = vld [vmem:[%s3513_s1 + $0x148] sm:$0xff]  }
   0x9   :  { %v2487_v22 = vld [vmem:[%s3513_s1 + $0x100] sm:$0xff]   ;;  %v2498_v27 = vld [vmem:[%s3513_s1 + $0xc8] sm:$0xff]   ;;  %v2500_v30 = vld [vmem:[%s3513_s1 + $0x150] sm:$0xff]  }
   0xa   :  { %v2489_v23 = vld [vmem:[%s3513_s1 + $0x80] sm:$0xff]   ;;  %v2495_v28 = vld [vmem:[%s3513_s1 + $0x108] sm:$0xff]   ;;  %v2497_v32 = vld [vmem:[%s3514_s0 + $0x1f8] ss:$36 sps:$4 sm:$0xff]  }
   0xb   :  { %2044 = vmatpush3.bf16.msra.mxu0 %v2469_v5  ;;  %2456 = vmatpush3.bf16.msra.mxu1 %v2469_v5  ;;  %v2493_v26 = vld [vmem:[%s3514_s0 + $0x1fc] ss:$36 sps:$4 sm:$0xff]   ;;  %v2499_v29 = vld [vmem:[%s3513_s1 + $0x88] sm:$0xff]   ;;  %v2501_v33 = vld [vmem:[%s3513_s1 + $0xd0] sm:$0xff]  }
   0xc   :  { %2045 = vmatprep.subr.bf16.mxu0 %v2470_v6  ;;  %2449 = vmatprep.subr.bf16.mxu1 %v2470_v6  ;;  %v2496_v31 = vld [vmem:[%s3514_s0 + $0x48] ss:$36 sps:$4 sm:$0xff]   ;;  %v2502_v34 = vld [vmem:[%s3513_s1 + $0x110] sm:$0xff]   ;;  %v2510_v38 = vld [vmem:[%s3513_s1 + $0xd8] sm:$0xff]  }
   0xd   :  { %v2503_v35 = vld [vmem:[%s3513_s1 + $0x90] sm:$0xff]   ;;  %v2506_v37 = vld [vmem:[%s3514_s0 + $0x244] ss:$36 sps:$4 sm:$0xff]   ;;  %v2511_v39 = vld [vmem:[%s3513_s1 + $0x158] sm:$0xff]  }
   0xe   :  { %v2504_v36 = vld [vmem:[%s3514_s0 + $0x94] ss:$36 sps:$4 sm:$0xff]   ;;  %v2509_v43 = vld [vmem:[%s3514_s0 + $0x240] ss:$36 sps:$4 sm:$0xff]   ;;  %v2516_v46 = vld [vmem:[%s3514_s0 + $0x28c] ss:$36 sps:$4 sm:$0xff]  }
   0xf   :  { %2046 = vmatpush3.bf16.msra.mxu0 %v2471_v7  ;;  %2457 = vmatpush3.bf16.msra.mxu1 %v2471_v7  ;;  %v2512_v40 = vld [vmem:[%s3513_s1 + $0x98] sm:$0xff]   ;;  %v2508_v42 = vld [vmem:[%s3514_s0 + $0x90] ss:$36 sps:$4 sm:$0xff]   ;;  %v2518_v44 = vld [vmem:[%s3513_s1 + $0xe0] sm:$0xff]  }
  0x10   :  { %2047 = vmatprep.subr.bf16.mxu0 %v2472_v8  ;;  %2450 = vmatprep.subr.bf16.mxu1 %v2472_v8  ;;  %v2513_v41 = vld [vmem:[%s3513_s1 + $0x118] sm:$0xff]   ;;  %v2522_v47 = vld [vmem:[%s3513_s1 + $0x160] sm:$0xff]   ;;  %v2524_v50 = vld [vmem:[%s3513_s1 + $0xe8] sm:$0xff]  }
  0x11   :  { %v2514_v45 = vld [vmem:[%s3514_s0 + $0xdc] ss:$36 sps:$4 sm:$0xff]   ;;  %v2526_v51 = vld [vmem:[%s3513_s1 + $0x168] sm:$0xff]   ;;  %v2529_v57 = vld [vmem:[%s3514_s0 + $0x2d4] ss:$36 sps:$4 sm:$0xff]  }
  0x12   :  { %v2521_v48 = vld [vmem:[%s3513_s1 + $0xa0] sm:$0xff]   ;;  %v2519_v52 = vld [vmem:[%s3514_s0 + $0xd8] ss:$36 sps:$4 sm:$0xff]   ;;  %v2520_v53 = vld [vmem:[%s3514_s0 + $0x288] ss:$36 sps:$4 sm:$0xff]  }
  0x13   :  { %2048 = vmatpush3.bf16.msra.mxu0 %v2473_v9  ;;  %2458 = vmatpush3.bf16.msra.mxu1 %v2473_v9  ;;  %v2523_v49 = vld [vmem:[%s3513_s1 + $0x120] sm:$0xff]   ;;  %v2525_v54 = vld [vmem:[%s3513_s1 + $0xa8] sm:$0xff]   ;;  %v2534_v58 = vld [vmem:[%s3513_s1 + $0xf0] sm:$0xff]   ;;  %v2723_v9 = vmov 0.0  }
  0x14   :  { %2049 = vmatprep.subr.bf16.mxu0 %v2474_v10  ;;  %2451 = vmatprep.subr.bf16.mxu1 %v2474_v10  ;;  %v2531_v55 = vld [vmem:[%s3513_s1 + $0x128] sm:$0xff]   ;;  %v2535_v59 = vld [vmem:[%s3513_s1 + $0xb0] sm:$0xff]   ;;  %v2536_v60 = vld [vmem:[%s3513_s1 + $0xf8] sm:$0xff]  }
  0x15   :  { %v2527_v56 = vld [vmem:[%s3514_s0 + $0x124] ss:$36 sps:$4 sm:$0xff]   ;;  %v2537_v61 = vld [vmem:[%s3513_s1 + $0x170] sm:$0xff]   ;;  %v2538_v0 = vld [vmem:[%s3513_s1 + $0xb8] sm:$0xff]  }
  0x16   :  { %v2539_v62 = vld [vmem:[%s3513_s1 + $0x130] sm:$0xff]   ;;  %v2532_v63 = vld [vmem:[%s3514_s0 + $0x120] ss:$36 sps:$4 sm:$0xff]   ;;  %v2546_v4 = vld [vmem:[%s3513_s1 + $0x178] sm:$0xff]  }
  0x17   :  { %2050 = vmatpush3.bf16.msra.mxu0 %v2475_v13  ;;  %2459 = vmatpush3.bf16.msra.mxu1 %v2475_v13  ;;  %v2533_v1 = vld [vmem:[%s3514_s0 + $0x2d0] ss:$36 sps:$4 sm:$0xff]   ;;  %v2547_v5 = vld [vmem:[%s3513_s1 + $0x138] sm:$0xff]   ;;  %v2548_v6 = vld [vmem:[%s3513_s1 + $0x1c0] sm:$0xff]  }
  0x18   :  { %2051 = vmatprep.subr.bf16.mxu0 %v2476_v14  ;;  %2452 = vmatprep.subr.bf16.mxu1 %v2476_v14  ;;  %v2540_v2 = vld [vmem:[%s3514_s0 + $0x16c] ss:$36 sps:$4 sm:$0xff]   ;;  %v2549_v10 = vld [vmem:[%s3513_s1 + $0x180] sm:$0xff]   ;;  %v2550_v11 = vld [vmem:[%s3514_s0 + $0x54] ss:$36 sps:$4 sm:$0xff]  }
  0x19   :  { %v2544_v3 = vld [vmem:[%s3514_s0 + $0xc] ss:$36 sps:$4 sm:$0xff]   ;;  %v2554_v12 = vld [vmem:[%s3514_s0 + $0x14] ss:$36 sps:$4 sm:$0xff]  }
  0x1a   :  { %v2542_v7 = vld [vmem:[%s3514_s0 + $0x8] ss:$36 sps:$4 sm:$0xff]  }
  0x1b   :  { %2052 = vmatpush3.bf16.msra.mxu0 %v2477_v15  ;;  %2460 = vmatpush3.bf16.msra.mxu1 %v2477_v15  ;;  %v2545_v8 = vld [vmem:[%s3514_s0 + $0x168] ss:$36 sps:$4 sm:$0xff]   ;;  %v2552_v15 = vld [vmem:[%s3514_s0 + $0x10] ss:$36 sps:$4 sm:$0xff]  }
  0x1c   :  { %2053 = vmatprep.subr.bf16.mxu0 %v2478_v16  ;;  %2453 = vmatprep.subr.bf16.mxu1 %v2478_v16  ;;  %v2557_v13 = vld [vmem:[%s3513_s1 + $0x1c8] sm:$0xff]   ;;  %v2555_v16 = vld [vmem:[%s3514_s0 + $0x50] ss:$36 sps:$4 sm:$0xff]  }
  0x1d   :  { %v2562_v14 = vld [vmem:[%s3513_s1 + $0x188] sm:$0xff]  }
  0x1f   :  { %2054 = vmatpush3.bf16.msra.mxu0 %v2479_v17  ;;  %2461 = vmatpush3.bf16.msra.mxu1 %v2479_v17  ;;  %v2556_v17 = vld [vmem:[%s3513_s1 + $0x200] sm:$0xff]  }
  0x20   :  { %2203 = vmatprep.subr.bf16.mxu0 %v2486_v18  ;;  %2121 = vmatprep.subr.bf16.mxu1 %v2488_v21  ;;  %v2572_v18 = vld [vmem:[%s3513_s1 + $0x1d0] sm:$0xff]  }
  0x21   :  { %v2573_v21 = vld [vmem:[%s3513_s1 + $0x190] sm:$0xff]  }
  0x22   :  { %1247 = vmatmul.mubr.bf16.vlgmr.msra.gmra.mrb[0].mxu0 %v2480_v19  ;;  %1295 = vmatmul.mubr.bf16.vlgmr.msra.gmra.mrb[0].mxu1 %v2483_v20  ;;  %v2558_v19 = vld [vmem:[%s3514_s0 + $0x9c] ss:$36 sps:$4 sm:$0xff]  }
  0x23   :  { %2204 = vmatpush3.bf16.msra.mxu0 %v2487_v22  ;;  %2122 = vmatpush3.bf16.msra.mxu1 %v2489_v23  ;;  %v2560_v20 = vld [vmem:[%s3514_s0 + $0x5c] ss:$36 sps:$4 sm:$0xff]   ;;  %v2565_v22 = vld [vmem:[%s3513_s1 + $0x208] sm:$0xff]  }
  0x24   :  { %2205 = vmatprep.subr.bf16.mxu0 %v2490_v24  ;;  %1254 = vmatprep.mubr.bf16.mxu0 %v2491_v25  ;;  %v2563_v23 = vld [vmem:[%s3514_s0 + $0x98] ss:$36 sps:$4 sm:$0xff]  }
  0x25   :  { %1302 = vmatprep.mubr.bf16.mxu1 %v2493_v26  ;;  %2123 = vmatprep.subr.bf16.mxu1 %v2498_v27  ;;  %v2581_v24 = vld [vmem:[%s3513_s1 + $0x1d8] sm:$0xff]   ;;  %v2566_v27 = vld [vmem:[%s3514_s0 + $0xe4] ss:$36 sps:$4 sm:$0xff]  }
  0x26   :  { %v2582_v25 = vld [vmem:[%s3513_s1 + $0x198] sm:$0xff]  }
  0x27   :  { %2206 = vmatpush3.bf16.msra.mxu0 %v2495_v28  ;;  %2124 = vmatpush3.bf16.msra.mxu1 %v2499_v29  ;;  %v2564_v26 = vld [vmem:[%s3514_s0 + $0x58] ss:$36 sps:$4 sm:$0xff]   ;;  %v2568_v28 = vld [vmem:[%s3514_s0 + $0xa4] ss:$36 sps:$4 sm:$0xff]   ;;  %v2578_v29 = vld [vmem:[%s3513_s1 + $0x210] sm:$0xff]  }
  0x28   :  { %2207 = vmatprep.subr.bf16.mxu0 %v2500_v30  ;;  %2125 = vmatprep.subr.bf16.mxu1 %v2501_v33  ;;  %v2570_v30 = vld [vmem:[%s3514_s0 + $0xe0] ss:$36 sps:$4 sm:$0xff]  }
  0x29   :  { %v2594_v33 = vld [vmem:[%s3513_s1 + $0x1e0] sm:$0xff]  }
  0x2a   :  { %1255 = vmatmul.mubr.bf16.gmra.mrb[4].mxu0 %v2496_v31  ;;  %1303 = vmatmul.mubr.bf16.gmra.mrb[4].mxu1 %v2497_v32  ;;  %v2571_v31 = vld [vmem:[%s3514_s0 + $0xa0] ss:$36 sps:$4 sm:$0xff]   ;;  %v2589_v32 = vld [vmem:[%s3513_s1 + $0x218] sm:$0xff]  }
  0x2b   :  { %2208 = vmatpush3.bf16.msra.mxu0 %v2502_v34  ;;  %2126 = vmatpush3.bf16.msra.mxu1 %v2503_v35  ;;  %v2597_v34 = vld [vmem:[%s3513_s1 + $0x1a0] sm:$0xff]   ;;  %v2574_v35 = vld [vmem:[%s3514_s0 + $0x12c] ss:$36 sps:$4 sm:$0xff]  }
  0x2c   :  { %1262 = vmatprep.mubr.bf16.mxu0 %v2504_v36  ;;  %1310 = vmatprep.mubr.bf16.mxu1 %v2506_v37  ;;  %v2576_v36 = vld [vmem:[%s3514_s0 + $0xec] ss:$36 sps:$4 sm:$0xff]   ;;  %v2598_v37 = vld [vmem:[%s3513_s1 + $0x220] sm:$0xff]  }
  0x2d   :  { %2127 = vmatprep.subr.bf16.mxu1 %v2510_v38  ;;  %2209 = vmatprep.subr.bf16.mxu0 %v2511_v39  ;;  %v2605_v38 = vld [vmem:[%s3513_s1 + $0x1e8] sm:$0xff]  }
  0x2e   :  { %v2606_v39 = vld [vmem:[%s3513_s1 + $0x1a8] sm:$0xff]  }
  0x2f   :  { %2128 = vmatpush3.bf16.msra.mxu1 %v2512_v40  ;;  %2210 = vmatpush3.bf16.msra.mxu0 %v2513_v41  ;;  %v2579_v40 = vld [vmem:[%s3514_s0 + $0x128] ss:$36 sps:$4 sm:$0xff]  }
  0x30   :  { %2129 = vmatprep.subr.bf16.mxu1 %v2518_v44  ;;  %2211 = vmatprep.subr.bf16.mxu0 %v2522_v47  ;;  %v2580_v41 = vld [vmem:[%s3514_s0 + $0xe8] ss:$36 sps:$4 sm:$0xff]   ;;  %v2622_v47 = vld [vmem:[%s3513_s1 + $0x230] sm:$0xff]  }
  0x31   :  { %v2613_v44 = vld [vmem:[%s3513_s1 + $0x228] sm:$0xff]  }
  0x32   :  { %1263 = vmatmul.mubr.bf16.gmra.mrb[8].mxu0 %v2508_v42  ;;  %1311 = vmatmul.mubr.bf16.gmra.mrb[8].mxu1 %v2509_v43  ;;  %v2583_v42 = vld [vmem:[%s3514_s0 + $0x174] ss:$36 sps:$4 sm:$0xff]  }
  0x33   :  { %1270 = vmatprep.mubr.bf16.mxu0 %v2514_v45  ;;  %1318 = vmatprep.mubr.bf16.mxu1 %v2516_v46  ;;  %v2585_v43 = vld [vmem:[%s3514_s0 + $0x134] ss:$36 sps:$4 sm:$0xff]  }
  0x34   :  { %2130 = vmatpush3.bf16.msra.mxu1 %v2521_v48  ;;  %2212 = vmatpush3.bf16.msra.mxu0 %v2523_v49  ;;  %v2614_v45 = vld [vmem:[%s3513_s1 + $0x1f0] sm:$0xff]  }
  0x35   :  { %2131 = vmatprep.subr.bf16.mxu1 %v2524_v50  ;;  %2213 = vmatprep.subr.bf16.mxu0 %v2526_v51  ;;  %v2615_v46 = vld [vmem:[%s3513_s1 + $0x1b0] sm:$0xff]   ;;  %v2590_v50 = vld [vmem:[%s3514_s0 + $0x1bc] ss:$36 sps:$4 sm:$0xff]  }
  0x36   :  { %v2587_v48 = vld [vmem:[%s3514_s0 + $0x170] ss:$36 sps:$4 sm:$0xff]   ;;  %v2592_v51 = vld [vmem:[%s3514_s0 + $0x17c] ss:$36 sps:$4 sm:$0xff]  }
  0x37   :  { %v2588_v49 = vld [vmem:[%s3514_s0 + $0x130] ss:$36 sps:$4 sm:$0xff]  }
  0x38   :  { %2132 = vmatpush3.bf16.msra.mxu1 %v2525_v54  ;;  %2214 = vmatpush3.bf16.msra.mxu0 %v2531_v55  ;;  %v2631_v54 = vld [vmem:[%s3513_s1 + $0x238] sm:$0xff]  }
  0x39   :  { %2133 = vmatprep.subr.bf16.mxu1 %v2534_v58  ;;  %2215 = vmatprep.subr.bf16.mxu0 %v2537_v61  ;;  %v2595_v55 = vld [vmem:[%s3514_s0 + $0x1b8] ss:$36 sps:$4 sm:$0xff]   ;;  %v2601_v58 = vld [vmem:[%s3514_s0 + $0x1c4] ss:$36 sps:$4 sm:$0xff]   ;;  %v2607_v61 = vld [vmem:[%s3514_s0 + $0x24c] ss:$36 sps:$4 sm:$0xff]  }
  0x3a   :  { %1271 = vmatmul.mubr.bf16.gmra.mrb[12].mxu0 %v2519_v52  ;;  %1319 = vmatmul.mubr.bf16.gmra.mrb[12].mxu1 %v2520_v53  ;;  %v2629_v52 = vld [vmem:[%s3513_s1 + $0x1f8] sm:$0xff]  }
  0x3b   :  { %1278 = vmatprep.mubr.bf16.mxu0 %v2527_v56  ;;  %1326 = vmatprep.mubr.bf16.mxu1 %v2529_v57  ;;  %v2630_v53 = vld [vmem:[%s3513_s1 + $0x1b8] sm:$0xff]   ;;  %v2599_v57 = vld [vmem:[%s3514_s0 + $0x204] ss:$36 sps:$4 sm:$0xff]  }
  0x3c   :  { %2134 = vmatpush3.bf16.msra.mxu1 %v2535_v59  ;;  %2216 = vmatpush3.bf16.msra.mxu0 %v2539_v62  ;;  %v2596_v56 = vld [vmem:[%s3514_s0 + $0x178] ss:$36 sps:$4 sm:$0xff]   ;;  %v2603_v59 = vld [vmem:[%s3514_s0 + $0x200] ss:$36 sps:$4 sm:$0xff]   ;;  %v2609_v62 = vld [vmem:[%s3514_s0 + $0x20c] ss:$36 sps:$4 sm:$0xff]  }
  0x3d   :  { %2135 = vmatprep.subr.bf16.mxu1 %v2536_v60  ;;  %2217 = vmatprep.subr.bf16.mxu0 %v2546_v4  ;;  %v2604_v60 = vld [vmem:[%s3514_s0 + $0x1c0] ss:$36 sps:$4 sm:$0xff]   ;;  %v2621_v4 = vld [vmem:[%s3514_s0 + $0x250] ss:$36 sps:$4 sm:$0xff]  }
  0x40   :  { %2136 = vmatpush3.bf16.msra.mxu1 %v2538_v0  ;;  %2218 = vmatpush3.bf16.msra.mxu0 %v2547_v5  ;;  %v2612_v0 = vld [vmem:[%s3514_s0 + $0x208] ss:$36 sps:$4 sm:$0xff]   ;;  %v2623_v5 = vld [vmem:[%s3514_s0 + $0x2dc] ss:$36 sps:$4 sm:$0xff]  }
  0x41   :  { %2285 = vmatprep.subr.bf16.mxu1 %v2548_v6  ;;  %2386 = vmatprep.subr.bf16.mxu0 %v2723_v9  ;;  %v2625_v6 = vld [vmem:[%s3514_s0 + $0x29c] ss:$36 sps:$4 sm:$0xff]  }
  0x42   :  { %1279 = vmatmul.mubr.bf16.gmra.mrb[16].mxu0 %v2532_v63  ;;  %1327 = vmatmul.mubr.bf16.gmra.mrb[16].mxu1 %v2533_v1  ;;  %v2611_v63 = vld [vmem:[%s3514_s0 + $0x248] ss:$36 sps:$4 sm:$0xff]   ;;  %v2616_v1 = vld [vmem:[%s3514_s0 + $0x294] ss:$36 sps:$4 sm:$0xff]  }
  0x43   :  { %1286 = vmatprep.mubr.bf16.mxu0 %v2540_v2  ;;  %1367 = vmatprep.mubr.bf16.mxu1 %v2544_v3  ;;  %v2618_v2 = vld [vmem:[%s3514_s0 + $0x254] ss:$36 sps:$4 sm:$0xff]  }
  0x44   :  { %v2620_v3 = vld [vmem:[%s3514_s0 + $0x290] ss:$36 sps:$4 sm:$0xff]  }
  0x4a   :  { %1287 = vmatmul.mubr.bf16.gmra.mrb[20].mxu0 %v2545_v8  ;;  %1368 = vmatmul.mubr.bf16.vlgmr.msra.gmra.mrb[20].mxu1 %v2542_v7  ;;  %v2627_v7 = vld [vmem:[%s3514_s0 + $0x2d8] ss:$36 sps:$4 sm:$0xff]  }
  0x4b   :  { %2286 = vmatpush3.bf16.msra.mxu1 %v2549_v10  ;;  %1375 = vmatprep.mubr.bf16.mxu1 %v2550_v11  ;;  %v2628_v8 = vld [vmem:[%s3514_s0 + $0x298] ss:$36 sps:$4 sm:$0xff]   ;;  %v2632_v10 = vld [vmem:[%s3514_s0 + $0x2e4] ss:$36 sps:$4 sm:$0xff]  }
  0x4c   :  { %1488 = vmatprep.mubr.bf16.mxu0 %v2554_v12  ;;  %2287 = vmatprep.subr.bf16.mxu1 %v2557_v13  ;;  %v2636_v11 = vld [vmem:[%s3514_s0 + $0x1c] ss:$36 sps:$4 sm:$0xff]  }
  0x4d   :  { %v2634_v12 = vld [vmem:[%s3514_s0 + $0x18] ss:$36 sps:$4 sm:$0xff]   ;;  %v2637_v13 = vld [vmem:[%s3514_s0 + $0x2e0] ss:$36 sps:$4 sm:$0xff]  }
  0x4f   :  { %2288 = vmatpush3.bf16.msra.mxu1 %v2562_v14  ;;  %v2638_v14 = vld [vmem:[%s3514_s0 + $0x64] ss:$36 sps:$4 sm:$0xff]  }
  0x50   :  { %2289 = vmatprep.subr.bf16.mxu1 %v2572_v18  ;;  %v2644_v18 = vld [vmem:[%s3514_s0 + $0xa8] ss:$36 sps:$4 sm:$0xff]  }
  0x52   :  { %1376 = vmatmul.mubr.bf16.gmra.mrb[24].mxu1 %v2555_v16  ;;  %1489 = vmatmul.mubr.bf16.vlgmr.msra.gmra.mrb[24].mxu0 %v2552_v15  ;;  %v2640_v15 = vld [vmem:[%s3514_s0 + $0x60] ss:$36 sps:$4 sm:$0xff]  }
  0x53   :  { %2387 = vmatpush3.bf16.msra.mxu0 %v2556_v17  ;;  %1383 = vmatprep.mubr.bf16.mxu1 %v2558_v19  ;;  %v2641_v16 = vld [vmem:[%s3514_s0 + $0x20] ss:$36 sps:$4 sm:$0xff]   ;;  %v2642_v17 = vld [vmem:[%s3514_s0 + $0xac] ss:$36 sps:$4 sm:$0xff]  }
  0x54   :  { %1496 = vmatprep.mubr.bf16.mxu0 %v2560_v20  ;;  %2388 = vmatprep.subr.bf16.mxu0 %v2723_v9  ;;  %v2645_v19 = vld [vmem:[%s3514_s0 + $0x68] ss:$36 sps:$4 sm:$0xff]   ;;  %v2646_v20 = vld [vmem:[%s3514_s0 + $0xf4] ss:$36 sps:$4 sm:$0xff]  }
  0x55   :  { %2290 = vmatpush3.bf16.msra.mxu1 %v2573_v21  ;;  %v2648_v21 = vld [vmem:[%s3514_s0 + $0xf0] ss:$36 sps:$4 sm:$0xff]  }
  0x56   :  { %2291 = vmatprep.subr.bf16.mxu1 %v2581_v24  ;;  %v2652_v24 = vld [vmem:[%s3514_s0 + $0x138] ss:$36 sps:$4 sm:$0xff]  }
  0x57   :  { %2389 = vmatpush3.bf16.msra.mxu0 %v2565_v22  ;;  %v2649_v22 = vld [vmem:[%s3514_s0 + $0xb0] ss:$36 sps:$4 sm:$0xff]  }
  0x58   :  { %2390 = vmatprep.subr.bf16.mxu0 %v2723_v9 }
  0x59   :  { %2292 = vmatpush3.bf16.msra.mxu1 %v2582_v25  ;;  %v2653_v25 = vld [vmem:[%s3514_s0 + $0xf8] ss:$36 sps:$4 sm:$0xff]  }
  0x5a   :  { %1384 = vmatmul.mubr.bf16.gmra.mrb[28].mxu1 %v2563_v23  ;;  %1497 = vmatmul.mubr.bf16.gmra.mrb[28].mxu0 %v2564_v26  ;;  %v2650_v23 = vld [vmem:[%s3514_s0 + $0x13c] ss:$36 sps:$4 sm:$0xff]   ;;  %v2654_v26 = vld [vmem:[%s3514_s0 + $0x184] ss:$36 sps:$4 sm:$0xff]  }
  0x5b   :  { %1391 = vmatprep.mubr.bf16.mxu1 %v2566_v27  ;;  %1504 = vmatprep.mubr.bf16.mxu0 %v2568_v28  ;;  %v2656_v27 = vld [vmem:[%s3514_s0 + $0x180] ss:$36 sps:$4 sm:$0xff]  }
  0x5c   :  { %2391 = vmatpush3.bf16.msra.mxu0 %v2578_v29  ;;  %2293 = vmatprep.subr.bf16.mxu1 %v2594_v33  ;;  %v2657_v28 = vld [vmem:[%s3514_s0 + $0x140] ss:$36 sps:$4 sm:$0xff]   ;;  %v2658_v29 = vld [vmem:[%s3514_s0 + $0x1cc] ss:$36 sps:$4 sm:$0xff]  }
  0x5d   :  { %2392 = vmatprep.subr.bf16.mxu0 %v2723_v9  ;;  %2294 = vmatpush3.bf16.msra.mxu1 %v2597_v34  ;;  %v2664_v33 = vld [vmem:[%s3514_s0 + $0x210] ss:$36 sps:$4 sm:$0xff]  }
  0x5e   :  { %2295 = vmatprep.subr.bf16.mxu1 %v2605_v38  ;;  %v2665_v34 = vld [vmem:[%s3514_s0 + $0x1d0] ss:$36 sps:$4 sm:$0xff]   ;;  %v2670_v38 = vld [vmem:[%s3514_s0 + $0x2a4] ss:$36 sps:$4 sm:$0xff]  }
  0x60   :  { %2393 = vmatpush3.bf16.msra.mxu0 %v2589_v32  ;;  %v2662_v32 = vld [vmem:[%s3514_s0 + $0x214] ss:$36 sps:$4 sm:$0xff]  }
  0x61   :  { %2394 = vmatprep.subr.bf16.mxu0 %v2723_v9  ;;  %2296 = vmatpush3.bf16.msra.mxu1 %v2606_v39  ;;  %v2672_v39 = vld [vmem:[%s3514_s0 + $0x2a0] ss:$36 sps:$4 sm:$0xff]  }
  0x62   :  { %1392 = vmatmul.mubr.bf16.gmra.mrb[32].mxu1 %v2570_v30  ;;  %1505 = vmatmul.mubr.bf16.gmra.mrb[32].mxu0 %v2571_v31  ;;  %v2660_v30 = vld [vmem:[%s3514_s0 + $0x1c8] ss:$36 sps:$4 sm:$0xff]  }
  0x63   :  { %1399 = vmatprep.mubr.bf16.mxu1 %v2574_v35  ;;  %1512 = vmatprep.mubr.bf16.mxu0 %v2576_v36  ;;  %v2661_v31 = vld [vmem:[%s3514_s0 + $0x188] ss:$36 sps:$4 sm:$0xff]   ;;  %v2666_v35 = vld [vmem:[%s3514_s0 + $0x25c] ss:$36 sps:$4 sm:$0xff]  }
  0x64   :  { %2395 = vmatpush3.bf16.msra.mxu0 %v2598_v37  ;;  %2297 = vmatprep.subr.bf16.mxu1 %v2614_v45  ;;  %v2668_v36 = vld [vmem:[%s3514_s0 + $0x258] ss:$36 sps:$4 sm:$0xff]  }
  0x65   :  { %2396 = vmatprep.subr.bf16.mxu0 %v2723_v9  ;;  %2298 = vmatpush3.bf16.msra.mxu1 %v2615_v46  ;;  %v2669_v37 = vld [vmem:[%s3514_s0 + $0x218] ss:$36 sps:$4 sm:$0xff]  }
  0x66   :  { %2299 = vmatprep.subr.bf16.mxu1 %v2629_v52 }
  0x68   :  { %2397 = vmatpush3.bf16.msra.mxu0 %v2613_v44 }
  0x69   :  { %2398 = vmatprep.subr.bf16.mxu0 %v2723_v9  ;;  %2300 = vmatpush3.bf16.msra.mxu1 %v2630_v53 }
  0x6a   :  { %1400 = vmatmul.mubr.bf16.gmra.mrb[36].mxu1 %v2579_v40  ;;  %1513 = vmatmul.mubr.bf16.gmra.mrb[36].mxu0 %v2580_v41  ;;  %v2673_v40 = vld [vmem:[%s3514_s0 + $0x260] ss:$36 sps:$4 sm:$0xff]   ;;  %v2674_v41 = vld [vmem:[%s3514_s0 + $0x2ec] ss:$36 sps:$4 sm:$0xff]  }
  0x6b   :  { %1407 = vmatprep.mubr.bf16.mxu1 %v2583_v42  ;;  %1520 = vmatprep.mubr.bf16.mxu0 %v2585_v43  ;;  %v2676_v42 = vld [vmem:[%s3514_s0 + $0x2e8] ss:$36 sps:$4 sm:$0xff]  }
  0x6c   :  { %2399 = vmatpush3.bf16.msra.mxu0 %v2622_v47  ;;  %v2677_v43 = vld [vmem:[%s3514_s0 + $0x2a8] ss:$36 sps:$4 sm:$0xff]  }
  0x6d   :  { %2400 = vmatprep.subr.bf16.mxu0 %v2723_v9 }
  0x70   :  { %2401 = vmatpush3.bf16.msra.mxu0 %v2631_v54 }
  0x72   :  { %1408 = vmatmul.mubr.bf16.gmra.mrb[40].mxu1 %v2587_v48  ;;  %1521 = vmatmul.mubr.bf16.gmra.mrb[40].mxu0 %v2588_v49  ;;  %v2678_v48 = vld [vmem:[%s3514_s0 + $0x2f0] ss:$36 sps:$4 sm:$0xff]  }
  0x73   :  { %1415 = vmatprep.mubr.bf16.mxu1 %v2590_v50  ;;  %1528 = vmatprep.mubr.bf16.mxu0 %v2592_v51 }
  0x7a   :  { %1416 = vmatmul.mubr.bf16.gmra.mrb[44].mxu1 %v2595_v55  ;;  %1529 = vmatmul.mubr.bf16.gmra.mrb[44].mxu0 %v2596_v56 }
  0x7b   :  { %1423 = vmatprep.mubr.bf16.mxu1 %v2599_v57  ;;  %1536 = vmatprep.mubr.bf16.mxu0 %v2601_v58 }
  0x82   :  { %1424 = vmatmul.mubr.bf16.gmra.mrb[48].mxu1 %v2603_v59  ;;  %1537 = vmatmul.mubr.bf16.gmra.mrb[48].mxu0 %v2604_v60 }
  0x83   :  { %1431 = vmatprep.mubr.bf16.mxu1 %v2607_v61  ;;  %1544 = vmatprep.mubr.bf16.mxu0 %v2609_v62 }
  0x8a   :  { %1432 = vmatmul.mubr.bf16.gmra.mrb[52].mxu1 %v2611_v63  ;;  %1545 = vmatmul.mubr.bf16.gmra.mrb[52].mxu0 %v2612_v0 }
  0x8b   :  { %1439 = vmatprep.mubr.bf16.mxu1 %v2616_v1  ;;  %1552 = vmatprep.mubr.bf16.mxu0 %v2618_v2 }
  0x92   :  { %1440 = vmatmul.mubr.bf16.gmra.mrb[56].mxu1 %v2620_v3  ;;  %1553 = vmatmul.mubr.bf16.gmra.mrb[56].mxu0 %v2621_v4 }
  0x93   :  { %1447 = vmatprep.mubr.bf16.mxu1 %v2623_v5  ;;  %1560 = vmatprep.mubr.bf16.mxu0 %v2625_v6 }
  0x9a   :  { %1448 = vmatmul.mubr.bf16.gmra.mrb[60].mxu1 %v2627_v7  ;;  %1561 = vmatmul.mubr.bf16.gmra.mrb[60].mxu0 %v2628_v8 }
  0x9b   :  { %1568 = vmatprep.mubr.bf16.mxu0 %v2632_v10  ;;  %1609 = vmatprep.mubr.bf16.mxu1 %v2636_v11 }
  0xa2   :  { %1569 = vmatmul.mubr.bf16.gmra.mrb[64].mxu0 %v2637_v13  ;;  %1610 = vmatmul.mubr.bf16.vlgmr.msra.gmra.mrb[64].mxu1 %v2634_v12  ;;  %v3309_v13 = vld [vmem:[%s3515_s2] ss:$0 sm:$0xff] }
  0xa3   :  { %1617 = vmatprep.mubr.bf16.mxu1 %v2638_v14  ;;  %2402 = vmatprep.mubr.msk.bf16.mxu0 %vm2724_vm0, %v2723_v9 }
  0xaa   :  { %1618 = vmatmul.mubr.bf16.gmra.mrb[68].mxu1 %v2640_v15  ;;  %2403 = vmatmul.mubr.bf16.vlgmr.msra.gmra.mrb[68].mxu0 %v2641_v16 }
  0xab   :  { %1625 = vmatprep.mubr.bf16.mxu1 %v2642_v17  ;;  %2406 = vmatprep.mubr.msk.bf16.mxu0 %vm2724_vm0, %v2723_v9 }
  0xb2   :  { %1626 = vmatmul.mubr.bf16.gmra.mrb[72].mxu1 %v2644_v18  ;;  %2407 = vmatmul.mubr.bf16.gmra.mrb[72].mxu0 %v2645_v19 }
  0xb3   :  { %1633 = vmatprep.mubr.bf16.mxu1 %v2646_v20  ;;  %2410 = vmatprep.mubr.msk.bf16.mxu0 %vm2724_vm0, %v2723_v9 }
  0xba   :  { %1634 = vmatmul.mubr.bf16.gmra.mrb[76].mxu1 %v2648_v21  ;;  %2411 = vmatmul.mubr.bf16.gmra.mrb[76].mxu0 %v2649_v22 }
  0xbb   :  { %1641 = vmatprep.mubr.bf16.mxu1 %v2650_v23  ;;  %2414 = vmatprep.mubr.msk.bf16.mxu0 %vm2724_vm0, %v2723_v9 }
  0xc2   :  { %1642 = vmatmul.mubr.bf16.gmra.mrb[80].mxu1 %v2652_v24  ;;  %2415 = vmatmul.mubr.bf16.gmra.mrb[80].mxu0 %v2653_v25 }
  0xc3   :  { %1649 = vmatprep.mubr.bf16.mxu1 %v2654_v26  ;;  %2418 = vmatprep.mubr.msk.bf16.mxu0 %vm2724_vm0, %v2723_v9 }
  0xca   :  { %1650 = vmatmul.mubr.bf16.gmra.mrb[84].mxu1 %v2656_v27  ;;  %2419 = vmatmul.mubr.bf16.gmra.mrb[84].mxu0 %v2657_v28 }
  0xcb   :  { %1657 = vmatprep.mubr.bf16.mxu1 %v2658_v29  ;;  %2422 = vmatprep.mubr.msk.bf16.mxu0 %vm2724_vm0, %v2723_v9 }
  0xd2   :  { %1658 = vmatmul.mubr.bf16.gmra.mrb[88].mxu1 %v2660_v30  ;;  %2423 = vmatmul.mubr.bf16.gmra.mrb[88].mxu0 %v2661_v31 }
  0xd3   :  { %1665 = vmatprep.mubr.bf16.mxu1 %v2662_v32  ;;  %2426 = vmatprep.mubr.msk.bf16.mxu0 %vm2724_vm0, %v2723_v9 }
  0xda   :  { %1666 = vmatmul.mubr.bf16.gmra.mrb[92].mxu1 %v2664_v33  ;;  %2427 = vmatmul.mubr.bf16.gmra.mrb[92].mxu0 %v2665_v34 }
  0xdb   :  { %1673 = vmatprep.mubr.bf16.mxu1 %v2666_v35  ;;  %2430 = vmatprep.mubr.msk.bf16.mxu0 %vm2724_vm0, %v2723_v9 }
  0xe2   :  { %1674 = vmatmul.mubr.bf16.gmra.mrb[96].mxu1 %v2668_v36  ;;  %2431 = vmatmul.mubr.bf16.gmra.mrb[96].mxu0 %v2669_v37 }
  0xe3   :  { %1681 = vmatprep.mubr.bf16.mxu1 %v2670_v38  ;;  %2434 = vmatprep.mubr.msk.bf16.mxu0 %vm2724_vm0, %v2723_v9 }
  0xea   :  { %1682 = vmatmul.mubr.bf16.gmra.mrb[100].mxu1 %v2672_v39  ;;  %2435 = vmatmul.mubr.bf16.gmra.mrb[100].mxu0 %v2673_v40 }
  0xeb   :  { %1689 = vmatprep.mubr.bf16.mxu1 %v2674_v41  ;;  %2438 = vmatprep.mubr.msk.bf16.mxu0 %vm2724_vm0, %v2723_v9 }
  0xf2   :  { %1690 = vmatmul.mubr.bf16.gmra.mrb[104].mxu1 %v2676_v42  ;;  %2439 = vmatmul.mubr.bf16.gmra.mrb[104].mxu0 %v2677_v43 }
  0xf3   :  { %2442 = vmatprep.mubr.msk.bf16.mxu0 %vm2724_vm0, %v2723_v9 }
  0xf5   :  { %v2055_v44 = vpop.f32.mrb[0].mxu0  ;;  %v2091_v45 = vpop.f32.mrb[0].mxu1 }
  0xf6   :  { %v2056_v46 = vpop.f32.mrb[1].mxu0  ;;  %v2092_v47 = vpop.f32.mrb[1].mxu1 }
  0xf7   :  { %v3288_v49 = vadd.f32 %v2056_v46, %v2055_v44  ;;  %v2058_v50 = vpop.f32.mrb[2].mxu0  ;;  %v3290_v51 = vadd.f32 %v2092_v47, %v2091_v45  ;;  %v2094_v52 = vpop.f32.mrb[2].mxu1 }
  0xf8   :  { %v2059_v53 = vpop.f32.mrb[3].mxu0  ;;  %v2095_v54 = vpop.f32.mrb[3].mxu1 }
  0xf9   :  { %v3292_v55 = vadd.f32 %v2059_v53, %v2058_v50  ;;  %v3294_v56 = vadd.f32 %v2095_v54, %v2094_v52  ;;  %v1249_v54 = vadd.f32 %v3288_v49, %v3309_v13 }
  0xfa   :  { %2443 = vmatmul.mubr.bf16.gmra.mrb[108].mxu0 %v2678_v48 }
  0xfd   :  { %v2061_v9 = vpop.f32.mrb[4].mxu0  ;;  %v2097_v57 = vpop.f32.mrb[4].mxu1 }
  0xfe   :  { %v2062_v58 = vpop.f32.mrb[5].mxu0  ;;  %v2098_v59 = vpop.f32.mrb[5].mxu1 }
  0xff   :  { %v3296_v60 = vadd.f32 %v2062_v58, %v2061_v9  ;;  %v2064_v61 = vpop.f32.mrb[6].mxu0  ;;  %v3298_v62 = vadd.f32 %v2098_v59, %v2097_v57  ;;  %v2100_v63 = vpop.f32.mrb[6].mxu1 }
 0x100   :  { %v2065_v0 = vpop.f32.mrb[7].mxu0  ;;  %v2101_v1 = vpop.f32.mrb[7].mxu1 }
 0x101   :  { %v3300_v2 = vadd.f32 %v2065_v0, %v2064_v61  ;;  %v3302_v3 = vadd.f32 %v2101_v1, %v2100_v63  ;;  %v1252_v0 = vadd.f32 %v3292_v55, %v3309_v13  ;;  %v1257_v49 = vadd.f32 %v3296_v60, %v3309_v13 }
 0x105   :  { %v2067_v4 = vpop.f32.mrb[8].mxu0  ;;  %v2103_v5 = vpop.f32.mrb[8].mxu1 }
 0x106   :  { %v2068_v6 = vpop.f32.mrb[9].mxu0  ;;  %v2104_v7 = vpop.f32.mrb[9].mxu1 }
 0x107   :  { %v3304_v8 = vadd.f32 %v2068_v6, %v2067_v4  ;;  %v2070_v10 = vpop.f32.mrb[10].mxu0  ;;  %v2105_v11 = vadd.f32 %v2104_v7, %v2103_v5  ;;  %v2106_v12 = vpop.f32.mrb[10].mxu1 }
 0x108   :  { %v2071_v14 = vpop.f32.mrb[11].mxu0  ;;  %v2107_v15 = vpop.f32.mrb[11].mxu1 }
 0x109   :  { %v3312_v16 = vadd.f32 %v2105_v11, %v3309_v13  ;;  %v3314_v17 = vadd.f32 %v2071_v14, %v2070_v10  ;;  %v2108_v18 = vadd.f32 %v2107_v15, %v2106_v12 }
 0x10b   :  { %v3317_v19 = vadd.f32 %v2108_v18, %v3309_v13 }
 0x10d   :  { %v2073_v20 = vpop.f32.mrb[12].mxu0  ;;  %v2109_v21 = vpop.f32.mrb[12].mxu1 }
 0x10e   :  { %v2074_v22 = vpop.f32.mrb[13].mxu0  ;;  %v2110_v23 = vpop.f32.mrb[13].mxu1 }
 0x10f   :  { %v3319_v24 = vadd.f32 %v2074_v22, %v2073_v20  ;;  %v2076_v25 = vpop.f32.mrb[14].mxu0  ;;  %v2111_v26 = vadd.f32 %v2110_v23, %v2109_v21  ;;  %v2112_v27 = vpop.f32.mrb[14].mxu1  ;;  %v1260_v21 = vadd.f32 %v3300_v2, %v3309_v13 }
 0x110   :  { %v2077_v28 = vpop.f32.mrb[15].mxu0  ;;  %v2113_v29 = vpop.f32.mrb[15].mxu1 }
 0x111   :  { %v3322_v30 = vadd.f32 %v2111_v26, %v3309_v13  ;;  %v3324_v31 = vadd.f32 %v2077_v28, %v2076_v25  ;;  %v2114_v32 = vadd.f32 %v2113_v29, %v2112_v27 }
 0x113   :  { %v3327_v33 = vadd.f32 %v2114_v32, %v3309_v13 }
 0x115   :  { %v2079_v34 = vpop.f32.mrb[16].mxu0  ;;  %v2115_v35 = vpop.f32.mrb[16].mxu1 }
 0x116   :  { %v2080_v36 = vpop.f32.mrb[17].mxu0  ;;  %v2116_v37 = vpop.f32.mrb[17].mxu1 }
 0x117   :  { %v3329_v38 = vadd.f32 %v2080_v36, %v2079_v34  ;;  %v2082_v39 = vpop.f32.mrb[18].mxu0  ;;  %v2117_v40 = vadd.f32 %v2116_v37, %v2115_v35  ;;  %v2118_v41 = vpop.f32.mrb[18].mxu1  ;;  %v1265_v36 = vadd.f32 %v3304_v8, %v3309_v13 }
 0x118   :  { %v2083_v42 = vpop.f32.mrb[19].mxu0  ;;  %v2119_v43 = vpop.f32.mrb[19].mxu1 }
 0x119   :  { %v3332_v44 = vadd.f32 %v2117_v40, %v3309_v13  ;;  %v3334_v45 = vadd.f32 %v2083_v42, %v2082_v39  ;;  %v2120_v46 = vadd.f32 %v2119_v43, %v2118_v41  ;;  %v1268_v41 = vadd.f32 %v3314_v17, %v3309_v13 }
 0x11b   :  { %v3337_v47 = vadd.f32 %v2120_v46, %v3309_v13 }
 0x11d   :  { %v2085_v48 = vpop.f32.mrb[20].mxu0  ;;  %v2137_v50 = vpop.f32.mrb[20].mxu1 }
 0x11e   :  { %v2086_v52 = vpop.f32.mrb[21].mxu0  ;;  %v2138_v53 = vpop.f32.mrb[21].mxu1 }
 0x11f   :  { %v3341_v9 = vadd.f32 %v2086_v52, %v2085_v48  ;;  %v2139_v57 = vadd.f32 %v2138_v53, %v2137_v50  ;;  %v2088_v58 = vpop.f32.mrb[22].mxu0  ;;  %v2140_v59 = vpop.f32.mrb[22].mxu1 }
 0x120   :  { %v2089_v61 = vpop.f32.mrb[23].mxu0  ;;  %v2141_v63 = vpop.f32.mrb[23].mxu1 }
 0x121   :  { %v1370_v1 = vadd.f32 %v2139_v57, %v1249_v54  ;;  %v3345_v4 = vadd.f32 %v2089_v61, %v2088_v58  ;;  %v2142_v5 = vadd.f32 %v2141_v63, %v2140_v59  ;;  %v1273_v61 = vadd.f32 %v3319_v24, %v3309_v13 }
 0x123   :  { %v1373_v6 = vadd.f32 %v2142_v5, %v1252_v0  ;;  %v1276_v5 = vadd.f32 %v3324_v31, %v3309_v13 }
 0x125   :  { %v2143_v7 = vpop.f32.mrb[24].mxu1  ;;  %v2219_v10 = vpop.f32.mrb[24].mxu0 }
 0x126   :  { %v2144_v11 = vpop.f32.mrb[25].mxu1  ;;  %v2220_v12 = vpop.f32.mrb[25].mxu0 }
 0x127   :  { %v2145_v14 = vadd.f32 %v2144_v11, %v2143_v7  ;;  %v2221_v15 = vadd.f32 %v2220_v12, %v2219_v10  ;;  %v2146_v18 = vpop.f32.mrb[26].mxu1  ;;  %v2222_v20 = vpop.f32.mrb[26].mxu0 }
 0x128   :  { %v2147_v55 = vpop.f32.mrb[27].mxu1  ;;  %v2223_v22 = vpop.f32.mrb[27].mxu0 }
 0x129   :  { %v1378_v23 = vadd.f32 %v2145_v14, %v1257_v49  ;;  %v3351_v25 = vadd.f32 %v2221_v15, %v1370_v1  ;;  %v2148_v26 = vadd.f32 %v2147_v55, %v2146_v18  ;;  %v2224_v27 = vadd.f32 %v2223_v22, %v2222_v20 }
 0x12a   :  { %v1281_v55 = vadd.f32 %v3329_v38, %v3309_v13 }
 0x12b   :  { %v1381_v28 = vadd.f32 %v2148_v26, %v1260_v21  ;;  %v3353_v29 = vadd.f32 %v2224_v27, %v1373_v6  ;;  %v1284_v27 = vadd.f32 %v3334_v45, %v3309_v13 }
 0x12d   :  { %v2149_v32 = vpop.f32.mrb[28].mxu1  ;;  %v2225_v34 = vpop.f32.mrb[28].mxu0 }
 0x12e   :  { %v2150_v60 = vpop.f32.mrb[29].mxu1  ;;  %v2226_v35 = vpop.f32.mrb[29].mxu0 }
 0x12f   :  { %v2151_v37 = vadd.f32 %v2150_v60, %v2149_v32  ;;  %v2227_v39 = vadd.f32 %v2226_v35, %v2225_v34  ;;  %v2152_v2 = vpop.f32.mrb[30].mxu1  ;;  %v2228_v40 = vpop.f32.mrb[30].mxu0 }
 0x130   :  { %v2153_v42 = vpop.f32.mrb[31].mxu1  ;;  %v2229_v43 = vpop.f32.mrb[31].mxu0 }
 0x131   :  { %v1386_v46 = vadd.f32 %v2151_v37, %v1265_v36  ;;  %v3359_v48 = vadd.f32 %v2227_v39, %v1378_v23  ;;  %v2154_v50 = vadd.f32 %v2153_v42, %v2152_v2  ;;  %v2230_v52 = vadd.f32 %v2229_v43, %v2228_v40 }
 0x132   :  { %v1289_v42 = vadd.f32 %v3341_v9, %v3309_v13 }
 0x133   :  { %v1389_v53 = vadd.f32 %v2154_v50, %v1268_v41  ;;  %v3361_v54 = vadd.f32 %v2230_v52, %v1381_v28  ;;  %v1292_v52 = vadd.f32 %v3345_v4, %v3309_v13 }
 0x135   :  { %v2155_v57 = vpop.f32.mrb[32].mxu1  ;;  %v2231_v58 = vpop.f32.mrb[32].mxu0 }
 0x136   :  { %v2156_v8 = vpop.f32.mrb[33].mxu1  ;;  %v2232_v59 = vpop.f32.mrb[33].mxu0 }
 0x137   :  { %v2157_v63 = vadd.f32 %v2156_v8, %v2155_v57  ;;  %v2233_v0 = vadd.f32 %v2232_v59, %v2231_v58  ;;  %v2158_v17 = vpop.f32.mrb[34].mxu1  ;;  %v2234_v1 = vpop.f32.mrb[34].mxu0 }
 0x138   :  { %v2159_v6 = vpop.f32.mrb[35].mxu1  ;;  %v2235_v7 = vpop.f32.mrb[35].mxu0 }
 0x139   :  { %v1394_v10 = vadd.f32 %v2157_v63, %v1273_v61  ;;  %v3367_v11 = vadd.f32 %v2233_v0, %v1386_v46  ;;  %v2160_v12 = vadd.f32 %v2159_v6, %v2158_v17  ;;  %v2236_v49 = vadd.f32 %v2235_v7, %v2234_v1 }
 0x13a   :  { %v1297_v6 = vadd.f32 %v3290_v51, %v3309_v13 }
 0x13b   :  { %v1397_v14 = vadd.f32 %v2160_v12, %v1276_v5  ;;  %v3369_v15 = vadd.f32 %v2236_v49, %v1389_v53  ;;  %v1300_v49 = vadd.f32 %v3294_v56, %v3309_v13 }
 0x13d   :  { %v2161_v18 = vpop.f32.mrb[36].mxu1  ;;  %v2237_v20 = vpop.f32.mrb[36].mxu0 }
 0x13e   :  { %v2162_v24 = vpop.f32.mrb[37].mxu1  ;;  %v2238_v21 = vpop.f32.mrb[37].mxu0 }
 0x13f   :  { %v2163_v22 = vadd.f32 %v2162_v24, %v2161_v18  ;;  %v2239_v23 = vadd.f32 %v2238_v21, %v2237_v20  ;;  %v2164_v31 = vpop.f32.mrb[38].mxu1  ;;  %v2240_v26 = vpop.f32.mrb[38].mxu0 }
 0x140   :  { %v2165_v28 = vpop.f32.mrb[39].mxu1  ;;  %v2241_v32 = vpop.f32.mrb[39].mxu0 }
 0x141   :  { %v1402_v34 = vadd.f32 %v2163_v22, %v1281_v55  ;;  %v3375_v60 = vadd.f32 %v2239_v23, %v1394_v10  ;;  %v2166_v35 = vadd.f32 %v2165_v28, %v2164_v31  ;;  %v2242_v36 = vadd.f32 %v2241_v32, %v2240_v26 }
 0x142   :  { %v1305_v28 = vadd.f32 %v3298_v62, %v3309_v13 }
 0x143   :  { %v1405_v37 = vadd.f32 %v2166_v35, %v1284_v27  ;;  %v3377_v39 = vadd.f32 %v2242_v36, %v1397_v14  ;;  %v1308_v36 = vadd.f32 %v3302_v3, %v3309_v13 }
 0x145   :  { %v2167_v2 = vpop.f32.mrb[40].mxu1  ;;  %v2243_v40 = vpop.f32.mrb[40].mxu0 }
 0x146   :  { %v2168_v38 = vpop.f32.mrb[41].mxu1  ;;  %v2244_v41 = vpop.f32.mrb[41].mxu0 }
 0x147   :  { %v2169_v43 = vadd.f32 %v2168_v38, %v2167_v2  ;;  %v2245_v46 = vadd.f32 %v2244_v41, %v2243_v40  ;;  %v2170_v45 = vpop.f32.mrb[42].mxu1  ;;  %v2246_v50 = vpop.f32.mrb[42].mxu0 }
 0x148   :  { %v2171_v53 = vpop.f32.mrb[43].mxu1  ;;  %v2247_v57 = vpop.f32.mrb[43].mxu0 }
 0x149   :  { %v1410_v58 = vadd.f32 %v2169_v43, %v1289_v42  ;;  %v3383_v8 = vadd.f32 %v2245_v46, %v1402_v34  ;;  %v2172_v59 = vadd.f32 %v2171_v53, %v2170_v45  ;;  %v2248_v61 = vadd.f32 %v2247_v57, %v2246_v50 }
 0x14b   :  { %v1413_v63 = vadd.f32 %v2172_v59, %v1292_v52  ;;  %v3385_v0 = vadd.f32 %v2248_v61, %v1405_v37 }
 0x14d   :  { %v2173_v17 = vpop.f32.mrb[44].mxu1  ;;  %v2249_v1 = vpop.f32.mrb[44].mxu0 }
 0x14e   :  { %v2174_v9 = vpop.f32.mrb[45].mxu1  ;;  %v2250_v5 = vpop.f32.mrb[45].mxu0 }
 0x14f   :  { %v2175_v7 = vadd.f32 %v2174_v9, %v2173_v17  ;;  %v2251_v10 = vadd.f32 %v2250_v5, %v2249_v1  ;;  %v2176_v4 = vpop.f32.mrb[46].mxu1  ;;  %v2252_v12 = vpop.f32.mrb[46].mxu0 }
 0x150   :  { %v2177_v14 = vpop.f32.mrb[47].mxu1  ;;  %v2253_v18 = vpop.f32.mrb[47].mxu0 }
 0x151   :  { %v1418_v20 = vadd.f32 %v2175_v7, %v1297_v6  ;;  %v3391_v24 = vadd.f32 %v2251_v10, %v1410_v58  ;;  %v2178_v21 = vadd.f32 %v2177_v14, %v2176_v4  ;;  %v2254_v55 = vadd.f32 %v2253_v18, %v2252_v12 }
 0x153   :  { %v1421_v22 = vadd.f32 %v2178_v21, %v1300_v49  ;;  %v3393_v23 = vadd.f32 %v2254_v55, %v1413_v63 }
 0x155   :  { %v2179_v31 = vpop.f32.mrb[48].mxu1  ;;  %v2255_v26 = vpop.f32.mrb[48].mxu0 }
 0x156   :  { %v2180_v51 = vpop.f32.mrb[49].mxu1  ;;  %v2256_v27 = vpop.f32.mrb[49].mxu0 }
 0x157   :  { %v2181_v32 = vadd.f32 %v2180_v51, %v2179_v31  ;;  %v2257_v34 = vadd.f32 %v2256_v27, %v2255_v26  ;;  %v2182_v56 = vpop.f32.mrb[50].mxu1  ;;  %v2258_v35 = vpop.f32.mrb[50].mxu0 }
 0x158   :  { %v2183_v37 = vpop.f32.mrb[51].mxu1  ;;  %v2259_v2 = vpop.f32.mrb[51].mxu0 }
 0x159   :  { %v1426_v40 = vadd.f32 %v2181_v32, %v1305_v28  ;;  %v3399_v38 = vadd.f32 %v2257_v34, %v1418_v20  ;;  %v2184_v41 = vadd.f32 %v2183_v37, %v2182_v56  ;;  %v2260_v42 = vadd.f32 %v2259_v2, %v2258_v35 }
 0x15b   :  { %v1429_v43 = vadd.f32 %v2184_v41, %v1308_v36  ;;  %v3401_v46 = vadd.f32 %v2260_v42, %v1421_v22 }
 0x15d   :  { %v2185_v45 = vpop.f32.mrb[52].mxu1  ;;  %v2261_v50 = vpop.f32.mrb[52].mxu0 }
 0x15e   :  { %v2186_v62 = vpop.f32.mrb[53].mxu1  ;;  %v2262_v52 = vpop.f32.mrb[53].mxu0 }
 0x15f   :  { %v2187_v53 = vadd.f32 %v2186_v62, %v2185_v45  ;;  %v2263_v57 = vadd.f32 %v2262_v52, %v2261_v50  ;;  %v2188_v58 = vpop.f32.mrb[54].mxu1  ;;  %v2264_v59 = vpop.f32.mrb[54].mxu0 }
 0x160   :  { %v2189_v61 = vpop.f32.mrb[55].mxu1  ;;  %v2265_v3 = vpop.f32.mrb[55].mxu0 }
 0x161   :  { %v1434_v13 = vadd.f32 %v2187_v53, %v3312_v16  ;;  %v3404_v63 = vadd.f32 %v2263_v57, %v1426_v40  ;;  %v2190_v17 = vadd.f32 %v2189_v61, %v2188_v58  ;;  %v2266_v1 = vadd.f32 %v2265_v3, %v2264_v59 }
 0x163   :  { %v1437_v9 = vadd.f32 %v2190_v17, %v3317_v19  ;;  %v3407_v5 = vadd.f32 %v2266_v1, %v1429_v43 }
 0x165   :  { %v2191_v6 = vpop.f32.mrb[56].mxu1  ;;  %v2267_v7 = vpop.f32.mrb[56].mxu0 }
 0x166   :  { %v2192_v10 = vpop.f32.mrb[57].mxu1  ;;  %v2268_v4 = vpop.f32.mrb[57].mxu0 }
 0x167   :  { %v2193_v12 = vadd.f32 %v2192_v10, %v2191_v6  ;;  %v2269_v49 = vadd.f32 %v2268_v4, %v2267_v7  ;;  %v2194_v14 = vpop.f32.mrb[58].mxu1  ;;  %v2270_v18 = vpop.f32.mrb[58].mxu0 }
 0x168   :  { %v2195_v20 = vpop.f32.mrb[59].mxu1  ;;  %v2271_v21 = vpop.f32.mrb[59].mxu0 }
 0x169   :  { %v1442_v16 = vadd.f32 %v2193_v12, %v3322_v30  ;;  %v3410_v55 = vadd.f32 %v2269_v49, %v1434_v13  ;;  %v2196_v22 = vadd.f32 %v2195_v20, %v2194_v14  ;;  %v2272_v31 = vadd.f32 %v2271_v21, %v2270_v18 }
 0x16b   :  { %v1445_v19 = vadd.f32 %v2196_v22, %v3327_v33  ;;  %v3413_v26 = vadd.f32 %v2272_v31, %v1437_v9 }
 0x16d   :  { %v2197_v51 = vpop.f32.mrb[60].mxu1  ;;  %v2273_v27 = vpop.f32.mrb[60].mxu0 }
 0x16e   :  { %v2198_v28 = vpop.f32.mrb[61].mxu1  ;;  %v2274_v32 = vpop.f32.mrb[61].mxu0 }
 0x16f   :  { %v2199_v34 = vadd.f32 %v2198_v28, %v2197_v51  ;;  %v2275_v56 = vadd.f32 %v2274_v32, %v2273_v27  ;;  %v2200_v35 = vpop.f32.mrb[62].mxu1  ;;  %v2276_v36 = vpop.f32.mrb[62].mxu0 }
 0x170   :  { %v2201_v37 = vpop.f32.mrb[63].mxu1  ;;  %v2277_v2 = vpop.f32.mrb[63].mxu0 }
 0x171   :  { %v1450_v30 = vadd.f32 %v2199_v34, %v3332_v44  ;;  %v3416_v40 = vadd.f32 %v2275_v56, %v1442_v16  ;;  %v2202_v41 = vadd.f32 %v2201_v37, %v2200_v35  ;;  %v2278_v42 = vadd.f32 %v2277_v2, %v2276_v36 }
 0x173   :  { %v1453_v33 = vadd.f32 %v2202_v41, %v3337_v47  ;;  %v3419_v43 = vadd.f32 %v2278_v42, %v1445_v19 }
 0x175   :  { %v2279_v45 = vpop.f32.mrb[64].mxu0  ;;  %v2301_v50 = vpop.f32.mrb[64].mxu1 }
 0x176   :  { %v2280_v62 = vpop.f32.mrb[65].mxu0  ;;  %v2302_v52 = vpop.f32.mrb[65].mxu1 }
 0x177   :  { %v2281_v53 = vadd.f32 %v2280_v62, %v2279_v45  ;;  %v2303_v57 = vadd.f32 %v2302_v52, %v2301_v50  ;;  %v2282_v58 = vpop.f32.mrb[66].mxu0  ;;  %v2304_v59 = vpop.f32.mrb[66].mxu1 }
 0x178   :  { %v2283_v61 = vpop.f32.mrb[67].mxu0  ;;  %v2305_v3 = vpop.f32.mrb[67].mxu1 }
 0x179   :  { %v3421_v13 = vadd.f32 %v2281_v53, %v1450_v30  ;;  %v2284_v44 = vadd.f32 %v2283_v61, %v2282_v58  ;;  %v2306_v17 = vadd.f32 %v2305_v3, %v2304_v59  ;;  %v1612_v1 = vadd.f32 %v2303_v57, %v3351_v25 }
 0x17b   :  { %v3424_v9 = vadd.f32 %v2284_v44, %v1453_v33  ;;  %v1615_v47 = vadd.f32 %v2306_v17, %v3353_v29 }
 0x17d   :  { %v2307_v6 = vpop.f32.mrb[68].mxu1  ;;  %v1732_v7 = vpop.f32.mrb[68].mxu0 }
 0x17e   :  { %v1733_v10 = vadd.f32 %v1732_v7, %v1612_v1  ;;  %v2308_v4 = vpop.f32.mrb[69].mxu1  ;;  %v2404_v12 = vpop.f32.mrb[69].mxu0 }
 0x17f   :  { %v2309_v49 = vadd.f32 %v2308_v4, %v2307_v6  ;;  %v2310_v14 = vpop.f32.mrb[70].mxu1  ;;  %v1735_v18 = vpop.f32.mrb[70].mxu0 }
 0x180   :  { %2679 = vtanh.f32 %v1733_v10  ;;  %v1736_v20 = vadd.f32 %v1735_v18, %v1615_v47  ;;  %v2311_v21 = vpop.f32.mrb[71].mxu1  ;;  %v2405_v16 = vpop.f32.mrb[71].mxu0 }
 0x181   :  { %v2312_v22 = vadd.f32 %v2311_v21, %v2310_v14  ;;  %v1620_v31 = vadd.f32 %v2309_v49, %v3359_v48 }
 0x182   :  { %2681 = vtanh.f32 %v1736_v20 }
 0x183   :  { %v1623_v25 = vadd.f32 %v2312_v22, %v3361_v54 }
 0x185   :  { %v2313_v19 = vpop.f32.mrb[72].mxu1  ;;  %v1740_v29 = vpop.f32.mrb[72].mxu0 }
 0x186   :  { %v1741_v51 = vadd.f32 %v1740_v29, %v1620_v31  ;;  %v2314_v27 = vpop.f32.mrb[73].mxu1  ;;  %v2408_v28 = vpop.f32.mrb[73].mxu0 }
 0x187   :  { %v2315_v32 = vadd.f32 %v2314_v27, %v2313_v19  ;;  %v2316_v34 = vpop.f32.mrb[74].mxu1  ;;  %v1743_v56 = vpop.f32.mrb[74].mxu0 }
 0x188   :  { %2683 = vtanh.f32 %v1741_v51  ;;  %v1744_v35 = vadd.f32 %v1743_v56, %v1623_v25  ;;  %v2317_v36 = vpop.f32.mrb[75].mxu1  ;;  %v2409_v37 = vpop.f32.mrb[75].mxu0 }
 0x189   :  { %v2318_v2 = vadd.f32 %v2317_v36, %v2316_v34  ;;  %v1628_v30 = vadd.f32 %v2315_v32, %v3367_v11 }
 0x18a   :  { %v2680_v41 = vpop.eup %2679  ;;  %2685 = vtanh.f32 %v1744_v35 }
 0x18b   :  { %1841 = vst [vmem:[%s3516_s3] sm:$0xff] %v2680_v41  ;;  %v1631_v48 = vadd.f32 %v2318_v2, %v3369_v15 }
 0x18c   :  { %v2682_v54 = vpop.eup %2681 }
 0x18d   :  { %1842 = vst [vmem:[%s3516_s3 + $0x8] sm:$0xff] %v2682_v54  ;;  %v2319_v42 = vpop.f32.mrb[76].mxu1  ;;  %v1748_v33 = vpop.f32.mrb[76].mxu0 }
 0x18e   :  { %v1749_v45 = vadd.f32 %v1748_v33, %v1628_v30  ;;  %v2320_v50 = vpop.f32.mrb[77].mxu1  ;;  %v2412_v62 = vpop.f32.mrb[77].mxu0 }
 0x18f   :  { %v2321_v52 = vadd.f32 %v2320_v50, %v2319_v42  ;;  %v2322_v11 = vpop.f32.mrb[78].mxu1  ;;  %v1751_v53 = vpop.f32.mrb[78].mxu0 }
 0x190   :  { %2687 = vtanh.f32 %v1749_v45  ;;  %v1752_v57 = vadd.f32 %v1751_v53, %v1631_v48  ;;  %v2323_v58 = vpop.f32.mrb[79].mxu1  ;;  %v2413_v59 = vpop.f32.mrb[79].mxu0 }
 0x191   :  { %v2324_v61 = vadd.f32 %v2323_v58, %v2322_v11  ;;  %v1636_v15 = vadd.f32 %v2321_v52, %v3375_v60 }
 0x192   :  { %v2684_v3 = vpop.eup %2683  ;;  %2689 = vtanh.f32 %v1752_v57 }
 0x193   :  { %1843 = vst [vmem:[%s3516_s3 + $0x10] sm:$0xff] %v2684_v3  ;;  %v1639_v44 = vadd.f32 %v2324_v61, %v3377_v39 }
 0x194   :  { %v2686_v17 = vpop.eup %2685 }
 0x195   :  { %1844 = vst [vmem:[%s3516_s3 + $0x18] sm:$0xff] %v2686_v17  ;;  %v2325_v1 = vpop.f32.mrb[80].mxu1  ;;  %v1756_v47 = vpop.f32.mrb[80].mxu0 }
 0x196   :  { %v1757_v6 = vadd.f32 %v1756_v47, %v1636_v15  ;;  %v2326_v7 = vpop.f32.mrb[81].mxu1  ;;  %v2416_v10 = vpop.f32.mrb[81].mxu0 }
 0x197   :  { %v2327_v4 = vadd.f32 %v2326_v7, %v2325_v1  ;;  %v2328_v60 = vpop.f32.mrb[82].mxu1  ;;  %v1759_v12 = vpop.f32.mrb[82].mxu0 }
 0x198   :  { %2691 = vtanh.f32 %v1757_v6  ;;  %v1760_v49 = vadd.f32 %v1759_v12, %v1639_v44  ;;  %v2329_v14 = vpop.f32.mrb[83].mxu1  ;;  %v2417_v18 = vpop.f32.mrb[83].mxu0 }
 0x199   :  { %v2330_v20 = vadd.f32 %v2329_v14, %v2328_v60  ;;  %v1644_v39 = vadd.f32 %v2327_v4, %v3383_v8 }
 0x19a   :  { %v2688_v21 = vpop.eup %2687  ;;  %2693 = vtanh.f32 %v1760_v49 }
 0x19b   :  { %1845 = vst [vmem:[%s3516_s3 + $0x20] sm:$0xff] %v2688_v21  ;;  %v1647_v16 = vadd.f32 %v2330_v20, %v3385_v0 }
 0x19c   :  { %v2690_v22 = vpop.eup %2689 }
 0x19d   :  { %1846 = vst [vmem:[%s3516_s3 + $0x28] sm:$0xff] %v2690_v22  ;;  %v2331_v31 = vpop.f32.mrb[84].mxu1  ;;  %v1764_v25 = vpop.f32.mrb[84].mxu0 }
 0x19e   :  { %v1765_v19 = vadd.f32 %v1764_v25, %v1644_v39  ;;  %v2332_v29 = vpop.f32.mrb[85].mxu1  ;;  %v2420_v51 = vpop.f32.mrb[85].mxu0 }
 0x19f   :  { %v2333_v27 = vadd.f32 %v2332_v29, %v2331_v31  ;;  %v2334_v8 = vpop.f32.mrb[86].mxu1  ;;  %v1767_v28 = vpop.f32.mrb[86].mxu0 }
 0x1a0   :  { %2695 = vtanh.f32 %v1765_v19  ;;  %v1768_v32 = vadd.f32 %v1767_v28, %v1647_v16  ;;  %v2335_v34 = vpop.f32.mrb[87].mxu1  ;;  %v2421_v56 = vpop.f32.mrb[87].mxu0 }
 0x1a1   :  { %v2336_v35 = vadd.f32 %v2335_v34, %v2334_v8  ;;  %v1652_v0 = vadd.f32 %v2333_v27, %v3391_v24 }
 0x1a2   :  { %v2692_v36 = vpop.eup %2691  ;;  %2697 = vtanh.f32 %v1768_v32 }
 0x1a3   :  { %1847 = vst [vmem:[%s3516_s3 + $0x30] sm:$0xff] %v2692_v36  ;;  %v1655_v37 = vadd.f32 %v2336_v35, %v3393_v23 }
 0x1a4   :  { %v2694_v2 = vpop.eup %2693 }
 0x1a5   :  { %1848 = vst [vmem:[%s3516_s3 + $0x38] sm:$0xff] %v2694_v2  ;;  %v2337_v30 = vpop.f32.mrb[88].mxu1  ;;  %v1772_v41 = vpop.f32.mrb[88].mxu0 }
 0x1a6   :  { %v1773_v48 = vadd.f32 %v1772_v41, %v1652_v0  ;;  %v2338_v54 = vpop.f32.mrb[89].mxu1  ;;  %v2424_v42 = vpop.f32.mrb[89].mxu0 }
 0x1a7   :  { %v2339_v33 = vadd.f32 %v2338_v54, %v2337_v30  ;;  %v2340_v24 = vpop.f32.mrb[90].mxu1  ;;  %v1775_v45 = vpop.f32.mrb[90].mxu0 }
 0x1a8   :  { %2699 = vtanh.f32 %v1773_v48  ;;  %v1776_v50 = vadd.f32 %v1775_v45, %v1655_v37  ;;  %v2341_v62 = vpop.f32.mrb[91].mxu1  ;;  %v2425_v52 = vpop.f32.mrb[91].mxu0 }
 0x1a9   :  { %v2342_v11 = vadd.f32 %v2341_v62, %v2340_v24  ;;  %v1660_v23 = vadd.f32 %v2339_v33, %v3399_v38 }
 0x1aa   :  { %v2696_v53 = vpop.eup %2695  ;;  %2701 = vtanh.f32 %v1776_v50 }
 0x1ab   :  { %1849 = vst [vmem:[%s3516_s3 + $0x40] sm:$0xff] %v2696_v53  ;;  %v1663_v57 = vadd.f32 %v2342_v11, %v3401_v46 }
 0x1ac   :  { %v2698_v58 = vpop.eup %2697 }
 0x1ad   :  { %1850 = vst [vmem:[%s3516_s3 + $0x48] sm:$0xff] %v2698_v58  ;;  %v2343_v59 = vpop.f32.mrb[92].mxu1  ;;  %v1780_v61 = vpop.f32.mrb[92].mxu0 }
 0x1ae   :  { %v1781_v15 = vadd.f32 %v1780_v61, %v1660_v23  ;;  %v2344_v3 = vpop.f32.mrb[93].mxu1  ;;  %v2428_v44 = vpop.f32.mrb[93].mxu0 }
 0x1af   :  { %v2345_v17 = vadd.f32 %v2344_v3, %v2343_v59  ;;  %v2346_v38 = vpop.f32.mrb[94].mxu1  ;;  %v1783_v1 = vpop.f32.mrb[94].mxu0 }
 0x1b0   :  { %2703 = vtanh.f32 %v1781_v15  ;;  %v1784_v47 = vadd.f32 %v1783_v1, %v1663_v57  ;;  %v2347_v6 = vpop.f32.mrb[95].mxu1  ;;  %v2429_v7 = vpop.f32.mrb[95].mxu0 }
 0x1b1   :  { %v2348_v10 = vadd.f32 %v2347_v6, %v2346_v38  ;;  %v1668_v46 = vadd.f32 %v2345_v17, %v3404_v63 }
 0x1b2   :  { %v2700_v4 = vpop.eup %2699  ;;  %2705 = vtanh.f32 %v1784_v47 }
 0x1b3   :  { %1851 = vst [vmem:[%s3516_s3 + $0x50] sm:$0xff] %v2700_v4  ;;  %v1671_v60 = vadd.f32 %v2348_v10, %v3407_v5 }
 0x1b4   :  { %v2702_v12 = vpop.eup %2701 }
 0x1b5   :  { %1852 = vst [vmem:[%s3516_s3 + $0x58] sm:$0xff] %v2702_v12  ;;  %v2349_v49 = vpop.f32.mrb[96].mxu1  ;;  %v1788_v14 = vpop.f32.mrb[96].mxu0 }
 0x1b6   :  { %v1789_v18 = vadd.f32 %v1788_v14, %v1668_v46  ;;  %v2350_v20 = vpop.f32.mrb[97].mxu1  ;;  %v2432_v39 = vpop.f32.mrb[97].mxu0 }
 0x1b7   :  { %v2351_v21 = vadd.f32 %v2350_v20, %v2349_v49  ;;  %v2352_v63 = vpop.f32.mrb[98].mxu1  ;;  %v1791_v16 = vpop.f32.mrb[98].mxu0 }
 0x1b8   :  { %2707 = vtanh.f32 %v1789_v18  ;;  %v1792_v22 = vadd.f32 %v1791_v16, %v1671_v60  ;;  %v2353_v31 = vpop.f32.mrb[99].mxu1  ;;  %v2433_v25 = vpop.f32.mrb[99].mxu0 }
 0x1b9   :  { %v2354_v19 = vadd.f32 %v2353_v31, %v2352_v63  ;;  %v1676_v5 = vadd.f32 %v2351_v21, %v3410_v55 }
 0x1ba   :  { %v2704_v29 = vpop.eup %2703  ;;  %2709 = vtanh.f32 %v1792_v22 }
 0x1bb   :  { %1853 = vst [vmem:[%s3516_s3 + $0x60] sm:$0xff] %v2704_v29  ;;  %v1679_v51 = vadd.f32 %v2354_v19, %v3413_v26 }
 0x1bc   :  { %v2706_v27 = vpop.eup %2705 }
 0x1bd   :  { %1854 = vst [vmem:[%s3516_s3 + $0x68] sm:$0xff] %v2706_v27  ;;  %v2355_v8 = vpop.f32.mrb[100].mxu1  ;;  %v1796_v28 = vpop.f32.mrb[100].mxu0 }
 0x1be   :  { %v1797_v32 = vadd.f32 %v1796_v28, %v1676_v5  ;;  %v2356_v34 = vpop.f32.mrb[101].mxu1  ;;  %v2436_v56 = vpop.f32.mrb[101].mxu0 }
 0x1bf   :  { %v2357_v35 = vadd.f32 %v2356_v34, %v2355_v8  ;;  %v2358_v55 = vpop.f32.mrb[102].mxu1  ;;  %v1799_v0 = vpop.f32.mrb[102].mxu0 }
 0x1c0   :  { %2711 = vtanh.f32 %v1797_v32  ;;  %v1800_v36 = vadd.f32 %v1799_v0, %v1679_v51  ;;  %v2359_v37 = vpop.f32.mrb[103].mxu1  ;;  %v2437_v2 = vpop.f32.mrb[103].mxu0 }
 0x1c1   :  { %v2360_v30 = vadd.f32 %v2359_v37, %v2358_v55  ;;  %v1684_v26 = vadd.f32 %v2357_v35, %v3416_v40 }
 0x1c2   :  { %v2708_v41 = vpop.eup %2707  ;;  %2713 = vtanh.f32 %v1800_v36 }
 0x1c3   :  { %1855 = vst [vmem:[%s3516_s3 + $0x70] sm:$0xff] %v2708_v41  ;;  %v1687_v48 = vadd.f32 %v2360_v30, %v3419_v43 }
 0x1c4   :  { %v2710_v54 = vpop.eup %2709 }
 0x1c5   :  { %1856 = vst [vmem:[%s3516_s3 + $0x78] sm:$0xff] %v2710_v54  ;;  %v2361_v42 = vpop.f32.mrb[104].mxu1  ;;  %v1804_v33 = vpop.f32.mrb[104].mxu0 }
 0x1c6   :  { %v1805_v24 = vadd.f32 %v1804_v33, %v1684_v26  ;;  %v2362_v45 = vpop.f32.mrb[105].mxu1  ;;  %v2440_v50 = vpop.f32.mrb[105].mxu0 }
 0x1c7   :  { %v2363_v62 = vadd.f32 %v2362_v45, %v2361_v42  ;;  %v2364_v40 = vpop.f32.mrb[106].mxu1  ;;  %v1807_v52 = vpop.f32.mrb[106].mxu0 }
 0x1c8   :  { %2715 = vtanh.f32 %v1805_v24  ;;  %v1808_v11 = vadd.f32 %v1807_v52, %v1687_v48  ;;  %v2365_v23 = vpop.f32.mrb[107].mxu1  ;;  %v2441_v53 = vpop.f32.mrb[107].mxu0 }
 0x1c9   :  { %v2366_v57 = vadd.f32 %v2365_v23, %v2364_v40  ;;  %v1692_v43 = vadd.f32 %v2363_v62, %v3421_v13 }
 0x1ca   :  { %v2712_v58 = vpop.eup %2711  ;;  %2717 = vtanh.f32 %v1808_v11 }
 0x1cb   :  { %1857 = vst [vmem:[%s3516_s3 + $0x80] sm:$0xff] %v2712_v58  ;;  %v1695_v59 = vadd.f32 %v2366_v57, %v3424_v9 }
 0x1cc   :  { %v2714_v61 = vpop.eup %2713 }
 0x1cd   :  { %1858 = vst [vmem:[%s3516_s3 + $0x88] sm:$0xff] %v2714_v61  ;;  %v1812_v15 = vpop.f32.mrb[108].mxu0 }
 0x1ce   :  { %v1813_v3 = vadd.f32 %v1812_v15, %v1692_v43  ;;  %v2444_v44 = vpop.f32.mrb[109].mxu0 }
 0x1cf   :  { %v1815_v17 = vpop.f32.mrb[110].mxu0 }
 0x1d0   :  { %2719 = vtanh.f32 %v1813_v3  ;;  %v1816_v38 = vadd.f32 %v1815_v17, %v1695_v59  ;;  %v2445_v13 = vpop.f32.mrb[111].mxu0 }
 0x1d2   :  { %v2716_v1 = vpop.eup %2715  ;;  %2721 = vtanh.f32 %v1816_v38 }
 0x1d3   :  { %1859 = vst [vmem:[%s3516_s3 + $0x90] sm:$0xff] %v2716_v1 }
 0x1d4   :  { %v2718_v47 = vpop.eup %2717 }
 0x1d5   :  { %1860 = vst [vmem:[%s3516_s3 + $0x98] sm:$0xff] %v2718_v47 }
 0x1da   :  { %v2720_v9 = vpop.eup %2719 }
 0x1db   :  { %1861 = vst [vmem:[%s3516_s3 + $0xa0] sm:$0xff] %v2720_v9 }
 0x1dc   :  { %v2722_v6 = vpop.eup %2721 }
 0x1dd   :  { %1862 = vst [vmem:[%s3516_s3 + $0xa8] sm:$0xff] %v2722_v6 }

// kernel: forward_im2col.8
= control target key start
LH: loop header
LB: loop body
LE: loop exit
PB: predicated region body
PF: predicated region fallthrough
CT: control target
= control target key end

     0   :  { %s2190_s12 = smov 0   ;;  %s2662_s0 = inlined_call_operand.vmem [shape: bf16[1024,384], index: 0, kind: input, shape index: {}]   ;;  %s2663_s1 = inlined_call_operand.vmem [shape: bf16[384,128], index: 1, kind: input, shape index: {}]   ;;  %s2664_s2 = inlined_call_operand.vmem [shape: f32[1,128], index: 2, kind: input, shape index: {}]   ;;  %s2665_s3 = inlined_call_operand.vmem [shape: f32[1024,128], index: 3, kind: output, shape index: {}]  }
   0x1 LB: > { %s1715_s13 = sadd.s32 4294967295, %s2167_s12   ;;  %p1719_p0 = scmp.ge.s32.totalorder %s2167_s12, 1  ;;  %s2167_s12 = sphi %s2190_s12, %s13_s12  }
   0x2   : > { %p139_p1 = scmp.lt.s32.totalorder %s2167_s12, 3 }
   0x4   : > { %p140_p2 = pnand %p1719_p0, %p139_p1 }
   0x5   : > { %v2009_v0 = vld [vmem:[%s2663_s1] sm:$0xff] (!%p140_p2)   ;;  %v2169_v1 = vmov (!%p140_p2), 0   ;;  %s1720_s16 = sshll.u32 (!%p140_p2), %s1715_s13, 6  ;;  %v2010_v2 = vld [vmem:[%s2663_s1 + $0x8] sm:$0xff] (!%p140_p2)   ;;  %v2011_v3 = vld [vmem:[%s2663_s1 + $0x10] sm:$0xff] (!%p140_p2)  }
   0x6   : > { %143 = sbr.rel (%p140_p2) target bundleno = 473 (0x1d9), region = 32  ;;  %1017 = vmatprep.subr.bf16.mxu0 (!%p140_p2), %v2169_v1  ;;  %1967 = vmatprep.subr.bf16.mxu1 (!%p140_p2), %v2169_v1  ;;  %p165_p3 = scmp.lt.s32.totalorder (!%p140_p2), %s1720_s16, 127  ;;  %v2012_v4 = vld [vmem:[%s2663_s1 + $0x18] sm:$0xff] (!%p140_p2)   ;;  %v2013_v5 = vld [vmem:[%s2663_s1 + $0x20] sm:$0xff] (!%p140_p2)   ;;  %v2014_v7 = vld [vmem:[%s2663_s1 + $0x28] sm:$0xff] (!%p140_p2)  }
   0x7   : > { %1018 = vmatpush1.bf16.msra.mxu0 (!%p140_p2), %v2009_v0  ;;  %1983 = vmatpush1.bf16.msra.mxu1 (!%p140_p2), %v2009_v0  ;;  %v2015_v9 = vld [vmem:[%s2663_s1 + $0x30] sm:$0xff] (!%p140_p2)   ;;  %v2016_v10 = vld [vmem:[%s2663_s1 + $0x38] sm:$0xff] (!%p140_p2)   ;;  %v2017_v11 = vld [vmem:[%s2663_s1 + $0x40] sm:$0xff] (!%p140_p2)  }
   0x8   : > { %1019 = vmatprep.subr.bf16.mxu0 (!%p140_p2), %v2169_v1  ;;  %1968 = vmatprep.subr.bf16.mxu1 (!%p140_p2), %v2169_v1  ;;  %v2018_v12 = vld [vmem:[%s2663_s1 + $0x48] sm:$0xff] (!%p140_p2)   ;;  %v2019_v13 = vld [vmem:[%s2663_s1 + $0x50] sm:$0xff] (!%p140_p2)   ;;  %v2020_v14 = vld [vmem:[%s2663_s1 + $0x58] sm:$0xff] (!%p140_p2)  }
   0x9   : > { %v2021_v15 = vld [vmem:[%s2663_s1 + $0x60] sm:$0xff] (!%p140_p2)   ;;  %v2022_v16 = vld [vmem:[%s2663_s1 + $0x68] sm:$0xff] (!%p140_p2)   ;;  %v2023_v17 = vld [vmem:[%s2663_s1 + $0x70] sm:$0xff] (!%p140_p2)  }
   0xa   : > { %v2024_v18 = vld [vmem:[%s2663_s1 + $0x78] sm:$0xff] (!%p140_p2)   ;;  %v2031_v19 = vld [vmem:[%s2663_s1 + $0x80] sm:$0xff] (!%p140_p2)   ;;  %v2038_v24 = vld [vmem:[%s2663_s1 + $0x88] sm:$0xff] (!%p140_p2)  }
   0xb   : > { %1020 = vmatpush1.bf16.msra.mxu0 (!%p140_p2), %v2010_v2  ;;  %1984 = vmatpush1.bf16.msra.mxu1 (!%p140_p2), %v2010_v2  ;;  %v2045_v25 = vld [vmem:[%s2663_s1 + $0x90] sm:$0xff] (!%p140_p2)   ;;  %v2052_v30 = vld [vmem:[%s2663_s1 + $0x98] sm:$0xff] (!%p140_p2)   ;;  %v2059_v32 = vld [vmem:[%s2663_s1 + $0xa0] sm:$0xff] (!%p140_p2)  }
   0xc   : > { %1021 = vmatprep.subr.bf16.mxu0 (!%p140_p2), %v2169_v1  ;;  %1969 = vmatprep.subr.bf16.mxu1 (!%p140_p2), %v2169_v1  ;;  %v2066_v36 = vld [vmem:[%s2663_s1 + $0xa8] sm:$0xff] (!%p140_p2)   ;;  %v2073_v41 = vld [vmem:[%s2663_s1 + $0xb0] sm:$0xff] (!%p140_p2)   ;;  %v2080_v42 = vld [vmem:[%s2663_s1 + $0xb8] sm:$0xff] (!%p140_p2)  }
   0xd   : > { %s2667_s16 = smov (!%p165_p3, %s1720_s16), 127 }
   0xe   : > { %s1999_s23 = smul.u32 12, %s2667_s16  ;;  %s1723_s19 = sshll.u32 %s2667_s16, 3 }
   0xf   : > { %1022 = vmatpush1.bf16.msra.mxu0 %v2011_v3  ;;  %1985 = vmatpush1.bf16.msra.mxu1 %v2011_v3  ;;  %s2480_s22 = scalar_lea.vmem %s2665_s3, %s1723_s19 }
  0x10   : > { %1023 = vmatprep.subr.bf16.mxu0 %v2169_v1  ;;  %1970 = vmatprep.subr.bf16.mxu1 %v2169_v1  ;;  %s2227_s28 = scalar_lea.vmem %s2662_s0, %s1999_s23 }
  0x11   : > { %v2027_v6 = vld [vmem:[%s2227_s28 + $0x4] ss:$12 sps:$4 sm:$0xff]   ;;  %v2025_v20 = vld [vmem:[%s2227_s28] ss:$12 sps:$4 sm:$0xff]   ;;  %v2032_v22 = vld [vmem:[%s2227_s28 + $0x1c] ss:$12 sps:$4 sm:$0xff]  }
  0x12   : > { %v2030_v8 = vld [vmem:[%s2227_s28 + $0x244] ss:$12 sps:$4 sm:$0xff]   ;;  %1049 = vmatprep.mubr.bf16.mxu0 %v2027_v6  ;;  %v2028_v21 = vld [vmem:[%s2227_s28 + $0x240] ss:$12 sps:$4 sm:$0xff]   ;;  %v2034_v23 = vld [vmem:[%s2227_s28 + $0x25c] ss:$12 sps:$4 sm:$0xff]  }
  0x13   : > { %1024 = vmatpush1.bf16.msra.mxu0 %v2012_v4  ;;  %1986 = vmatpush1.bf16.msra.mxu1 %v2012_v4  ;;  %v2036_v26 = vld [vmem:[%s2227_s28 + $0x18] ss:$12 sps:$4 sm:$0xff]   ;;  %v2039_v28 = vld [vmem:[%s2227_s28 + $0x34] ss:$12 sps:$4 sm:$0xff]   ;;  %v2043_v31 = vld [vmem:[%s2227_s28 + $0x30] ss:$12 sps:$4 sm:$0xff]  }
  0x14   : > { %1025 = vmatprep.subr.bf16.mxu0 %v2169_v1  ;;  %1971 = vmatprep.subr.bf16.mxu1 %v2169_v1  ;;  %v2037_v27 = vld [vmem:[%s2227_s28 + $0x258] ss:$12 sps:$4 sm:$0xff]   ;;  %v2041_v29 = vld [vmem:[%s2227_s28 + $0x274] ss:$12 sps:$4 sm:$0xff]   ;;  %v2044_v33 = vld [vmem:[%s2227_s28 + $0x270] ss:$12 sps:$4 sm:$0xff]  }
  0x15   : > { %1241 = vmatprep.mubr.bf16.mxu1 %v2030_v8  ;;  %v2046_v34 = vld [vmem:[%s2227_s28 + $0x4c] ss:$12 sps:$4 sm:$0xff]   ;;  %v2050_v37 = vld [vmem:[%s2227_s28 + $0x48] ss:$12 sps:$4 sm:$0xff]   ;;  %v2053_v39 = vld [vmem:[%s2227_s28 + $0x64] ss:$12 sps:$4 sm:$0xff]  }
  0x16   : > { %v2048_v35 = vld [vmem:[%s2227_s28 + $0x28c] ss:$12 sps:$4 sm:$0xff]   ;;  %v2051_v38 = vld [vmem:[%s2227_s28 + $0x288] ss:$12 sps:$4 sm:$0xff]   ;;  %v2055_v40 = vld [vmem:[%s2227_s28 + $0x2a4] ss:$12 sps:$4 sm:$0xff]  }
  0x17   : > { %1026 = vmatpush1.bf16.msra.mxu0 %v2013_v5  ;;  %1987 = vmatpush1.bf16.msra.mxu1 %v2013_v5  ;;  %v2057_v43 = vld [vmem:[%s2227_s28 + $0x60] ss:$12 sps:$4 sm:$0xff]   ;;  %v2060_v45 = vld [vmem:[%s2227_s28 + $0x7c] ss:$12 sps:$4 sm:$0xff]   ;;  %v2064_v47 = vld [vmem:[%s2227_s28 + $0x78] ss:$12 sps:$4 sm:$0xff]  }
  0x18   : > { %1027 = vmatprep.subr.bf16.mxu0 %v2169_v1  ;;  %1972 = vmatprep.subr.bf16.mxu1 %v2169_v1  ;;  %v2058_v44 = vld [vmem:[%s2227_s28 + $0x2a0] ss:$12 sps:$4 sm:$0xff]   ;;  %v2062_v46 = vld [vmem:[%s2227_s28 + $0x2bc] ss:$12 sps:$4 sm:$0xff]   ;;  %v2065_v48 = vld [vmem:[%s2227_s28 + $0x2b8] ss:$12 sps:$4 sm:$0xff]  }
  0x19   : > { %v2067_v49 = vld [vmem:[%s2227_s28 + $0x94] ss:$12 sps:$4 sm:$0xff]   ;;  %v2071_v51 = vld [vmem:[%s2227_s28 + $0x90] ss:$12 sps:$4 sm:$0xff]   ;;  %v2074_v53 = vld [vmem:[%s2227_s28 + $0xac] ss:$12 sps:$4 sm:$0xff]  }
  0x1a   : > { %v2069_v50 = vld [vmem:[%s2227_s28 + $0x2d4] ss:$12 sps:$4 sm:$0xff]   ;;  %v2072_v52 = vld [vmem:[%s2227_s28 + $0x2d0] ss:$12 sps:$4 sm:$0xff]   ;;  %v2076_v54 = vld [vmem:[%s2227_s28 + $0x2ec] ss:$12 sps:$4 sm:$0xff]  }
  0x1b   : > { %1028 = vmatpush1.bf16.msra.mxu0 %v2014_v7  ;;  %1988 = vmatpush1.bf16.msra.mxu1 %v2014_v7  ;;  %v2078_v55 = vld [vmem:[%s2227_s28 + $0xa8] ss:$12 sps:$4 sm:$0xff]   ;;  %v2081_v57 = vld [vmem:[%s2227_s28 + $0xc4] ss:$12 sps:$4 sm:$0xff]   ;;  %v2084_v59 = vld [vmem:[%s2227_s28 + $0xc0] ss:$12 sps:$4 sm:$0xff]  }
  0x1c   : > { %1029 = vmatprep.subr.bf16.mxu0 %v2169_v1  ;;  %1973 = vmatprep.subr.bf16.mxu1 %v2169_v1  ;;  %v2079_v56 = vld [vmem:[%s2227_s28 + $0x2e8] ss:$12 sps:$4 sm:$0xff]   ;;  %v2085_v60 = vld [vmem:[%s2227_s28 + $0x20] ss:$12 sps:$4 sm:$0xff]   ;;  %v2088_v62 = vld [vmem:[%s2227_s28 + $0x38] ss:$12 sps:$4 sm:$0xff]  }
  0x1d   : > { %v2083_v58 = vld [vmem:[%s2227_s28 + $0x8] ss:$12 sps:$4 sm:$0xff]   ;;  %v2089_v63 = vld [vmem:[%s2227_s28 + $0xd8] ss:$12 sps:$4 sm:$0xff]   ;;  %v2090_v0 = vld [vmem:[%s2227_s28 + $0x50] ss:$12 sps:$4 sm:$0xff]  }
  0x1e   : > { %v2086_v61 = vld [vmem:[%s2227_s28 + $0xdc] ss:$12 sps:$4 sm:$0xff]   ;;  %v2095_v4 = vld [vmem:[%s2227_s28 + $0x80] ss:$12 sps:$4 sm:$0xff]   ;;  %v2098_v6 = vld [vmem:[%s2227_s28 + $0x98] ss:$12 sps:$4 sm:$0xff]  }
  0x1f   : > { %1030 = vmatpush1.bf16.msra.mxu0 %v2015_v9  ;;  %1989 = vmatpush1.bf16.msra.mxu1 %v2015_v9  ;;  %v2093_v2 = vld [vmem:[%s2227_s28 + $0x68] ss:$12 sps:$4 sm:$0xff]   ;;  %v2094_v3 = vld [vmem:[%s2227_s28 + $0xf0] ss:$12 sps:$4 sm:$0xff]   ;;  %v2096_v5 = vld [vmem:[%s2227_s28 + $0x10c] ss:$12 sps:$4 sm:$0xff]  }
  0x20   : > { %1031 = vmatprep.subr.bf16.mxu0 %v2169_v1  ;;  %1974 = vmatprep.subr.bf16.mxu1 %v2169_v1  ;;  %v2099_v7 = vld [vmem:[%s2227_s28 + $0x108] ss:$12 sps:$4 sm:$0xff]   ;;  %v2100_v8 = vld [vmem:[%s2227_s28 + $0xb0] ss:$12 sps:$4 sm:$0xff]  }
  0x21   : > { %v2101_v9 = vld [vmem:[%s2227_s28 + $0x124] ss:$12 sps:$4 sm:$0xff]  }
  0x23   : > { %1032 = vmatpush1.bf16.msra.mxu0 %v2016_v10  ;;  %1990 = vmatpush1.bf16.msra.mxu1 %v2016_v10  ;;  %v2103_v10 = vld [vmem:[%s2227_s28 + $0xc8] ss:$12 sps:$4 sm:$0xff]  }
  0x24   : > { %1033 = vmatprep.subr.bf16.mxu0 %v2169_v1  ;;  %1975 = vmatprep.subr.bf16.mxu1 %v2169_v1 }
  0x27   : > { %1034 = vmatpush1.bf16.msra.mxu0 %v2017_v11  ;;  %1991 = vmatpush1.bf16.msra.mxu1 %v2017_v11  ;;  %v2104_v11 = vld [vmem:[%s2227_s28 + $0x120] ss:$12 sps:$4 sm:$0xff]  }
  0x28   : > { %1035 = vmatprep.subr.bf16.mxu0 %v2169_v1  ;;  %1976 = vmatprep.subr.bf16.mxu1 %v2169_v1 }
  0x2b   : > { %1036 = vmatpush1.bf16.msra.mxu0 %v2018_v12  ;;  %1992 = vmatpush1.bf16.msra.mxu1 %v2018_v12  ;;  %v2105_v12 = vld [vmem:[%s2227_s28 + $0xe0] ss:$12 sps:$4 sm:$0xff]  }
  0x2c   : > { %1037 = vmatprep.subr.bf16.mxu0 %v2169_v1  ;;  %1977 = vmatprep.subr.bf16.mxu1 %v2169_v1 }
  0x2f   : > { %1038 = vmatpush1.bf16.msra.mxu0 %v2019_v13  ;;  %1993 = vmatpush1.bf16.msra.mxu1 %v2019_v13  ;;  %v2106_v13 = vld [vmem:[%s2227_s28 + $0x13c] ss:$12 sps:$4 sm:$0xff]  }
  0x30   : > { %1039 = vmatprep.subr.bf16.mxu0 %v2169_v1  ;;  %1978 = vmatprep.subr.bf16.mxu1 %v2169_v1 }
  0x33   : > { %1040 = vmatpush1.bf16.msra.mxu0 %v2020_v14  ;;  %1994 = vmatpush1.bf16.msra.mxu1 %v2020_v14  ;;  %v2108_v14 = vld [vmem:[%s2227_s28 + $0xf8] ss:$12 sps:$4 sm:$0xff]  }
  0x34   : > { %1041 = vmatprep.subr.bf16.mxu0 %v2169_v1  ;;  %1979 = vmatprep.subr.bf16.mxu1 %v2169_v1 }
  0x37   : > { %1042 = vmatpush1.bf16.msra.mxu0 %v2021_v15  ;;  %1995 = vmatpush1.bf16.msra.mxu1 %v2021_v15  ;;  %v2109_v15 = vld [vmem:[%s2227_s28 + $0x138] ss:$12 sps:$4 sm:$0xff]  }
  0x38   : > { %1043 = vmatprep.subr.bf16.mxu0 %v2169_v1  ;;  %1980 = vmatprep.subr.bf16.mxu1 %v2169_v1 }
  0x3b   : > { %1044 = vmatpush1.bf16.msra.mxu0 %v2022_v16  ;;  %1996 = vmatpush1.bf16.msra.mxu1 %v2022_v16  ;;  %v2110_v16 = vld [vmem:[%s2227_s28 + $0x110] ss:$12 sps:$4 sm:$0xff]  }
  0x3c   : > { %1045 = vmatprep.subr.bf16.mxu0 %v2169_v1  ;;  %1981 = vmatprep.subr.bf16.mxu1 %v2169_v1 }
  0x3f   : > { %1046 = vmatpush1.bf16.msra.mxu0 %v2023_v17  ;;  %1997 = vmatpush1.bf16.msra.mxu1 %v2023_v17  ;;  %v2111_v17 = vld [vmem:[%s2227_s28 + $0x154] ss:$12 sps:$4 sm:$0xff]  }
  0x40   : > { %1047 = vmatprep.subr.bf16.mxu0 %v2169_v1  ;;  %1982 = vmatprep.subr.bf16.mxu1 %v2169_v1  ;;  %v2091_v1 = vld [vmem:[%s2227_s28 + $0xf4] ss:$12 sps:$4 sm:$0xff]  }
  0x43   : > { %1048 = vmatpush1.bf16.msra.mxu0 %v2024_v18  ;;  %1998 = vmatpush1.bf16.msra.mxu1 %v2024_v18  ;;  %v2113_v18 = vld [vmem:[%s2227_s28 + $0x128] ss:$12 sps:$4 sm:$0xff]  }
  0x44   : > { %1887 = vmatprep.subr.bf16.mxu1 %v2031_v19 }
  0x46   : > { %1050 = vmatmul.mubr.bf16.vlgmr.msra.gmra.mrb[0].mxu0 %v2025_v20  ;;  %1242 = vmatmul.mubr.bf16.vlgmr.msra.gmra.mrb[0].mxu1 %v2028_v21  ;;  %v2115_v20 = vld [vmem:[%s2227_s28 + $0x140] ss:$12 sps:$4 sm:$0xff]  }
  0x47   : > { %1888 = vmatpush3.bf16.msra.mxu1 %v2031_v19  ;;  %1057 = vmatprep.mubr.bf16.mxu0 %v2032_v22  ;;  %v2114_v19 = vld [vmem:[%s2227_s28 + $0x150] ss:$12 sps:$4 sm:$0xff]   ;;  %v2116_v21 = vld [vmem:[%s2227_s28 + $0x16c] ss:$12 sps:$4 sm:$0xff]  }
  0x48   : > { %1249 = vmatprep.mubr.bf16.mxu1 %v2034_v23  ;;  %1889 = vmatprep.subr.bf16.mxu1 %v2038_v24  ;;  %v2118_v22 = vld [vmem:[%s2227_s28 + $0x158] ss:$12 sps:$4 sm:$0xff]   ;;  %v2119_v23 = vld [vmem:[%s2227_s28 + $0x168] ss:$12 sps:$4 sm:$0xff]  }
  0x4b   : > { %1890 = vmatpush3.bf16.msra.mxu1 %v2038_v24  ;;  %v2120_v24 = vld [vmem:[%s2227_s28 + $0x170] ss:$12 sps:$4 sm:$0xff]  }
  0x4c   : > { %1891 = vmatprep.subr.bf16.mxu1 %v2045_v25 }
  0x4e   : > { %1058 = vmatmul.mubr.bf16.gmra.mrb[4].mxu0 %v2036_v26  ;;  %1250 = vmatmul.mubr.bf16.gmra.mrb[4].mxu1 %v2037_v27  ;;  %v2123_v26 = vld [vmem:[%s2227_s28 + $0x188] ss:$12 sps:$4 sm:$0xff]   ;;  %v2124_v27 = vld [vmem:[%s2227_s28 + $0x180] ss:$12 sps:$4 sm:$0xff]  }
  0x4f   : > { %1065 = vmatprep.mubr.bf16.mxu0 %v2039_v28  ;;  %1257 = vmatprep.mubr.bf16.mxu1 %v2041_v29  ;;  %v2125_v28 = vld [vmem:[%s2227_s28 + $0x1a0] ss:$12 sps:$4 sm:$0xff]   ;;  %v2126_v29 = vld [vmem:[%s2227_s28 + $0x19c] ss:$12 sps:$4 sm:$0xff]  }
  0x50   : > { %1892 = vmatpush3.bf16.msra.mxu1 %v2045_v25  ;;  %v2121_v25 = vld [vmem:[%s2227_s28 + $0x184] ss:$12 sps:$4 sm:$0xff]  }
  0x51   : > { %1893 = vmatprep.subr.bf16.mxu1 %v2052_v30 }
  0x54   : > { %1894 = vmatpush3.bf16.msra.mxu1 %v2052_v30  ;;  %v2128_v30 = vld [vmem:[%s2227_s28 + $0x1b8] ss:$12 sps:$4 sm:$0xff]  }
  0x55   : > { %1895 = vmatprep.subr.bf16.mxu1 %v2059_v32 }
  0x56   : > { %1066 = vmatmul.mubr.bf16.gmra.mrb[8].mxu0 %v2043_v31  ;;  %1258 = vmatmul.mubr.bf16.gmra.mrb[8].mxu1 %v2044_v33  ;;  %v2129_v31 = vld [vmem:[%s2227_s28 + $0x198] ss:$12 sps:$4 sm:$0xff]   ;;  %v2131_v33 = vld [vmem:[%s2227_s28 + $0x1b4] ss:$12 sps:$4 sm:$0xff]  }
  0x57   : > { %1073 = vmatprep.mubr.bf16.mxu0 %v2046_v34  ;;  %1265 = vmatprep.mubr.bf16.mxu1 %v2048_v35  ;;  %v2133_v34 = vld [vmem:[%s2227_s28 + $0x1e8] ss:$12 sps:$4 sm:$0xff]   ;;  %v2134_v35 = vld [vmem:[%s2227_s28 + $0x1b0] ss:$12 sps:$4 sm:$0xff]  }
  0x58   : > { %1896 = vmatpush3.bf16.msra.mxu1 %v2059_v32  ;;  %v2130_v32 = vld [vmem:[%s2227_s28 + $0x1d0] ss:$12 sps:$4 sm:$0xff]  }
  0x59   : > { %1897 = vmatprep.subr.bf16.mxu1 %v2066_v36 }
  0x5c   : > { %1898 = vmatpush3.bf16.msra.mxu1 %v2066_v36  ;;  %v2135_v36 = vld [vmem:[%s2227_s28 + $0x200] ss:$12 sps:$4 sm:$0xff]  }
  0x5d   : > { %1899 = vmatprep.subr.bf16.mxu1 %v2073_v41 }
  0x5e   : > { %1074 = vmatmul.mubr.bf16.gmra.mrb[12].mxu0 %v2050_v37  ;;  %1266 = vmatmul.mubr.bf16.gmra.mrb[12].mxu1 %v2051_v38  ;;  %v2136_v37 = vld [vmem:[%s2227_s28 + $0x1cc] ss:$12 sps:$4 sm:$0xff]  }
  0x5f   : > { %1081 = vmatprep.mubr.bf16.mxu0 %v2053_v39  ;;  %1273 = vmatprep.mubr.bf16.mxu1 %v2055_v40  ;;  %v2138_v38 = vld [vmem:[%s2227_s28 + $0x218] ss:$12 sps:$4 sm:$0xff]   ;;  %v2139_v39 = vld [vmem:[%s2227_s28 + $0x1c8] ss:$12 sps:$4 sm:$0xff]   ;;  %v2140_v40 = vld [vmem:[%s2227_s28 + $0x230] ss:$12 sps:$4 sm:$0xff]  }
  0x60   : > { %1900 = vmatpush3.bf16.msra.mxu1 %v2073_v41  ;;  %v2141_v41 = vld [vmem:[%s2227_s28 + $0x1e4] ss:$12 sps:$4 sm:$0xff]  }
  0x61   : > { %1901 = vmatprep.subr.bf16.mxu1 %v2080_v42 }
  0x64   : > { %1902 = vmatpush3.bf16.msra.mxu1 %v2080_v42  ;;  %v2143_v42 = vld [vmem:[%s2227_s28 + $0x248] ss:$12 sps:$4 sm:$0xff]  }
  0x66   : > { %1082 = vmatmul.mubr.bf16.gmra.mrb[16].mxu0 %v2057_v43  ;;  %1274 = vmatmul.mubr.bf16.gmra.mrb[16].mxu1 %v2058_v44  ;;  %v2144_v43 = vld [vmem:[%s2227_s28 + $0x1e0] ss:$12 sps:$4 sm:$0xff]  }
  0x67   : > { %1089 = vmatprep.mubr.bf16.mxu0 %v2060_v45  ;;  %1281 = vmatprep.mubr.bf16.mxu1 %v2062_v46  ;;  %v2145_v44 = vld [vmem:[%s2227_s28 + $0x260] ss:$12 sps:$4 sm:$0xff]   ;;  %v2146_v45 = vld [vmem:[%s2227_s28 + $0x1fc] ss:$12 sps:$4 sm:$0xff]   ;;  %v2148_v46 = vld [vmem:[%s2227_s28 + $0x278] ss:$12 sps:$4 sm:$0xff]  }
  0x6e   : > { %1090 = vmatmul.mubr.bf16.gmra.mrb[20].mxu0 %v2064_v47  ;;  %1282 = vmatmul.mubr.bf16.gmra.mrb[20].mxu1 %v2065_v48  ;;  %v2149_v47 = vld [vmem:[%s2227_s28 + $0x1f8] ss:$12 sps:$4 sm:$0xff]   ;;  %v2150_v48 = vld [vmem:[%s2227_s28 + $0x290] ss:$12 sps:$4 sm:$0xff]  }
  0x6f   : > { %1097 = vmatprep.mubr.bf16.mxu0 %v2067_v49  ;;  %1289 = vmatprep.mubr.bf16.mxu1 %v2069_v50  ;;  %v2151_v49 = vld [vmem:[%s2227_s28 + $0x214] ss:$12 sps:$4 sm:$0xff]  }
  0x70   : > { %v2153_v50 = vld [vmem:[%s2227_s28 + $0x2a8] ss:$12 sps:$4 sm:$0xff]  }
  0x76   : > { %1098 = vmatmul.mubr.bf16.gmra.mrb[24].mxu0 %v2071_v51  ;;  %1290 = vmatmul.mubr.bf16.gmra.mrb[24].mxu1 %v2072_v52  ;;  %v2154_v51 = vld [vmem:[%s2227_s28 + $0x210] ss:$12 sps:$4 sm:$0xff]   ;;  %v2155_v52 = vld [vmem:[%s2227_s28 + $0x2c0] ss:$12 sps:$4 sm:$0xff]  }
  0x77   : > { %1105 = vmatprep.mubr.bf16.mxu0 %v2074_v53  ;;  %1297 = vmatprep.mubr.bf16.mxu1 %v2076_v54  ;;  %v2156_v53 = vld [vmem:[%s2227_s28 + $0x22c] ss:$12 sps:$4 sm:$0xff]  }
  0x78   : > { %v2158_v54 = vld [vmem:[%s2227_s28 + $0x2d8] ss:$12 sps:$4 sm:$0xff]  }
  0x7e   : > { %1106 = vmatmul.mubr.bf16.gmra.mrb[28].mxu0 %v2078_v55  ;;  %1298 = vmatmul.mubr.bf16.gmra.mrb[28].mxu1 %v2079_v56  ;;  %v2159_v55 = vld [vmem:[%s2227_s28 + $0x228] ss:$12 sps:$4 sm:$0xff]   ;;  %v2160_v56 = vld [vmem:[%s2227_s28 + $0x2f0] ss:$12 sps:$4 sm:$0xff]  }
  0x7f   : > { %1113 = vmatprep.mubr.bf16.mxu0 %v2081_v57  ;;  %1903 = vmatprep.mubr.bf16.mxu1 %v2083_v58 }
  0x86   : > { %1114 = vmatmul.mubr.bf16.gmra.mrb[32].mxu0 %v2084_v59  ;;  %1904 = vmatmul.mubr.bf16.vlgmr.msra.gmra.mrb[32].mxu1 %v2085_v60 }
  0x87   : > { %1121 = vmatprep.mubr.bf16.mxu0 %v2086_v61  ;;  %1907 = vmatprep.mubr.bf16.mxu1 %v2088_v62 }
  0x8e   : > { %1122 = vmatmul.mubr.bf16.gmra.mrb[36].mxu0 %v2089_v63  ;;  %1908 = vmatmul.mubr.bf16.gmra.mrb[36].mxu1 %v2090_v0 }
  0x8f   : > { %1129 = vmatprep.mubr.bf16.mxu0 %v2091_v1  ;;  %1911 = vmatprep.mubr.bf16.mxu1 %v2093_v2 }
  0x96   : > { %1130 = vmatmul.mubr.bf16.gmra.mrb[40].mxu0 %v2094_v3  ;;  %1912 = vmatmul.mubr.bf16.gmra.mrb[40].mxu1 %v2095_v4 }
  0x97   : > { %1137 = vmatprep.mubr.bf16.mxu0 %v2096_v5  ;;  %1915 = vmatprep.mubr.bf16.mxu1 %v2098_v6 }
  0x9e   : > { %1138 = vmatmul.mubr.bf16.gmra.mrb[44].mxu0 %v2099_v7  ;;  %1916 = vmatmul.mubr.bf16.gmra.mrb[44].mxu1 %v2100_v8 }
  0x9f   : > { %1145 = vmatprep.mubr.bf16.mxu0 %v2101_v9  ;;  %1919 = vmatprep.mubr.bf16.mxu1 %v2103_v10 }
  0xa6   : > { %1146 = vmatmul.mubr.bf16.gmra.mrb[48].mxu0 %v2104_v11  ;;  %1920 = vmatmul.mubr.bf16.gmra.mrb[48].mxu1 %v2105_v12 }
  0xa7   : > { %1153 = vmatprep.mubr.bf16.mxu0 %v2106_v13  ;;  %1923 = vmatprep.mubr.bf16.mxu1 %v2108_v14 }
  0xae   : > { %1154 = vmatmul.mubr.bf16.gmra.mrb[52].mxu0 %v2109_v15  ;;  %1924 = vmatmul.mubr.bf16.gmra.mrb[52].mxu1 %v2110_v16 }
  0xaf   : > { %1161 = vmatprep.mubr.bf16.mxu0 %v2111_v17  ;;  %1927 = vmatprep.mubr.bf16.mxu1 %v2113_v18 }
  0xb6   : > { %1162 = vmatmul.mubr.bf16.gmra.mrb[56].mxu0 %v2114_v19  ;;  %1928 = vmatmul.mubr.bf16.gmra.mrb[56].mxu1 %v2115_v20 }
  0xb7   : > { %1169 = vmatprep.mubr.bf16.mxu0 %v2116_v21  ;;  %1931 = vmatprep.mubr.bf16.mxu1 %v2118_v22 }
  0xbe   : > { %1170 = vmatmul.mubr.bf16.gmra.mrb[60].mxu0 %v2119_v23  ;;  %1932 = vmatmul.mubr.bf16.gmra.mrb[60].mxu1 %v2120_v24 }
  0xbf   : > { %1177 = vmatprep.mubr.bf16.mxu0 %v2121_v25  ;;  %1935 = vmatprep.mubr.bf16.mxu1 %v2123_v26 }
  0xc6   : > { %1178 = vmatmul.mubr.bf16.gmra.mrb[64].mxu0 %v2124_v27  ;;  %1936 = vmatmul.mubr.bf16.gmra.mrb[64].mxu1 %v2125_v28 }
  0xc7   : > { %1185 = vmatprep.mubr.bf16.mxu0 %v2126_v29  ;;  %1939 = vmatprep.mubr.bf16.mxu1 %v2128_v30 }
  0xce   : > { %1186 = vmatmul.mubr.bf16.gmra.mrb[68].mxu0 %v2129_v31  ;;  %1940 = vmatmul.mubr.bf16.gmra.mrb[68].mxu1 %v2130_v32 }
  0xcf   : > { %1193 = vmatprep.mubr.bf16.mxu0 %v2131_v33  ;;  %1943 = vmatprep.mubr.bf16.mxu1 %v2133_v34 }
  0xd6   : > { %1194 = vmatmul.mubr.bf16.gmra.mrb[72].mxu0 %v2134_v35  ;;  %1944 = vmatmul.mubr.bf16.gmra.mrb[72].mxu1 %v2135_v36 }
  0xd7   : > { %1201 = vmatprep.mubr.bf16.mxu0 %v2136_v37  ;;  %1947 = vmatprep.mubr.bf16.mxu1 %v2138_v38 }
  0xde   : > { %1202 = vmatmul.mubr.bf16.gmra.mrb[76].mxu0 %v2139_v39  ;;  %1948 = vmatmul.mubr.bf16.gmra.mrb[76].mxu1 %v2140_v40 }
  0xdf   : > { %1209 = vmatprep.mubr.bf16.mxu0 %v2141_v41  ;;  %1951 = vmatprep.mubr.bf16.mxu1 %v2143_v42 }
  0xe6   : > { %1210 = vmatmul.mubr.bf16.gmra.mrb[80].mxu0 %v2144_v43  ;;  %1952 = vmatmul.mubr.bf16.gmra.mrb[80].mxu1 %v2145_v44 }
  0xe7   : > { %1217 = vmatprep.mubr.bf16.mxu0 %v2146_v45  ;;  %1955 = vmatprep.mubr.bf16.mxu1 %v2148_v46 }
  0xee   : > { %1218 = vmatmul.mubr.bf16.gmra.mrb[84].mxu0 %v2149_v47  ;;  %1956 = vmatmul.mubr.bf16.gmra.mrb[84].mxu1 %v2150_v48 }
  0xef   : > { %1225 = vmatprep.mubr.bf16.mxu0 %v2151_v49  ;;  %1959 = vmatprep.mubr.bf16.mxu1 %v2153_v50 }
  0xf6   : > { %1226 = vmatmul.mubr.bf16.gmra.mrb[88].mxu0 %v2154_v51  ;;  %1960 = vmatmul.mubr.bf16.gmra.mrb[88].mxu1 %v2155_v52 }
  0xf7   : > { %1233 = vmatprep.mubr.bf16.mxu0 %v2156_v53  ;;  %1963 = vmatprep.mubr.bf16.mxu1 %v2158_v54 }
  0xfe   : > { %1234 = vmatmul.mubr.bf16.gmra.mrb[92].mxu0 %v2159_v55  ;;  %1964 = vmatmul.mubr.bf16.gmra.mrb[92].mxu1 %v2160_v56 }
 0x119   : > { %v2406_v57 = vpop.f32.mrb[0].mxu0  ;;  %v2408_v58 = vpop.f32.mrb[0].mxu1 }
 0x11a   : > { %v1053_v59 = vpop.f32.mrb[1].mxu0  ;;  %v1245_v60 = vpop.f32.mrb[1].mxu1 }
 0x11b   : > { %v2410_v61 = vpop.f32.mrb[2].mxu0  ;;  %v2412_v62 = vpop.f32.mrb[2].mxu1  ;;  %v2469_v59 = vld [vmem:[%s2664_s2] ss:$0 sm:$0xff] }
 0x11c   : > { %v1056_v63 = vpop.f32.mrb[3].mxu0  ;;  %v1248_v0 = vpop.f32.mrb[3].mxu1 }
 0x11d   : > { %v1052_v63 = vadd.f32 %v2469_v59, %v2406_v57  ;;  %v1055_v57 = vadd.f32 %v2469_v59, %v2410_v61 }
 0x121   : > { %v1059_v1 = vpop.f32.mrb[4].mxu0  ;;  %v2414_v2 = vpop.f32.mrb[4].mxu1 }
 0x122   : > { %v1061_v3 = vpop.f32.mrb[5].mxu0  ;;  %v1253_v4 = vpop.f32.mrb[5].mxu1  ;;  %v1060_v60 = vadd.f32 %v2469_v59, %v1059_v1 }
 0x123   : > { %v1062_v5 = vpop.f32.mrb[6].mxu0  ;;  %v2416_v6 = vpop.f32.mrb[6].mxu1 }
 0x124   : > { %v1064_v7 = vpop.f32.mrb[7].mxu0  ;;  %v1256_v8 = vpop.f32.mrb[7].mxu1  ;;  %v1063_v4 = vadd.f32 %v2469_v59, %v1062_v5 }
 0x129   : > { %v2418_v9 = vpop.f32.mrb[8].mxu0  ;;  %v2420_v10 = vpop.f32.mrb[8].mxu1 }
 0x12a   : > { %v1069_v11 = vpop.f32.mrb[9].mxu0  ;;  %v1261_v12 = vpop.f32.mrb[9].mxu1  ;;  %v1068_v61 = vadd.f32 %v2469_v59, %v2418_v9 }
 0x12b   : > { %v2422_v13 = vpop.f32.mrb[10].mxu0  ;;  %v2424_v14 = vpop.f32.mrb[10].mxu1 }
 0x12c   : > { %v1072_v15 = vpop.f32.mrb[11].mxu0  ;;  %v1264_v16 = vpop.f32.mrb[11].mxu1 }
 0x131   : > { %v2426_v17 = vpop.f32.mrb[12].mxu0  ;;  %v2428_v18 = vpop.f32.mrb[12].mxu1 }
 0x132   : > { %v1077_v19 = vpop.f32.mrb[13].mxu0  ;;  %v1269_v20 = vpop.f32.mrb[13].mxu1  ;;  %v1076_v5 = vadd.f32 %v2469_v59, %v2426_v17 }
 0x133   : > { %v2430_v21 = vpop.f32.mrb[14].mxu0  ;;  %v2432_v22 = vpop.f32.mrb[14].mxu1 }
 0x134   : > { %v1080_v23 = vpop.f32.mrb[15].mxu0  ;;  %v1272_v24 = vpop.f32.mrb[15].mxu1 }
 0x139   : > { %v2434_v25 = vpop.f32.mrb[16].mxu0  ;;  %v2436_v26 = vpop.f32.mrb[16].mxu1 }
 0x13a   : > { %v1085_v27 = vpop.f32.mrb[17].mxu0  ;;  %v1277_v28 = vpop.f32.mrb[17].mxu1 }
 0x13b   : > { %v2438_v29 = vpop.f32.mrb[18].mxu0  ;;  %v2440_v30 = vpop.f32.mrb[18].mxu1  ;;  %v1079_v28 = vadd.f32 %v2469_v59, %v2430_v21 }
 0x13c   : > { %v1088_v31 = vpop.f32.mrb[19].mxu0  ;;  %v1280_v32 = vpop.f32.mrb[19].mxu1 }
 0x141   : > { %v2442_v33 = vpop.f32.mrb[20].mxu0  ;;  %v2444_v34 = vpop.f32.mrb[20].mxu1 }
 0x142   : > { %v1093_v35 = vpop.f32.mrb[21].mxu0  ;;  %v1285_v36 = vpop.f32.mrb[21].mxu1  ;;  %v1092_v21 = vadd.f32 %v2469_v59, %v2442_v33 }
 0x143   : > { %v2446_v37 = vpop.f32.mrb[22].mxu0  ;;  %v2448_v38 = vpop.f32.mrb[22].mxu1  ;;  %v1071_v36 = vadd.f32 %v2469_v59, %v2422_v13 }
 0x144   : > { %v1096_v39 = vpop.f32.mrb[23].mxu0  ;;  %v1288_v40 = vpop.f32.mrb[23].mxu1 }
 0x149   : > { %v2450_v41 = vpop.f32.mrb[24].mxu0  ;;  %v2452_v42 = vpop.f32.mrb[24].mxu1 }
 0x14a   : > { %v1101_v43 = vpop.f32.mrb[25].mxu0  ;;  %v1293_v44 = vpop.f32.mrb[25].mxu1 }
 0x14b   : > { %v2454_v45 = vpop.f32.mrb[26].mxu0  ;;  %v2456_v46 = vpop.f32.mrb[26].mxu1 }
 0x14c   : > { %v1104_v47 = vpop.f32.mrb[27].mxu0  ;;  %v1296_v48 = vpop.f32.mrb[27].mxu1 }
 0x14d   : > { %v1084_v48 = vadd.f32 %v2469_v59, %v2434_v25 }
 0x151   : > { %v2458_v49 = vpop.f32.mrb[28].mxu0  ;;  %v2460_v50 = vpop.f32.mrb[28].mxu1 }
 0x152   : > { %v1109_v51 = vpop.f32.mrb[29].mxu0  ;;  %v1301_v52 = vpop.f32.mrb[29].mxu1 }
 0x153   : > { %v2462_v53 = vpop.f32.mrb[30].mxu0  ;;  %v2464_v54 = vpop.f32.mrb[30].mxu1  ;;  %v1095_v52 = vadd.f32 %v2469_v59, %v2446_v37  ;;  %v1108_v37 = vadd.f32 %v2469_v59, %v2458_v49 }
 0x154   : > { %v1112_v55 = vpop.f32.mrb[31].mxu0  ;;  %v1304_v56 = vpop.f32.mrb[31].mxu1 }
 0x159   : > { %v2475_v0 = vpop.f32.mrb[32].mxu0  ;;  %v1905_v3 = vpop.f32.mrb[32].mxu1 }
 0x15a   : > { %v1349_v7 = vadd.f32 %v1905_v3, %v1060_v60  ;;  %v1117_v8 = vpop.f32.mrb[33].mxu0  ;;  %v1340_v1 = vpop.f32.mrb[33].mxu1 }
 0x15b   : > { %v1341_v11 = vadd.f32 %v1340_v1, %v1052_v63  ;;  %v2485_v12 = vpop.f32.mrb[34].mxu0  ;;  %v1906_v15 = vpop.f32.mrb[34].mxu1  ;;  %v1087_v63 = vadd.f32 %v2469_v59, %v2438_v29 }
 0x15c   : > { %1597 = vst [vmem:[%s2480_s22 + $0x10] sm:$0xff] %v1349_v7  ;;  %v1352_v16 = vadd.f32 %v1906_v15, %v1063_v4  ;;  %v1120_v19 = vpop.f32.mrb[35].mxu0  ;;  %v1343_v20 = vpop.f32.mrb[35].mxu1  ;;  %v1111_v15 = vadd.f32 %v2469_v59, %v2462_v53 }
 0x15d   : > { %1595 = vst [vmem:[%s2480_s22] sm:$0xff] %v1341_v11  ;;  %v1344_v23 = vadd.f32 %v1343_v20, %v1055_v57  ;;  %v1100_v57 = vadd.f32 %v2469_v59, %v2450_v41 }
 0x15e   : > { %1598 = vst [vmem:[%s2480_s22 + $0x18] sm:$0xff] %v1352_v16 }
 0x15f   : > { %1596 = vst [vmem:[%s2480_s22 + $0x8] sm:$0xff] %v1344_v23  ;;  %v1103_v23 = vadd.f32 %v2469_v59, %v2454_v45 }
 0x161   : > { %v1123_v24 = vpop.f32.mrb[36].mxu0  ;;  %v1909_v27 = vpop.f32.mrb[36].mxu1 }
 0x162   : > { %v1365_v31 = vadd.f32 %v1909_v27, %v1076_v5  ;;  %v1125_v32 = vpop.f32.mrb[37].mxu0  ;;  %v1356_v35 = vpop.f32.mrb[37].mxu1  ;;  %v1124_v53 = vadd.f32 %v2469_v59, %v1123_v24 }
 0x163   : > { %v1357_v39 = vadd.f32 %v1356_v35, %v1068_v61  ;;  %v1126_v40 = vpop.f32.mrb[38].mxu0  ;;  %v1910_v17 = vpop.f32.mrb[38].mxu1  ;;  %v1116_v32 = vadd.f32 %v2469_v59, %v2475_v0 }
 0x164   : > { %1601 = vst [vmem:[%s2480_s22 + $0x30] sm:$0xff] %v1365_v31  ;;  %v1368_v43 = vadd.f32 %v1910_v17, %v1079_v28  ;;  %v1128_v44 = vpop.f32.mrb[39].mxu0  ;;  %v1359_v9 = vpop.f32.mrb[39].mxu1 }
 0x165   : > { %1599 = vst [vmem:[%s2480_s22 + $0x20] sm:$0xff] %v1357_v39  ;;  %v1360_v47 = vadd.f32 %v1359_v9, %v1071_v36  ;;  %v1127_v36 = vadd.f32 %v2469_v59, %v1126_v40  ;;  %v1119_v44 = vadd.f32 %v2469_v59, %v2485_v12 }
 0x166   : > { %1602 = vst [vmem:[%s2480_s22 + $0x38] sm:$0xff] %v1368_v43 }
 0x167   : > { %1600 = vst [vmem:[%s2480_s22 + $0x28] sm:$0xff] %v1360_v47 }
 0x169   : > { %v1131_v13 = vpop.f32.mrb[40].mxu0  ;;  %v1913_v51 = vpop.f32.mrb[40].mxu1 }
 0x16a   : > { %v1381_v55 = vadd.f32 %v1913_v51, %v1092_v21  ;;  %v1133_v56 = vpop.f32.mrb[41].mxu0  ;;  %v1372_v60 = vpop.f32.mrb[41].mxu1 }
 0x16b   : > { %v1373_v3 = vadd.f32 %v1372_v60, %v1084_v48  ;;  %v1134_v4 = vpop.f32.mrb[42].mxu0  ;;  %v1914_v33 = vpop.f32.mrb[42].mxu1 }
 0x16c   : > { %1605 = vst [vmem:[%s2480_s22 + $0x50] sm:$0xff] %v1381_v55  ;;  %v1384_v7 = vadd.f32 %v1914_v33, %v1095_v52  ;;  %v1136_v8 = vpop.f32.mrb[43].mxu0  ;;  %v1375_v25 = vpop.f32.mrb[43].mxu1  ;;  %v1132_v52 = vadd.f32 %v2469_v59, %v1131_v13  ;;  %v1135_v33 = vadd.f32 %v2469_v59, %v1134_v4 }
 0x16d   : > { %1603 = vst [vmem:[%s2480_s22 + $0x40] sm:$0xff] %v1373_v3  ;;  %v1376_v1 = vadd.f32 %v1375_v25, %v1087_v63 }
 0x16e   : > { %1606 = vst [vmem:[%s2480_s22 + $0x58] sm:$0xff] %v1384_v7 }
 0x16f   : > { %1604 = vst [vmem:[%s2480_s22 + $0x48] sm:$0xff] %v1376_v1 }
 0x171   : > { %v1139_v29 = vpop.f32.mrb[44].mxu0  ;;  %v1917_v11 = vpop.f32.mrb[44].mxu1 }
 0x172   : > { %v1397_v16 = vadd.f32 %v1917_v11, %v1108_v37  ;;  %v1141_v19 = vpop.f32.mrb[45].mxu0  ;;  %v1388_v20 = vpop.f32.mrb[45].mxu1  ;;  %v1140_v40 = vadd.f32 %v2469_v59, %v1139_v29 }
 0x173   : > { %v1389_v5 = vadd.f32 %v1388_v20, %v1100_v57  ;;  %v1142_v61 = vpop.f32.mrb[46].mxu0  ;;  %v1918_v49 = vpop.f32.mrb[46].mxu1 }
 0x174   : > { %1609 = vst [vmem:[%s2480_s22 + $0x70] sm:$0xff] %v1397_v16  ;;  %v1400_v27 = vadd.f32 %v1918_v49, %v1111_v15  ;;  %v1144_v28 = vpop.f32.mrb[47].mxu0  ;;  %v1391_v41 = vpop.f32.mrb[47].mxu1  ;;  %v1143_v56 = vadd.f32 %v2469_v59, %v1142_v61 }
 0x175   : > { %1607 = vst [vmem:[%s2480_s22 + $0x60] sm:$0xff] %v1389_v5  ;;  %v1392_v31 = vadd.f32 %v1391_v41, %v1103_v23 }
 0x176   : > { %1610 = vst [vmem:[%s2480_s22 + $0x78] sm:$0xff] %v1400_v27 }
 0x177   : > { %1608 = vst [vmem:[%s2480_s22 + $0x68] sm:$0xff] %v1392_v31 }
 0x179   : > { %v1147_v35 = vpop.f32.mrb[48].mxu0  ;;  %v1921_v45 = vpop.f32.mrb[48].mxu1 }
 0x17a   : > { %v1413_v39 = vadd.f32 %v1921_v45, %v1124_v53  ;;  %v1149_v17 = vpop.f32.mrb[49].mxu0  ;;  %v1404_v43 = vpop.f32.mrb[49].mxu1  ;;  %v1148_v11 = vadd.f32 %v2469_v59, %v1147_v35 }
 0x17b   : > { %v1405_v9 = vadd.f32 %v1404_v43, %v1116_v32  ;;  %v1150_v47 = vpop.f32.mrb[50].mxu0  ;;  %v1922_v21 = vpop.f32.mrb[50].mxu1 }
 0x17c   : > { %1613 = vst [vmem:[%s2480_s22 + $0x90] sm:$0xff] %v1413_v39  ;;  %v1416_v24 = vadd.f32 %v1922_v21, %v1127_v36  ;;  %v1152_v48 = vpop.f32.mrb[51].mxu0  ;;  %v1407_v51 = vpop.f32.mrb[51].mxu1  ;;  %v1151_v5 = vadd.f32 %v2469_v59, %v1150_v47 }
 0x17d   : > { %1611 = vst [vmem:[%s2480_s22 + $0x80] sm:$0xff] %v1405_v9  ;;  %v1408_v0 = vadd.f32 %v1407_v51, %v1119_v44 }
 0x17e   : > { %1614 = vst [vmem:[%s2480_s22 + $0x98] sm:$0xff] %v1416_v24 }
 0x17f   : > { %1612 = vst [vmem:[%s2480_s22 + $0x88] sm:$0xff] %v1408_v0 }
 0x181   : > { %v1155_v55 = vpop.f32.mrb[52].mxu0  ;;  %v1925_v12 = vpop.f32.mrb[52].mxu1 }
 0x182   : > { %v1429_v60 = vadd.f32 %v1925_v12, %v1140_v40  ;;  %v1157_v63 = vpop.f32.mrb[53].mxu0  ;;  %v1420_v3 = vpop.f32.mrb[53].mxu1  ;;  %v1156_v29 = vadd.f32 %v2469_v59, %v1155_v55 }
 0x183   : > { %v1421_v7 = vadd.f32 %v1420_v3, %v1132_v52  ;;  %v1158_v8 = vpop.f32.mrb[54].mxu0  ;;  %v1926_v25 = vpop.f32.mrb[54].mxu1 }
 0x184   : > { %1617 = vst [vmem:[%s2480_s22 + $0xb0] sm:$0xff] %v1429_v60  ;;  %v1432_v1 = vadd.f32 %v1926_v25, %v1143_v56  ;;  %v1160_v37 = vpop.f32.mrb[55].mxu0  ;;  %v1423_v57 = vpop.f32.mrb[55].mxu1  ;;  %v1159_v16 = vadd.f32 %v2469_v59, %v1158_v8 }
 0x185   : > { %1615 = vst [vmem:[%s2480_s22 + $0xa0] sm:$0xff] %v1421_v7  ;;  %v1424_v13 = vadd.f32 %v1423_v57, %v1135_v33 }
 0x186   : > { %1618 = vst [vmem:[%s2480_s22 + $0xb8] sm:$0xff] %v1432_v1 }
 0x187   : > { %1616 = vst [vmem:[%s2480_s22 + $0xa8] sm:$0xff] %v1424_v13 }
 0x189   : > { %v1163_v15 = vpop.f32.mrb[56].mxu0  ;;  %v1929_v4 = vpop.f32.mrb[56].mxu1 }
 0x18a   : > { %v1445_v19 = vadd.f32 %v1929_v4, %v1156_v29  ;;  %v1165_v20 = vpop.f32.mrb[57].mxu0  ;;  %v1436_v23 = vpop.f32.mrb[57].mxu1  ;;  %v1164_v32 = vadd.f32 %v2469_v59, %v1163_v15 }
 0x18b   : > { %v1437_v61 = vadd.f32 %v1436_v23, %v1148_v11  ;;  %v1166_v49 = vpop.f32.mrb[58].mxu0  ;;  %v1930_v27 = vpop.f32.mrb[58].mxu1 }
 0x18c   : > { %1621 = vst [vmem:[%s2480_s22 + $0xd0] sm:$0xff] %v1445_v19  ;;  %v1448_v28 = vadd.f32 %v1930_v27, %v1159_v16  ;;  %v1168_v41 = vpop.f32.mrb[59].mxu0  ;;  %v1439_v31 = vpop.f32.mrb[59].mxu1  ;;  %v1167_v43 = vadd.f32 %v2469_v59, %v1166_v49 }
 0x18d   : > { %1619 = vst [vmem:[%s2480_s22 + $0xc0] sm:$0xff] %v1437_v61  ;;  %v1440_v53 = vadd.f32 %v1439_v31, %v1151_v5 }
 0x18e   : > { %1622 = vst [vmem:[%s2480_s22 + $0xd8] sm:$0xff] %v1448_v28 }
 0x18f   : > { %1620 = vst [vmem:[%s2480_s22 + $0xc8] sm:$0xff] %v1440_v53 }
 0x191   : > { %v1171_v35 = vpop.f32.mrb[60].mxu0  ;;  %v1933_v45 = vpop.f32.mrb[60].mxu1 }
 0x192   : > { %v1172_v36 = vadd.f32 %v2469_v59, %v1171_v35  ;;  %v1173_v39 = vpop.f32.mrb[61].mxu0  ;;  %v1452_v17 = vpop.f32.mrb[61].mxu1 }
 0x193   : > { %v1453_v44 = vadd.f32 %v1452_v17, %v1164_v32  ;;  %v1174_v9 = vpop.f32.mrb[62].mxu0  ;;  %v1934_v47 = vpop.f32.mrb[62].mxu1 }
 0x194   : > { %v1461_v21 = vadd.f32 %v1933_v45, %v1172_v36  ;;  %v1175_v24 = vadd.f32 %v2469_v59, %v1174_v9  ;;  %v1176_v48 = vpop.f32.mrb[63].mxu0  ;;  %v1455_v51 = vpop.f32.mrb[63].mxu1 }
 0x195   : > { %1623 = vst [vmem:[%s2480_s22 + $0xe0] sm:$0xff] %v1453_v44  ;;  %v1456_v0 = vadd.f32 %v1455_v51, %v1167_v43 }
 0x196   : > { %1625 = vst [vmem:[%s2480_s22 + $0xf0] sm:$0xff] %v1461_v21  ;;  %v1464_v40 = vadd.f32 %v1934_v47, %v1175_v24 }
 0x197   : > { %1624 = vst [vmem:[%s2480_s22 + $0xe8] sm:$0xff] %v1456_v0 }
 0x198   : > { %1626 = vst [vmem:[%s2480_s22 + $0xf8] sm:$0xff] %v1464_v40 }
 0x199   : > { %v1179_v52 = vpop.f32.mrb[64].mxu0  ;;  %v1937_v55 = vpop.f32.mrb[64].mxu1 }
 0x19a   : > { %v1180_v12 = vadd.f32 %v2469_v59, %v1179_v52  ;;  %v1181_v56 = vpop.f32.mrb[65].mxu0  ;;  %v1468_v60 = vpop.f32.mrb[65].mxu1 }
 0x19b   : > { %v1182_v63 = vpop.f32.mrb[66].mxu0  ;;  %v1938_v3 = vpop.f32.mrb[66].mxu1 }
 0x19c   : > { %v1469_v33 = vadd.f32 %v1468_v60, %v1180_v12  ;;  %v1183_v7 = vadd.f32 %v2469_v59, %v1182_v63  ;;  %v1184_v8 = vpop.f32.mrb[67].mxu0  ;;  %v1471_v25 = vpop.f32.mrb[67].mxu1  ;;  %v1244_v12 = vadd.f32 %v2469_v59, %v2408_v58  ;;  %v1255_v63 = vadd.f32 %v2469_v59, %v2416_v6 }
 0x19e   : > { %1627 = vst [vmem:[%s2480_s22 + $0x100] sm:$0xff] %v1469_v33  ;;  %v1472_v1 = vadd.f32 %v1471_v25, %v1183_v7 }
 0x1a0   : > { %1628 = vst [vmem:[%s2480_s22 + $0x108] sm:$0xff] %v1472_v1 }
 0x1a1   : > { %v1187_v37 = vpop.f32.mrb[68].mxu0  ;;  %v1941_v57 = vpop.f32.mrb[68].mxu1 }
 0x1a2   : > { %v1188_v13 = vadd.f32 %v2469_v59, %v1187_v37  ;;  %v1189_v29 = vpop.f32.mrb[69].mxu0  ;;  %v1484_v11 = vpop.f32.mrb[69].mxu1 }
 0x1a3   : > { %v1190_v15 = vpop.f32.mrb[70].mxu0  ;;  %v1942_v4 = vpop.f32.mrb[70].mxu1 }
 0x1a4   : > { %v1477_v16 = vadd.f32 %v1937_v55, %v1188_v13  ;;  %v1191_v19 = vadd.f32 %v2469_v59, %v1190_v15  ;;  %v1192_v20 = vpop.f32.mrb[71].mxu0  ;;  %v1487_v23 = vpop.f32.mrb[71].mxu1  ;;  %v1252_v55 = vadd.f32 %v2469_v59, %v2414_v2  ;;  %v1247_v2 = vadd.f32 %v2469_v59, %v2412_v62 }
 0x1a5   : > { %v1268_v62 = vadd.f32 %v2469_v59, %v2428_v18  ;;  %v1271_v20 = vadd.f32 %v2469_v59, %v2432_v22  ;;  %v1263_v18 = vadd.f32 %v2469_v59, %v2424_v14  ;;  %v1284_v14 = vadd.f32 %v2469_v59, %v2444_v34 }
 0x1a6   : > { %1629 = vst [vmem:[%s2480_s22 + $0x110] sm:$0xff] %v1477_v16  ;;  %v1480_v5 = vadd.f32 %v1938_v3, %v1191_v19  ;;  %v1279_v34 = vadd.f32 %v2469_v59, %v2440_v30  ;;  %v1300_v30 = vadd.f32 %v2469_v59, %v2460_v50  ;;  %v1295_v50 = vadd.f32 %v2469_v59, %v2456_v46 }
 0x1a8   : > { %1630 = vst [vmem:[%s2480_s22 + $0x118] sm:$0xff] %v1480_v5 }
 0x1a9   : > { %v1195_v61 = vpop.f32.mrb[72].mxu0  ;;  %v2569_v49 = vpop.f32.mrb[72].mxu1 }
 0x1aa   : > { %v1196_v27 = vadd.f32 %v2469_v59, %v1195_v61  ;;  %v1197_v28 = vpop.f32.mrb[73].mxu0  ;;  %v1500_v41 = vpop.f32.mrb[73].mxu1 }
 0x1ab   : > { %v1198_v31 = vpop.f32.mrb[74].mxu0  ;;  %v2572_v53 = vpop.f32.mrb[74].mxu1 }
 0x1ac   : > { %v1485_v32 = vadd.f32 %v1484_v11, %v1196_v27  ;;  %v1199_v35 = vadd.f32 %v2469_v59, %v1198_v31  ;;  %v1200_v45 = vpop.f32.mrb[75].mxu0  ;;  %v1503_v36 = vpop.f32.mrb[75].mxu1 }
 0x1ae   : > { %1631 = vst [vmem:[%s2480_s22 + $0x120] sm:$0xff] %v1485_v32  ;;  %v1488_v39 = vadd.f32 %v1487_v23, %v1199_v35 }
 0x1b0   : > { %1632 = vst [vmem:[%s2480_s22 + $0x128] sm:$0xff] %v1488_v39 }
 0x1b1   : > { %v1203_v17 = vpop.f32.mrb[76].mxu0  ;;  %v2577_v43 = vpop.f32.mrb[76].mxu1 }
 0x1b2   : > { %v1204_v44 = vadd.f32 %v2469_v59, %v1203_v17  ;;  %v1205_v9 = vpop.f32.mrb[77].mxu0  ;;  %v2580_v47 = vpop.f32.mrb[77].mxu1 }
 0x1b3   : > { %v1206_v21 = vpop.f32.mrb[78].mxu0  ;;  %v2582_v24 = vpop.f32.mrb[78].mxu1  ;;  %v1287_v9 = vadd.f32 %v2469_v59, %v2448_v38 }
 0x1b4   : > { %v1493_v48 = vadd.f32 %v1941_v57, %v1204_v44  ;;  %v1207_v51 = vadd.f32 %v2469_v59, %v1206_v21  ;;  %v1208_v0 = vpop.f32.mrb[79].mxu0  ;;  %v2585_v40 = vpop.f32.mrb[79].mxu1 }
 0x1b6   : > { %1633 = vst [vmem:[%s2480_s22 + $0x130] sm:$0xff] %v1493_v48  ;;  %v1496_v52 = vadd.f32 %v1942_v4, %v1207_v51  ;;  %v1260_v4 = vadd.f32 %v2469_v59, %v2420_v10 }
 0x1b8   : > { %1634 = vst [vmem:[%s2480_s22 + $0x138] sm:$0xff] %v1496_v52 }
 0x1b9   : > { %v1211_v56 = vpop.f32.mrb[80].mxu0  ;;  %v1953_v60 = vpop.f32.mrb[80].mxu1 }
 0x1ba   : > { %v1212_v3 = vadd.f32 %v2469_v59, %v1211_v56  ;;  %v1541_v33 = vadd.f32 %v1953_v60, %v1252_v55  ;;  %v1213_v7 = vpop.f32.mrb[81].mxu0  ;;  %v1532_v8 = vpop.f32.mrb[81].mxu1 }
 0x1bb   : > { %v1533_v25 = vadd.f32 %v1532_v8, %v1244_v12  ;;  %v1214_v58 = vpop.f32.mrb[82].mxu0  ;;  %v1954_v1 = vpop.f32.mrb[82].mxu1  ;;  %v1303_v8 = vadd.f32 %v2469_v59, %v2464_v54 }
 0x1bc   : > { %v1501_v37 = vadd.f32 %v1500_v41, %v1212_v3  ;;  %1645 = vst [vmem:[%s2480_s22 + $0x190] sm:$0xff] %v1541_v33  ;;  %v1215_v57 = vadd.f32 %v2469_v59, %v1214_v58  ;;  %v1544_v6 = vadd.f32 %v1954_v1, %v1255_v63  ;;  %v1216_v13 = vpop.f32.mrb[83].mxu0  ;;  %v1535_v29 = vpop.f32.mrb[83].mxu1 }
 0x1bd   : > { %1643 = vst [vmem:[%s2480_s22 + $0x180] sm:$0xff] %v1533_v25  ;;  %v1536_v11 = vadd.f32 %v1535_v29, %v1247_v2 }
 0x1be   : > { %1635 = vst [vmem:[%s2480_s22 + $0x140] sm:$0xff] %v1501_v37  ;;  %v1504_v15 = vadd.f32 %v1503_v36, %v1215_v57  ;;  %1646 = vst [vmem:[%s2480_s22 + $0x198] sm:$0xff] %v1544_v6 }
 0x1bf   : > { %1644 = vst [vmem:[%s2480_s22 + $0x188] sm:$0xff] %v1536_v11 }
 0x1c0   : > { %1636 = vst [vmem:[%s2480_s22 + $0x148] sm:$0xff] %v1504_v15 }
 0x1c1   : > { %v1219_v16 = vpop.f32.mrb[84].mxu0  ;;  %v1957_v19 = vpop.f32.mrb[84].mxu1 }
 0x1c2   : > { %v1220_v23 = vadd.f32 %v2469_v59, %v1219_v16  ;;  %v1557_v5 = vadd.f32 %v1957_v19, %v1268_v62  ;;  %v1221_v61 = vpop.f32.mrb[85].mxu0  ;;  %v1548_v27 = vpop.f32.mrb[85].mxu1 }
 0x1c3   : > { %v1549_v28 = vadd.f32 %v1548_v27, %v1260_v4  ;;  %v1222_v10 = vpop.f32.mrb[86].mxu0  ;;  %v1958_v41 = vpop.f32.mrb[86].mxu1 }
 0x1c4   : > { %v1509_v31 = vadd.f32 %v2569_v49, %v1220_v23  ;;  %1649 = vst [vmem:[%s2480_s22 + $0x1b0] sm:$0xff] %v1557_v5  ;;  %v1223_v22 = vadd.f32 %v2469_v59, %v1222_v10  ;;  %v1560_v32 = vadd.f32 %v1958_v41, %v1271_v20  ;;  %v1224_v35 = vpop.f32.mrb[87].mxu0  ;;  %v1551_v45 = vpop.f32.mrb[87].mxu1  ;;  %v1276_v49 = vadd.f32 %v2469_v59, %v2436_v26 }
 0x1c5   : > { %1647 = vst [vmem:[%s2480_s22 + $0x1a0] sm:$0xff] %v1549_v28  ;;  %v1552_v36 = vadd.f32 %v1551_v45, %v1263_v18 }
 0x1c6   : > { %1637 = vst [vmem:[%s2480_s22 + $0x150] sm:$0xff] %v1509_v31  ;;  %v1512_v39 = vadd.f32 %v2572_v53, %v1223_v22  ;;  %1650 = vst [vmem:[%s2480_s22 + $0x1b8] sm:$0xff] %v1560_v32 }
 0x1c7   : > { %1648 = vst [vmem:[%s2480_s22 + $0x1a8] sm:$0xff] %v1552_v36 }
 0x1c8   : > { %1638 = vst [vmem:[%s2480_s22 + $0x158] sm:$0xff] %v1512_v39 }
 0x1c9   : > { %v1227_v17 = vpop.f32.mrb[88].mxu0  ;;  %v1961_v44 = vpop.f32.mrb[88].mxu1 }
 0x1ca   : > { %v1228_v21 = vadd.f32 %v2469_v59, %v1227_v17  ;;  %v1573_v53 = vadd.f32 %v1961_v44, %v1284_v14  ;;  %v1229_v48 = vpop.f32.mrb[89].mxu0  ;;  %v1564_v51 = vpop.f32.mrb[89].mxu1 }
 0x1cb   : > { %v1565_v0 = vadd.f32 %v1564_v51, %v1276_v49  ;;  %v1230_v26 = vpop.f32.mrb[90].mxu0  ;;  %v1962_v52 = vpop.f32.mrb[90].mxu1 }
 0x1cc   : > { %v1517_v55 = vadd.f32 %v2580_v47, %v1228_v21  ;;  %1653 = vst [vmem:[%s2480_s22 + $0x1d0] sm:$0xff] %v1573_v53  ;;  %v1231_v38 = vadd.f32 %v2469_v59, %v1230_v26  ;;  %v1576_v12 = vadd.f32 %v1962_v52, %v1287_v9  ;;  %v1232_v56 = vpop.f32.mrb[91].mxu0  ;;  %v1567_v60 = vpop.f32.mrb[91].mxu1  ;;  %v1292_v47 = vadd.f32 %v2469_v59, %v2452_v42 }
 0x1cd   : > { %1651 = vst [vmem:[%s2480_s22 + $0x1c0] sm:$0xff] %v1565_v0  ;;  %v1568_v63 = vadd.f32 %v1567_v60, %v1279_v34 }
 0x1ce   : > { %1639 = vst [vmem:[%s2480_s22 + $0x160] sm:$0xff] %v1517_v55  ;;  %v1520_v3 = vadd.f32 %v2585_v40, %v1231_v38  ;;  %1654 = vst [vmem:[%s2480_s22 + $0x1d8] sm:$0xff] %v1576_v12 }
 0x1cf   : > { %1652 = vst [vmem:[%s2480_s22 + $0x1c8] sm:$0xff] %v1568_v63 }
 0x1d0   : > { %1640 = vst [vmem:[%s2480_s22 + $0x168] sm:$0xff] %v1520_v3 }
 0x1d1   : > { %v1235_v33 = vpop.f32.mrb[92].mxu0  ;;  %v1965_v7 = vpop.f32.mrb[92].mxu1 }
 0x1d2   : > { %v1236_v2 = vadd.f32 %v2469_v59, %v1235_v33  ;;  %v1589_v40 = vadd.f32 %v1965_v7, %v1300_v30  ;;  %v1237_v25 = vpop.f32.mrb[93].mxu0  ;;  %v1580_v58 = vpop.f32.mrb[93].mxu1 }
 0x1d3   : > { %v1581_v1 = vadd.f32 %v1580_v58, %v1292_v47  ;;  %v1238_v42 = vpop.f32.mrb[94].mxu0  ;;  %v1966_v37 = vpop.f32.mrb[94].mxu1 }
 0x1d4   : > { %v1525_v57 = vadd.f32 %v2577_v43, %v1236_v2  ;;  %1657 = vst [vmem:[%s2480_s22 + $0x1f0] sm:$0xff] %v1589_v40  ;;  %v1239_v54 = vadd.f32 %v2469_v59, %v1238_v42  ;;  %v1592_v6 = vadd.f32 %v1966_v37, %v1303_v8  ;;  %v1240_v13 = vpop.f32.mrb[95].mxu0  ;;  %v1583_v29 = vpop.f32.mrb[95].mxu1 }
 0x1d5   : > { %1655 = vst [vmem:[%s2480_s22 + $0x1e0] sm:$0xff] %v1581_v1  ;;  %v1584_v11 = vadd.f32 %v1583_v29, %v1295_v50 }
 0x1d6   : > { %1641 = vst [vmem:[%s2480_s22 + $0x170] sm:$0xff] %v1525_v57  ;;  %v1528_v15 = vadd.f32 %v2582_v24, %v1239_v54  ;;  %1658 = vst [vmem:[%s2480_s22 + $0x1f8] sm:$0xff] %v1592_v6 }
 0x1d7   : > { %1656 = vst [vmem:[%s2480_s22 + $0x1e8] sm:$0xff] %v1584_v11 }
 0x1d8   : > { %1642 = vst [vmem:[%s2480_s22 + $0x178] sm:$0xff] %v1528_v15 }
 0x1d9 PF: > { %s13_s12 = sadd.s32 1, %s2167_s12  }
 0x1da   : > { %p10_p4 = scmp.ge.s32.totalorder %s13_s12, 4  }
 0x1dc   :  { %12 = sbr.rel (!%p10_p4) target bundleno = 1 (0x1), region = 62 }

// kernel: forward_im2col.9
= control target key start
LH: loop header
LB: loop body
LE: loop exit
PB: predicated region body
PF: predicated region fallthrough
CT: control target
= control target key end

     0   :  { %s1382_s12 = smov 0   ;;  %s1687_s0 = inlined_call_operand.vmem [shape: bf16[1024,256], index: 0, kind: input, shape index: {}]   ;;  %s1688_s1 = inlined_call_operand.vmem [shape: bf16[256,128], index: 1, kind: input, shape index: {}]   ;;  %s1689_s2 = inlined_call_operand.vmem [shape: f32[1,128], index: 2, kind: input, shape index: {}]   ;;  %s1690_s3 = inlined_call_operand.vmem [shape: f32[1024,128], index: 3, kind: output, shape index: {}]  }
   0x1 LB: > { %s1106_s13 = sadd.s32 4294967295, %s1359_s12   ;;  %p1110_p0 = scmp.ge.s32.totalorder %s1359_s12, 1  ;;  %s1359_s12 = sphi %s1382_s12, %s13_s12  }
   0x2   : > { %p139_p1 = scmp.lt.s32.totalorder %s1359_s12, 3 }
   0x4   : > { %p140_p2 = pnand %p1110_p0, %p139_p1 }
   0x5   : > { %v1241_v0 = vld [vmem:[%s1688_s1] sm:$0xff] (!%p140_p2)   ;;  %v1361_v1 = vmov (!%p140_p2), 0   ;;  %s1111_s16 = sshll.u32 (!%p140_p2), %s1106_s13, 6  ;;  %v1242_v2 = vld [vmem:[%s1688_s1 + $0x8] sm:$0xff] (!%p140_p2)   ;;  %v1243_v3 = vld [vmem:[%s1688_s1 + $0x10] sm:$0xff] (!%p140_p2)  }
   0x6   : > { %143 = sbr.rel (%p140_p2) target bundleno = 407 (0x197), region = 32  ;;  %697 = vmatprep.subr.bf16.mxu0 (!%p140_p2), %v1361_v1  ;;  %1200 = vmatprep.subr.bf16.mxu1 (!%p140_p2), %v1361_v1  ;;  %p165_p3 = scmp.lt.s32.totalorder (!%p140_p2), %s1111_s16, 127  ;;  %v1244_v4 = vld [vmem:[%s1688_s1 + $0x18] sm:$0xff] (!%p140_p2)   ;;  %v1245_v5 = vld [vmem:[%s1688_s1 + $0x20] sm:$0xff] (!%p140_p2)   ;;  %v1246_v7 = vld [vmem:[%s1688_s1 + $0x28] sm:$0xff] (!%p140_p2)  }
   0x7   : > { %698 = vmatpush1.bf16.msra.mxu0 (!%p140_p2), %v1241_v0  ;;  %1216 = vmatpush1.bf16.msra.mxu1 (!%p140_p2), %v1241_v0  ;;  %v1247_v9 = vld [vmem:[%s1688_s1 + $0x30] sm:$0xff] (!%p140_p2)   ;;  %v1248_v10 = vld [vmem:[%s1688_s1 + $0x38] sm:$0xff] (!%p140_p2)   ;;  %v1249_v11 = vld [vmem:[%s1688_s1 + $0x40] sm:$0xff] (!%p140_p2)  }
   0x8   : > { %699 = vmatprep.subr.bf16.mxu0 (!%p140_p2), %v1361_v1  ;;  %1201 = vmatprep.subr.bf16.mxu1 (!%p140_p2), %v1361_v1  ;;  %v1250_v12 = vld [vmem:[%s1688_s1 + $0x48] sm:$0xff] (!%p140_p2)   ;;  %v1251_v13 = vld [vmem:[%s1688_s1 + $0x50] sm:$0xff] (!%p140_p2)   ;;  %v1252_v14 = vld [vmem:[%s1688_s1 + $0x58] sm:$0xff] (!%p140_p2)  }
   0x9   : > { %v1253_v15 = vld [vmem:[%s1688_s1 + $0x60] sm:$0xff] (!%p140_p2)   ;;  %v1254_v16 = vld [vmem:[%s1688_s1 + $0x68] sm:$0xff] (!%p140_p2)   ;;  %v1255_v17 = vld [vmem:[%s1688_s1 + $0x70] sm:$0xff] (!%p140_p2)  }
   0xa   : > { %v1256_v18 = vld [vmem:[%s1688_s1 + $0x78] sm:$0xff] (!%p140_p2)  }
   0xb   : > { %700 = vmatpush1.bf16.msra.mxu0 (!%p140_p2), %v1242_v2  ;;  %1217 = vmatpush1.bf16.msra.mxu1 (!%p140_p2), %v1242_v2 }
   0xc   : > { %701 = vmatprep.subr.bf16.mxu0 (!%p140_p2), %v1361_v1  ;;  %1202 = vmatprep.subr.bf16.mxu1 (!%p140_p2), %v1361_v1 }
   0xd   : > { %s1692_s16 = smov (!%p165_p3, %s1111_s16), 127 }
   0xe   : > { %s1199_s23 = sshll.u32 %s1692_s16, 3 }
   0xf   : > { %702 = vmatpush1.bf16.msra.mxu0 %v1243_v3  ;;  %1218 = vmatpush1.bf16.msra.mxu1 %v1243_v3  ;;  %s1421_s28 = scalar_lea.vmem %s1687_s0, %s1199_s23  ;;  %s1554_s5 = scalar_lea.vmem %s1690_s3, %s1199_s23 }
  0x10   : > { %703 = vmatprep.subr.bf16.mxu0 %v1361_v1  ;;  %1203 = vmatprep.subr.bf16.mxu1 %v1361_v1  ;;  %v1259_v6 = vld [vmem:[%s1421_s28 + $0x4] ss:$8 sps:$4 sm:$0xff]   ;;  %v1257_v19 = vld [vmem:[%s1421_s28] ss:$8 sps:$4 sm:$0xff]   ;;  %v1263_v21 = vld [vmem:[%s1421_s28 + $0x14] ss:$8 sps:$4 sm:$0xff]  }
  0x11   : > { %v1262_v8 = vld [vmem:[%s1421_s28 + $0x104] ss:$8 sps:$4 sm:$0xff]   ;;  %729 = vmatprep.mubr.bf16.mxu0 %v1259_v6  ;;  %v1260_v20 = vld [vmem:[%s1421_s28 + $0x100] ss:$8 sps:$4 sm:$0xff]   ;;  %v1265_v22 = vld [vmem:[%s1421_s28 + $0x114] ss:$8 sps:$4 sm:$0xff]  }
  0x12   : > { %857 = vmatprep.mubr.bf16.mxu1 %v1262_v8  ;;  %v1267_v23 = vld [vmem:[%s1421_s28 + $0x10] ss:$8 sps:$4 sm:$0xff]   ;;  %v1269_v25 = vld [vmem:[%s1421_s28 + $0x24] ss:$8 sps:$4 sm:$0xff]   ;;  %v1273_v27 = vld [vmem:[%s1421_s28 + $0x20] ss:$8 sps:$4 sm:$0xff]  }
  0x13   : > { %704 = vmatpush1.bf16.msra.mxu0 %v1244_v4  ;;  %1219 = vmatpush1.bf16.msra.mxu1 %v1244_v4  ;;  %v1268_v24 = vld [vmem:[%s1421_s28 + $0x110] ss:$8 sps:$4 sm:$0xff]   ;;  %v1271_v26 = vld [vmem:[%s1421_s28 + $0x124] ss:$8 sps:$4 sm:$0xff]   ;;  %v1274_v28 = vld [vmem:[%s1421_s28 + $0x120] ss:$8 sps:$4 sm:$0xff]  }
  0x14   : > { %705 = vmatprep.subr.bf16.mxu0 %v1361_v1  ;;  %1204 = vmatprep.subr.bf16.mxu1 %v1361_v1  ;;  %v1275_v29 = vld [vmem:[%s1421_s28 + $0x34] ss:$8 sps:$4 sm:$0xff]   ;;  %v1279_v31 = vld [vmem:[%s1421_s28 + $0x30] ss:$8 sps:$4 sm:$0xff]   ;;  %v1281_v33 = vld [vmem:[%s1421_s28 + $0x44] ss:$8 sps:$4 sm:$0xff]  }
  0x15   : > { %v1277_v30 = vld [vmem:[%s1421_s28 + $0x134] ss:$8 sps:$4 sm:$0xff]   ;;  %v1280_v32 = vld [vmem:[%s1421_s28 + $0x130] ss:$8 sps:$4 sm:$0xff]   ;;  %v1283_v34 = vld [vmem:[%s1421_s28 + $0x144] ss:$8 sps:$4 sm:$0xff]  }
  0x16   : > { %v1285_v35 = vld [vmem:[%s1421_s28 + $0x40] ss:$8 sps:$4 sm:$0xff]   ;;  %v1287_v37 = vld [vmem:[%s1421_s28 + $0x54] ss:$8 sps:$4 sm:$0xff]   ;;  %v1291_v39 = vld [vmem:[%s1421_s28 + $0x50] ss:$8 sps:$4 sm:$0xff]  }
  0x17   : > { %706 = vmatpush1.bf16.msra.mxu0 %v1245_v5  ;;  %1220 = vmatpush1.bf16.msra.mxu1 %v1245_v5  ;;  %v1286_v36 = vld [vmem:[%s1421_s28 + $0x140] ss:$8 sps:$4 sm:$0xff]   ;;  %v1289_v38 = vld [vmem:[%s1421_s28 + $0x154] ss:$8 sps:$4 sm:$0xff]   ;;  %v1292_v40 = vld [vmem:[%s1421_s28 + $0x150] ss:$8 sps:$4 sm:$0xff]  }
  0x18   : > { %707 = vmatprep.subr.bf16.mxu0 %v1361_v1  ;;  %1205 = vmatprep.subr.bf16.mxu1 %v1361_v1  ;;  %v1293_v41 = vld [vmem:[%s1421_s28 + $0x64] ss:$8 sps:$4 sm:$0xff]   ;;  %v1297_v43 = vld [vmem:[%s1421_s28 + $0x60] ss:$8 sps:$4 sm:$0xff]   ;;  %v1299_v45 = vld [vmem:[%s1421_s28 + $0x74] ss:$8 sps:$4 sm:$0xff]  }
  0x19   : > { %v1295_v42 = vld [vmem:[%s1421_s28 + $0x164] ss:$8 sps:$4 sm:$0xff]   ;;  %v1298_v44 = vld [vmem:[%s1421_s28 + $0x160] ss:$8 sps:$4 sm:$0xff]   ;;  %v1301_v46 = vld [vmem:[%s1421_s28 + $0x174] ss:$8 sps:$4 sm:$0xff]  }
  0x1a   : > { %v1303_v47 = vld [vmem:[%s1421_s28 + $0x70] ss:$8 sps:$4 sm:$0xff]   ;;  %v1305_v49 = vld [vmem:[%s1421_s28 + $0x84] ss:$8 sps:$4 sm:$0xff]   ;;  %v1309_v51 = vld [vmem:[%s1421_s28 + $0x80] ss:$8 sps:$4 sm:$0xff]  }
  0x1b   : > { %708 = vmatpush1.bf16.msra.mxu0 %v1246_v7  ;;  %1221 = vmatpush1.bf16.msra.mxu1 %v1246_v7  ;;  %v1304_v48 = vld [vmem:[%s1421_s28 + $0x170] ss:$8 sps:$4 sm:$0xff]   ;;  %v1307_v50 = vld [vmem:[%s1421_s28 + $0x184] ss:$8 sps:$4 sm:$0xff]   ;;  %v1310_v52 = vld [vmem:[%s1421_s28 + $0x180] ss:$8 sps:$4 sm:$0xff]  }
  0x1c   : > { %709 = vmatprep.subr.bf16.mxu0 %v1361_v1  ;;  %1206 = vmatprep.subr.bf16.mxu1 %v1361_v1  ;;  %v1311_v53 = vld [vmem:[%s1421_s28 + $0x94] ss:$8 sps:$4 sm:$0xff]   ;;  %v1315_v55 = vld [vmem:[%s1421_s28 + $0x90] ss:$8 sps:$4 sm:$0xff]   ;;  %v1317_v57 = vld [vmem:[%s1421_s28 + $0xa4] ss:$8 sps:$4 sm:$0xff]  }
  0x1d   : > { %v1313_v54 = vld [vmem:[%s1421_s28 + $0x194] ss:$8 sps:$4 sm:$0xff]   ;;  %v1316_v56 = vld [vmem:[%s1421_s28 + $0x190] ss:$8 sps:$4 sm:$0xff]   ;;  %v1319_v58 = vld [vmem:[%s1421_s28 + $0x1a4] ss:$8 sps:$4 sm:$0xff]  }
  0x1e   : > { %v1321_v59 = vld [vmem:[%s1421_s28 + $0xa0] ss:$8 sps:$4 sm:$0xff]   ;;  %v1323_v61 = vld [vmem:[%s1421_s28 + $0xb4] ss:$8 sps:$4 sm:$0xff]   ;;  %v1327_v63 = vld [vmem:[%s1421_s28 + $0xb0] ss:$8 sps:$4 sm:$0xff]  }
  0x1f   : > { %710 = vmatpush1.bf16.msra.mxu0 %v1247_v9  ;;  %1222 = vmatpush1.bf16.msra.mxu1 %v1247_v9  ;;  %v1322_v60 = vld [vmem:[%s1421_s28 + $0x1a0] ss:$8 sps:$4 sm:$0xff]   ;;  %v1325_v62 = vld [vmem:[%s1421_s28 + $0x1b4] ss:$8 sps:$4 sm:$0xff]   ;;  %v1328_v0 = vld [vmem:[%s1421_s28 + $0x1b0] ss:$8 sps:$4 sm:$0xff]  }
  0x20   : > { %711 = vmatprep.subr.bf16.mxu0 %v1361_v1  ;;  %1207 = vmatprep.subr.bf16.mxu1 %v1361_v1  ;;  %v1331_v2 = vld [vmem:[%s1421_s28 + $0x1c4] ss:$8 sps:$4 sm:$0xff]   ;;  %v1333_v3 = vld [vmem:[%s1421_s28 + $0xc0] ss:$8 sps:$4 sm:$0xff]   ;;  %v1335_v5 = vld [vmem:[%s1421_s28 + $0xd4] ss:$8 sps:$4 sm:$0xff]  }
  0x21   : > { %v1334_v4 = vld [vmem:[%s1421_s28 + $0x1c0] ss:$8 sps:$4 sm:$0xff]   ;;  %v1337_v6 = vld [vmem:[%s1421_s28 + $0x1d4] ss:$8 sps:$4 sm:$0xff]   ;;  %v1339_v7 = vld [vmem:[%s1421_s28 + $0xd0] ss:$8 sps:$4 sm:$0xff]  }
  0x22   : > { %v1340_v8 = vld [vmem:[%s1421_s28 + $0x1d0] ss:$8 sps:$4 sm:$0xff]   ;;  %v1341_v9 = vld [vmem:[%s1421_s28 + $0xe4] ss:$8 sps:$4 sm:$0xff]  }
  0x23   : > { %712 = vmatpush1.bf16.msra.mxu0 %v1248_v10  ;;  %1223 = vmatpush1.bf16.msra.mxu1 %v1248_v10  ;;  %v1343_v10 = vld [vmem:[%s1421_s28 + $0x1e4] ss:$8 sps:$4 sm:$0xff]  }
  0x24   : > { %713 = vmatprep.subr.bf16.mxu0 %v1361_v1  ;;  %1208 = vmatprep.subr.bf16.mxu1 %v1361_v1 }
  0x27   : > { %714 = vmatpush1.bf16.msra.mxu0 %v1249_v11  ;;  %1224 = vmatpush1.bf16.msra.mxu1 %v1249_v11  ;;  %v1345_v11 = vld [vmem:[%s1421_s28 + $0xe0] ss:$8 sps:$4 sm:$0xff]  }
  0x28   : > { %715 = vmatprep.subr.bf16.mxu0 %v1361_v1  ;;  %1209 = vmatprep.subr.bf16.mxu1 %v1361_v1 }
  0x2b   : > { %716 = vmatpush1.bf16.msra.mxu0 %v1250_v12  ;;  %1225 = vmatpush1.bf16.msra.mxu1 %v1250_v12  ;;  %v1346_v12 = vld [vmem:[%s1421_s28 + $0x1e0] ss:$8 sps:$4 sm:$0xff]  }
  0x2c   : > { %717 = vmatprep.subr.bf16.mxu0 %v1361_v1  ;;  %1210 = vmatprep.subr.bf16.mxu1 %v1361_v1 }
  0x2f   : > { %718 = vmatpush1.bf16.msra.mxu0 %v1251_v13  ;;  %1226 = vmatpush1.bf16.msra.mxu1 %v1251_v13  ;;  %v1347_v13 = vld [vmem:[%s1421_s28 + $0xf4] ss:$8 sps:$4 sm:$0xff]  }
  0x30   : > { %719 = vmatprep.subr.bf16.mxu0 %v1361_v1  ;;  %1211 = vmatprep.subr.bf16.mxu1 %v1361_v1 }
  0x33   : > { %720 = vmatpush1.bf16.msra.mxu0 %v1252_v14  ;;  %1227 = vmatpush1.bf16.msra.mxu1 %v1252_v14  ;;  %v1349_v14 = vld [vmem:[%s1421_s28 + $0x1f4] ss:$8 sps:$4 sm:$0xff]  }
  0x34   : > { %721 = vmatprep.subr.bf16.mxu0 %v1361_v1  ;;  %1212 = vmatprep.subr.bf16.mxu1 %v1361_v1 }
  0x37   : > { %722 = vmatpush1.bf16.msra.mxu0 %v1253_v15  ;;  %1228 = vmatpush1.bf16.msra.mxu1 %v1253_v15  ;;  %v1351_v15 = vld [vmem:[%s1421_s28 + $0xf0] ss:$8 sps:$4 sm:$0xff]  }
  0x38   : > { %723 = vmatprep.subr.bf16.mxu0 %v1361_v1  ;;  %1213 = vmatprep.subr.bf16.mxu1 %v1361_v1 }
  0x3b   : > { %724 = vmatpush1.bf16.msra.mxu0 %v1254_v16  ;;  %1229 = vmatpush1.bf16.msra.mxu1 %v1254_v16  ;;  %v1352_v16 = vld [vmem:[%s1421_s28 + $0x1f0] ss:$8 sps:$4 sm:$0xff]  }
  0x3c   : > { %725 = vmatprep.subr.bf16.mxu0 %v1361_v1  ;;  %1214 = vmatprep.subr.bf16.mxu1 %v1361_v1 }
  0x3f   : > { %726 = vmatpush1.bf16.msra.mxu0 %v1255_v17  ;;  %1230 = vmatpush1.bf16.msra.mxu1 %v1255_v17  ;;  %v1547_v17 = vld [vmem:[%s1689_s2] ss:$0 sm:$0xff] }
  0x40   : > { %727 = vmatprep.subr.bf16.mxu0 %v1361_v1  ;;  %1215 = vmatprep.subr.bf16.mxu1 %v1361_v1  ;;  %v1329_v1 = vld [vmem:[%s1421_s28 + $0xc4] ss:$8 sps:$4 sm:$0xff]  }
  0x43   : > { %728 = vmatpush1.bf16.msra.mxu0 %v1256_v18  ;;  %1231 = vmatpush1.bf16.msra.mxu1 %v1256_v18 }
  0x46   : > { %730 = vmatmul.mubr.bf16.vlgmr.msra.gmra.mrb[0].mxu0 %v1257_v19  ;;  %858 = vmatmul.mubr.bf16.vlgmr.msra.gmra.mrb[0].mxu1 %v1260_v20 }
  0x47   : > { %737 = vmatprep.mubr.bf16.mxu0 %v1263_v21  ;;  %865 = vmatprep.mubr.bf16.mxu1 %v1265_v22 }
  0x4e   : > { %738 = vmatmul.mubr.bf16.gmra.mrb[4].mxu0 %v1267_v23  ;;  %866 = vmatmul.mubr.bf16.gmra.mrb[4].mxu1 %v1268_v24 }
  0x4f   : > { %745 = vmatprep.mubr.bf16.mxu0 %v1269_v25  ;;  %873 = vmatprep.mubr.bf16.mxu1 %v1271_v26 }
  0x56   : > { %746 = vmatmul.mubr.bf16.gmra.mrb[8].mxu0 %v1273_v27  ;;  %874 = vmatmul.mubr.bf16.gmra.mrb[8].mxu1 %v1274_v28 }
  0x57   : > { %753 = vmatprep.mubr.bf16.mxu0 %v1275_v29  ;;  %881 = vmatprep.mubr.bf16.mxu1 %v1277_v30 }
  0x5e   : > { %754 = vmatmul.mubr.bf16.gmra.mrb[12].mxu0 %v1279_v31  ;;  %882 = vmatmul.mubr.bf16.gmra.mrb[12].mxu1 %v1280_v32 }
  0x5f   : > { %761 = vmatprep.mubr.bf16.mxu0 %v1281_v33  ;;  %889 = vmatprep.mubr.bf16.mxu1 %v1283_v34 }
  0x66   : > { %762 = vmatmul.mubr.bf16.gmra.mrb[16].mxu0 %v1285_v35  ;;  %890 = vmatmul.mubr.bf16.gmra.mrb[16].mxu1 %v1286_v36 }
  0x67   : > { %769 = vmatprep.mubr.bf16.mxu0 %v1287_v37  ;;  %897 = vmatprep.mubr.bf16.mxu1 %v1289_v38 }
  0x6e   : > { %770 = vmatmul.mubr.bf16.gmra.mrb[20].mxu0 %v1291_v39  ;;  %898 = vmatmul.mubr.bf16.gmra.mrb[20].mxu1 %v1292_v40 }
  0x6f   : > { %777 = vmatprep.mubr.bf16.mxu0 %v1293_v41  ;;  %905 = vmatprep.mubr.bf16.mxu1 %v1295_v42 }
  0x76   : > { %778 = vmatmul.mubr.bf16.gmra.mrb[24].mxu0 %v1297_v43  ;;  %906 = vmatmul.mubr.bf16.gmra.mrb[24].mxu1 %v1298_v44 }
  0x77   : > { %785 = vmatprep.mubr.bf16.mxu0 %v1299_v45  ;;  %913 = vmatprep.mubr.bf16.mxu1 %v1301_v46 }
  0x7e   : > { %786 = vmatmul.mubr.bf16.gmra.mrb[28].mxu0 %v1303_v47  ;;  %914 = vmatmul.mubr.bf16.gmra.mrb[28].mxu1 %v1304_v48 }
  0x7f   : > { %793 = vmatprep.mubr.bf16.mxu0 %v1305_v49  ;;  %921 = vmatprep.mubr.bf16.mxu1 %v1307_v50 }
  0x86   : > { %794 = vmatmul.mubr.bf16.gmra.mrb[32].mxu0 %v1309_v51  ;;  %922 = vmatmul.mubr.bf16.gmra.mrb[32].mxu1 %v1310_v52 }
  0x87   : > { %801 = vmatprep.mubr.bf16.mxu0 %v1311_v53  ;;  %929 = vmatprep.mubr.bf16.mxu1 %v1313_v54 }
  0x8e   : > { %802 = vmatmul.mubr.bf16.gmra.mrb[36].mxu0 %v1315_v55  ;;  %930 = vmatmul.mubr.bf16.gmra.mrb[36].mxu1 %v1316_v56 }
  0x8f   : > { %809 = vmatprep.mubr.bf16.mxu0 %v1317_v57  ;;  %937 = vmatprep.mubr.bf16.mxu1 %v1319_v58 }
  0x96   : > { %810 = vmatmul.mubr.bf16.gmra.mrb[40].mxu0 %v1321_v59  ;;  %938 = vmatmul.mubr.bf16.gmra.mrb[40].mxu1 %v1322_v60 }
  0x97   : > { %817 = vmatprep.mubr.bf16.mxu0 %v1323_v61  ;;  %945 = vmatprep.mubr.bf16.mxu1 %v1325_v62 }
  0x9e   : > { %818 = vmatmul.mubr.bf16.gmra.mrb[44].mxu0 %v1327_v63  ;;  %946 = vmatmul.mubr.bf16.gmra.mrb[44].mxu1 %v1328_v0 }
  0x9f   : > { %825 = vmatprep.mubr.bf16.mxu0 %v1329_v1  ;;  %953 = vmatprep.mubr.bf16.mxu1 %v1331_v2 }
  0xa6   : > { %826 = vmatmul.mubr.bf16.gmra.mrb[48].mxu0 %v1333_v3  ;;  %954 = vmatmul.mubr.bf16.gmra.mrb[48].mxu1 %v1334_v4 }
  0xa7   : > { %833 = vmatprep.mubr.bf16.mxu0 %v1335_v5  ;;  %961 = vmatprep.mubr.bf16.mxu1 %v1337_v6 }
  0xae   : > { %834 = vmatmul.mubr.bf16.gmra.mrb[52].mxu0 %v1339_v7  ;;  %962 = vmatmul.mubr.bf16.gmra.mrb[52].mxu1 %v1340_v8 }
  0xaf   : > { %841 = vmatprep.mubr.bf16.mxu0 %v1341_v9  ;;  %969 = vmatprep.mubr.bf16.mxu1 %v1343_v10 }
  0xb6   : > { %842 = vmatmul.mubr.bf16.gmra.mrb[56].mxu0 %v1345_v11  ;;  %970 = vmatmul.mubr.bf16.gmra.mrb[56].mxu1 %v1346_v12 }
  0xb7   : > { %849 = vmatprep.mubr.bf16.mxu0 %v1347_v13  ;;  %977 = vmatprep.mubr.bf16.mxu1 %v1349_v14 }
  0xbe   : > { %850 = vmatmul.mubr.bf16.gmra.mrb[60].mxu0 %v1351_v15  ;;  %978 = vmatmul.mubr.bf16.gmra.mrb[60].mxu1 %v1352_v16 }
 0x119   : > { %v731_v18 = vpop.f32.mrb[0].mxu0  ;;  %v859_v19 = vpop.f32.mrb[0].mxu1 }
 0x11a   : > { %v732_v20 = vadd.f32 %v1547_v17, %v731_v18  ;;  %v860_v21 = vadd.f32 %v1547_v17, %v859_v19  ;;  %v733_v22 = vpop.f32.mrb[1].mxu0  ;;  %v861_v23 = vpop.f32.mrb[1].mxu1 }
 0x11b   : > { %v734_v24 = vpop.f32.mrb[2].mxu0  ;;  %v862_v25 = vpop.f32.mrb[2].mxu1 }
 0x11c   : > { %986 = vst [vmem:[%s1554_s5] sm:$0xff] %v732_v20  ;;  %1018 = vst [vmem:[%s1554_s5 + $0x100] sm:$0xff] %v860_v21  ;;  %v735_v26 = vadd.f32 %v1547_v17, %v734_v24  ;;  %v863_v27 = vadd.f32 %v1547_v17, %v862_v25  ;;  %v736_v28 = vpop.f32.mrb[3].mxu0  ;;  %v864_v29 = vpop.f32.mrb[3].mxu1 }
 0x11e   : > { %987 = vst [vmem:[%s1554_s5 + $0x8] sm:$0xff] %v735_v26  ;;  %1019 = vst [vmem:[%s1554_s5 + $0x108] sm:$0xff] %v863_v27 }
 0x121   : > { %v739_v30 = vpop.f32.mrb[4].mxu0  ;;  %v867_v31 = vpop.f32.mrb[4].mxu1 }
 0x122   : > { %v740_v32 = vadd.f32 %v1547_v17, %v739_v30  ;;  %v868_v33 = vadd.f32 %v1547_v17, %v867_v31  ;;  %v741_v34 = vpop.f32.mrb[5].mxu0  ;;  %v869_v35 = vpop.f32.mrb[5].mxu1 }
 0x123   : > { %v742_v36 = vpop.f32.mrb[6].mxu0  ;;  %v870_v37 = vpop.f32.mrb[6].mxu1 }
 0x124   : > { %988 = vst [vmem:[%s1554_s5 + $0x10] sm:$0xff] %v740_v32  ;;  %1020 = vst [vmem:[%s1554_s5 + $0x110] sm:$0xff] %v868_v33  ;;  %v743_v38 = vadd.f32 %v1547_v17, %v742_v36  ;;  %v871_v39 = vadd.f32 %v1547_v17, %v870_v37  ;;  %v744_v40 = vpop.f32.mrb[7].mxu0  ;;  %v872_v41 = vpop.f32.mrb[7].mxu1 }
 0x126   : > { %989 = vst [vmem:[%s1554_s5 + $0x18] sm:$0xff] %v743_v38  ;;  %1021 = vst [vmem:[%s1554_s5 + $0x118] sm:$0xff] %v871_v39 }
 0x129   : > { %v747_v42 = vpop.f32.mrb[8].mxu0  ;;  %v875_v43 = vpop.f32.mrb[8].mxu1 }
 0x12a   : > { %v748_v44 = vadd.f32 %v1547_v17, %v747_v42  ;;  %v876_v45 = vadd.f32 %v1547_v17, %v875_v43  ;;  %v749_v46 = vpop.f32.mrb[9].mxu0  ;;  %v877_v47 = vpop.f32.mrb[9].mxu1 }
 0x12b   : > { %v750_v48 = vpop.f32.mrb[10].mxu0  ;;  %v878_v49 = vpop.f32.mrb[10].mxu1 }
 0x12c   : > { %990 = vst [vmem:[%s1554_s5 + $0x20] sm:$0xff] %v748_v44  ;;  %1022 = vst [vmem:[%s1554_s5 + $0x120] sm:$0xff] %v876_v45  ;;  %v751_v50 = vadd.f32 %v1547_v17, %v750_v48  ;;  %v879_v51 = vadd.f32 %v1547_v17, %v878_v49  ;;  %v752_v52 = vpop.f32.mrb[11].mxu0  ;;  %v880_v53 = vpop.f32.mrb[11].mxu1 }
 0x12e   : > { %991 = vst [vmem:[%s1554_s5 + $0x28] sm:$0xff] %v751_v50  ;;  %1023 = vst [vmem:[%s1554_s5 + $0x128] sm:$0xff] %v879_v51 }
 0x131   : > { %v755_v54 = vpop.f32.mrb[12].mxu0  ;;  %v883_v55 = vpop.f32.mrb[12].mxu1 }
 0x132   : > { %v756_v56 = vadd.f32 %v1547_v17, %v755_v54  ;;  %v884_v57 = vadd.f32 %v1547_v17, %v883_v55  ;;  %v757_v58 = vpop.f32.mrb[13].mxu0  ;;  %v885_v59 = vpop.f32.mrb[13].mxu1 }
 0x133   : > { %v758_v60 = vpop.f32.mrb[14].mxu0  ;;  %v886_v61 = vpop.f32.mrb[14].mxu1 }
 0x134   : > { %992 = vst [vmem:[%s1554_s5 + $0x30] sm:$0xff] %v756_v56  ;;  %1024 = vst [vmem:[%s1554_s5 + $0x130] sm:$0xff] %v884_v57  ;;  %v759_v62 = vadd.f32 %v1547_v17, %v758_v60  ;;  %v887_v63 = vadd.f32 %v1547_v17, %v886_v61  ;;  %v760_v0 = vpop.f32.mrb[15].mxu0  ;;  %v888_v1 = vpop.f32.mrb[15].mxu1 }
 0x136   : > { %993 = vst [vmem:[%s1554_s5 + $0x38] sm:$0xff] %v759_v62  ;;  %1025 = vst [vmem:[%s1554_s5 + $0x138] sm:$0xff] %v887_v63 }
 0x139   : > { %v763_v2 = vpop.f32.mrb[16].mxu0  ;;  %v891_v3 = vpop.f32.mrb[16].mxu1 }
 0x13a   : > { %v764_v4 = vadd.f32 %v1547_v17, %v763_v2  ;;  %v892_v5 = vadd.f32 %v1547_v17, %v891_v3  ;;  %v765_v6 = vpop.f32.mrb[17].mxu0  ;;  %v893_v7 = vpop.f32.mrb[17].mxu1 }
 0x13b   : > { %v766_v8 = vpop.f32.mrb[18].mxu0  ;;  %v894_v9 = vpop.f32.mrb[18].mxu1 }
 0x13c   : > { %994 = vst [vmem:[%s1554_s5 + $0x40] sm:$0xff] %v764_v4  ;;  %1026 = vst [vmem:[%s1554_s5 + $0x140] sm:$0xff] %v892_v5  ;;  %v767_v10 = vadd.f32 %v1547_v17, %v766_v8  ;;  %v895_v11 = vadd.f32 %v1547_v17, %v894_v9  ;;  %v768_v12 = vpop.f32.mrb[19].mxu0  ;;  %v896_v13 = vpop.f32.mrb[19].mxu1 }
 0x13e   : > { %995 = vst [vmem:[%s1554_s5 + $0x48] sm:$0xff] %v767_v10  ;;  %1027 = vst [vmem:[%s1554_s5 + $0x148] sm:$0xff] %v895_v11 }
 0x141   : > { %v771_v14 = vpop.f32.mrb[20].mxu0  ;;  %v899_v15 = vpop.f32.mrb[20].mxu1 }
 0x142   : > { %v772_v16 = vadd.f32 %v1547_v17, %v771_v14  ;;  %v900_v18 = vadd.f32 %v1547_v17, %v899_v15  ;;  %v773_v19 = vpop.f32.mrb[21].mxu0  ;;  %v901_v20 = vpop.f32.mrb[21].mxu1 }
 0x143   : > { %v774_v21 = vpop.f32.mrb[22].mxu0  ;;  %v902_v22 = vpop.f32.mrb[22].mxu1 }
 0x144   : > { %996 = vst [vmem:[%s1554_s5 + $0x50] sm:$0xff] %v772_v16  ;;  %1028 = vst [vmem:[%s1554_s5 + $0x150] sm:$0xff] %v900_v18  ;;  %v775_v23 = vadd.f32 %v1547_v17, %v774_v21  ;;  %v903_v24 = vadd.f32 %v1547_v17, %v902_v22  ;;  %v776_v25 = vpop.f32.mrb[23].mxu0  ;;  %v904_v26 = vpop.f32.mrb[23].mxu1 }
 0x146   : > { %997 = vst [vmem:[%s1554_s5 + $0x58] sm:$0xff] %v775_v23  ;;  %1029 = vst [vmem:[%s1554_s5 + $0x158] sm:$0xff] %v903_v24 }
 0x149   : > { %v779_v27 = vpop.f32.mrb[24].mxu0  ;;  %v907_v28 = vpop.f32.mrb[24].mxu1 }
 0x14a   : > { %v780_v29 = vadd.f32 %v1547_v17, %v779_v27  ;;  %v908_v30 = vadd.f32 %v1547_v17, %v907_v28  ;;  %v781_v31 = vpop.f32.mrb[25].mxu0  ;;  %v909_v32 = vpop.f32.mrb[25].mxu1 }
 0x14b   : > { %v782_v33 = vpop.f32.mrb[26].mxu0  ;;  %v910_v34 = vpop.f32.mrb[26].mxu1 }
 0x14c   : > { %998 = vst [vmem:[%s1554_s5 + $0x60] sm:$0xff] %v780_v29  ;;  %1030 = vst [vmem:[%s1554_s5 + $0x160] sm:$0xff] %v908_v30  ;;  %v783_v35 = vadd.f32 %v1547_v17, %v782_v33  ;;  %v911_v36 = vadd.f32 %v1547_v17, %v910_v34  ;;  %v784_v37 = vpop.f32.mrb[27].mxu0  ;;  %v912_v38 = vpop.f32.mrb[27].mxu1 }
 0x14e   : > { %999 = vst [vmem:[%s1554_s5 + $0x68] sm:$0xff] %v783_v35  ;;  %1031 = vst [vmem:[%s1554_s5 + $0x168] sm:$0xff] %v911_v36 }
 0x151   : > { %v787_v39 = vpop.f32.mrb[28].mxu0  ;;  %v915_v40 = vpop.f32.mrb[28].mxu1 }
 0x152   : > { %v788_v41 = vadd.f32 %v1547_v17, %v787_v39  ;;  %v916_v42 = vadd.f32 %v1547_v17, %v915_v40  ;;  %v789_v43 = vpop.f32.mrb[29].mxu0  ;;  %v917_v44 = vpop.f32.mrb[29].mxu1 }
 0x153   : > { %v790_v45 = vpop.f32.mrb[30].mxu0  ;;  %v918_v46 = vpop.f32.mrb[30].mxu1 }
 0x154   : > { %1000 = vst [vmem:[%s1554_s5 + $0x70] sm:$0xff] %v788_v41  ;;  %1032 = vst [vmem:[%s1554_s5 + $0x170] sm:$0xff] %v916_v42  ;;  %v791_v47 = vadd.f32 %v1547_v17, %v790_v45  ;;  %v919_v48 = vadd.f32 %v1547_v17, %v918_v46  ;;  %v792_v49 = vpop.f32.mrb[31].mxu0  ;;  %v920_v50 = vpop.f32.mrb[31].mxu1 }
 0x156   : > { %1001 = vst [vmem:[%s1554_s5 + $0x78] sm:$0xff] %v791_v47  ;;  %1033 = vst [vmem:[%s1554_s5 + $0x178] sm:$0xff] %v919_v48 }
 0x159   : > { %v795_v51 = vpop.f32.mrb[32].mxu0  ;;  %v923_v52 = vpop.f32.mrb[32].mxu1 }
 0x15a   : > { %v796_v53 = vadd.f32 %v1547_v17, %v795_v51  ;;  %v924_v54 = vadd.f32 %v1547_v17, %v923_v52  ;;  %v797_v55 = vpop.f32.mrb[33].mxu0  ;;  %v925_v56 = vpop.f32.mrb[33].mxu1 }
 0x15b   : > { %v798_v57 = vpop.f32.mrb[34].mxu0  ;;  %v926_v58 = vpop.f32.mrb[34].mxu1 }
 0x15c   : > { %1002 = vst [vmem:[%s1554_s5 + $0x80] sm:$0xff] %v796_v53  ;;  %1034 = vst [vmem:[%s1554_s5 + $0x180] sm:$0xff] %v924_v54  ;;  %v799_v59 = vadd.f32 %v1547_v17, %v798_v57  ;;  %v927_v60 = vadd.f32 %v1547_v17, %v926_v58  ;;  %v800_v61 = vpop.f32.mrb[35].mxu0  ;;  %v928_v62 = vpop.f32.mrb[35].mxu1 }
 0x15e   : > { %1003 = vst [vmem:[%s1554_s5 + $0x88] sm:$0xff] %v799_v59  ;;  %1035 = vst [vmem:[%s1554_s5 + $0x188] sm:$0xff] %v927_v60 }
 0x161   : > { %v803_v63 = vpop.f32.mrb[36].mxu0  ;;  %v931_v0 = vpop.f32.mrb[36].mxu1 }
 0x162   : > { %v804_v1 = vadd.f32 %v1547_v17, %v803_v63  ;;  %v932_v2 = vadd.f32 %v1547_v17, %v931_v0  ;;  %v805_v3 = vpop.f32.mrb[37].mxu0  ;;  %v933_v4 = vpop.f32.mrb[37].mxu1 }
 0x163   : > { %v806_v5 = vpop.f32.mrb[38].mxu0  ;;  %v934_v6 = vpop.f32.mrb[38].mxu1 }
 0x164   : > { %1004 = vst [vmem:[%s1554_s5 + $0x90] sm:$0xff] %v804_v1  ;;  %1036 = vst [vmem:[%s1554_s5 + $0x190] sm:$0xff] %v932_v2  ;;  %v807_v7 = vadd.f32 %v1547_v17, %v806_v5  ;;  %v935_v8 = vadd.f32 %v1547_v17, %v934_v6  ;;  %v808_v9 = vpop.f32.mrb[39].mxu0  ;;  %v936_v10 = vpop.f32.mrb[39].mxu1 }
 0x166   : > { %1005 = vst [vmem:[%s1554_s5 + $0x98] sm:$0xff] %v807_v7  ;;  %1037 = vst [vmem:[%s1554_s5 + $0x198] sm:$0xff] %v935_v8 }
 0x169   : > { %v811_v11 = vpop.f32.mrb[40].mxu0  ;;  %v939_v12 = vpop.f32.mrb[40].mxu1 }
 0x16a   : > { %v812_v13 = vadd.f32 %v1547_v17, %v811_v11  ;;  %v940_v14 = vadd.f32 %v1547_v17, %v939_v12  ;;  %v813_v15 = vpop.f32.mrb[41].mxu0  ;;  %v941_v16 = vpop.f32.mrb[41].mxu1 }
 0x16b   : > { %v814_v18 = vpop.f32.mrb[42].mxu0  ;;  %v942_v19 = vpop.f32.mrb[42].mxu1 }
 0x16c   : > { %1006 = vst [vmem:[%s1554_s5 + $0xa0] sm:$0xff] %v812_v13  ;;  %1038 = vst [vmem:[%s1554_s5 + $0x1a0] sm:$0xff] %v940_v14  ;;  %v815_v20 = vadd.f32 %v1547_v17, %v814_v18  ;;  %v943_v21 = vadd.f32 %v1547_v17, %v942_v19  ;;  %v816_v22 = vpop.f32.mrb[43].mxu0  ;;  %v944_v23 = vpop.f32.mrb[43].mxu1 }
 0x16e   : > { %1007 = vst [vmem:[%s1554_s5 + $0xa8] sm:$0xff] %v815_v20  ;;  %1039 = vst [vmem:[%s1554_s5 + $0x1a8] sm:$0xff] %v943_v21 }
 0x171   : > { %v819_v24 = vpop.f32.mrb[44].mxu0  ;;  %v947_v25 = vpop.f32.mrb[44].mxu1 }
 0x172   : > { %v820_v26 = vadd.f32 %v1547_v17, %v819_v24  ;;  %v948_v27 = vadd.f32 %v1547_v17, %v947_v25  ;;  %v821_v28 = vpop.f32.mrb[45].mxu0  ;;  %v949_v29 = vpop.f32.mrb[45].mxu1 }
 0x173   : > { %v822_v30 = vpop.f32.mrb[46].mxu0  ;;  %v950_v31 = vpop.f32.mrb[46].mxu1 }
 0x174   : > { %1008 = vst [vmem:[%s1554_s5 + $0xb0] sm:$0xff] %v820_v26  ;;  %1040 = vst [vmem:[%s1554_s5 + $0x1b0] sm:$0xff] %v948_v27  ;;  %v823_v32 = vadd.f32 %v1547_v17, %v822_v30  ;;  %v951_v33 = vadd.f32 %v1547_v17, %v950_v31  ;;  %v824_v34 = vpop.f32.mrb[47].mxu0  ;;  %v952_v35 = vpop.f32.mrb[47].mxu1 }
 0x176   : > { %1009 = vst [vmem:[%s1554_s5 + $0xb8] sm:$0xff] %v823_v32  ;;  %1041 = vst [vmem:[%s1554_s5 + $0x1b8] sm:$0xff] %v951_v33 }
 0x179   : > { %v827_v36 = vpop.f32.mrb[48].mxu0  ;;  %v955_v37 = vpop.f32.mrb[48].mxu1 }
 0x17a   : > { %v828_v38 = vadd.f32 %v1547_v17, %v827_v36  ;;  %v956_v39 = vadd.f32 %v1547_v17, %v955_v37  ;;  %v829_v40 = vpop.f32.mrb[49].mxu0  ;;  %v957_v41 = vpop.f32.mrb[49].mxu1 }
 0x17b   : > { %v830_v42 = vpop.f32.mrb[50].mxu0  ;;  %v958_v43 = vpop.f32.mrb[50].mxu1 }
 0x17c   : > { %1010 = vst [vmem:[%s1554_s5 + $0xc0] sm:$0xff] %v828_v38  ;;  %1042 = vst [vmem:[%s1554_s5 + $0x1c0] sm:$0xff] %v956_v39  ;;  %v831_v44 = vadd.f32 %v1547_v17, %v830_v42  ;;  %v959_v45 = vadd.f32 %v1547_v17, %v958_v43  ;;  %v832_v46 = vpop.f32.mrb[51].mxu0  ;;  %v960_v47 = vpop.f32.mrb[51].mxu1 }
 0x17e   : > { %1011 = vst [vmem:[%s1554_s5 + $0xc8] sm:$0xff] %v831_v44  ;;  %1043 = vst [vmem:[%s1554_s5 + $0x1c8] sm:$0xff] %v959_v45 }
 0x181   : > { %v835_v48 = vpop.f32.mrb[52].mxu0  ;;  %v963_v49 = vpop.f32.mrb[52].mxu1 }
 0x182   : > { %v836_v50 = vadd.f32 %v1547_v17, %v835_v48  ;;  %v964_v51 = vadd.f32 %v1547_v17, %v963_v49  ;;  %v837_v52 = vpop.f32.mrb[53].mxu0  ;;  %v965_v53 = vpop.f32.mrb[53].mxu1 }
 0x183   : > { %v838_v54 = vpop.f32.mrb[54].mxu0  ;;  %v966_v55 = vpop.f32.mrb[54].mxu1 }
 0x184   : > { %1012 = vst [vmem:[%s1554_s5 + $0xd0] sm:$0xff] %v836_v50  ;;  %1044 = vst [vmem:[%s1554_s5 + $0x1d0] sm:$0xff] %v964_v51  ;;  %v839_v56 = vadd.f32 %v1547_v17, %v838_v54  ;;  %v967_v57 = vadd.f32 %v1547_v17, %v966_v55  ;;  %v840_v58 = vpop.f32.mrb[55].mxu0  ;;  %v968_v59 = vpop.f32.mrb[55].mxu1 }
 0x186   : > { %1013 = vst [vmem:[%s1554_s5 + $0xd8] sm:$0xff] %v839_v56  ;;  %1045 = vst [vmem:[%s1554_s5 + $0x1d8] sm:$0xff] %v967_v57 }
 0x189   : > { %v843_v60 = vpop.f32.mrb[56].mxu0  ;;  %v971_v61 = vpop.f32.mrb[56].mxu1 }
 0x18a   : > { %v844_v62 = vadd.f32 %v1547_v17, %v843_v60  ;;  %v972_v63 = vadd.f32 %v1547_v17, %v971_v61  ;;  %v845_v0 = vpop.f32.mrb[57].mxu0  ;;  %v973_v1 = vpop.f32.mrb[57].mxu1 }
 0x18b   : > { %v846_v2 = vpop.f32.mrb[58].mxu0  ;;  %v974_v3 = vpop.f32.mrb[58].mxu1 }
 0x18c   : > { %1014 = vst [vmem:[%s1554_s5 + $0xe0] sm:$0xff] %v844_v62  ;;  %1046 = vst [vmem:[%s1554_s5 + $0x1e0] sm:$0xff] %v972_v63  ;;  %v847_v4 = vadd.f32 %v1547_v17, %v846_v2  ;;  %v975_v5 = vadd.f32 %v1547_v17, %v974_v3  ;;  %v848_v6 = vpop.f32.mrb[59].mxu0  ;;  %v976_v7 = vpop.f32.mrb[59].mxu1 }
 0x18e   : > { %1015 = vst [vmem:[%s1554_s5 + $0xe8] sm:$0xff] %v847_v4  ;;  %1047 = vst [vmem:[%s1554_s5 + $0x1e8] sm:$0xff] %v975_v5 }
 0x191   : > { %v851_v8 = vpop.f32.mrb[60].mxu0  ;;  %v979_v9 = vpop.f32.mrb[60].mxu1 }
 0x192   : > { %v852_v10 = vadd.f32 %v1547_v17, %v851_v8  ;;  %v980_v11 = vadd.f32 %v1547_v17, %v979_v9  ;;  %v853_v12 = vpop.f32.mrb[61].mxu0  ;;  %v981_v13 = vpop.f32.mrb[61].mxu1 }
 0x193   : > { %v854_v14 = vpop.f32.mrb[62].mxu0  ;;  %v982_v15 = vpop.f32.mrb[62].mxu1 }
 0x194   : > { %1016 = vst [vmem:[%s1554_s5 + $0xf0] sm:$0xff] %v852_v10  ;;  %1048 = vst [vmem:[%s1554_s5 + $0x1f0] sm:$0xff] %v980_v11  ;;  %v855_v16 = vadd.f32 %v1547_v17, %v854_v14  ;;  %v983_v18 = vadd.f32 %v1547_v17, %v982_v15  ;;  %v856_v19 = vpop.f32.mrb[63].mxu0  ;;  %v984_v20 = vpop.f32.mrb[63].mxu1 }
 0x196   : > { %1017 = vst [vmem:[%s1554_s5 + $0xf8] sm:$0xff] %v855_v16  ;;  %1049 = vst [vmem:[%s1554_s5 + $0x1f8] sm:$0xff] %v983_v18 }
 0x197 PF: > { %s13_s12 = sadd.s32 1, %s1359_s12  }
 0x198   : > { %p10_p4 = scmp.ge.s32.totalorder %s13_s12, 4  }
 0x19a   :  { %12 = sbr.rel (!%p10_p4) target bundleno = 1 (0x1), region = 62 }

</bundles_post_ra>
